<compile_context>
chip_gen: v7x
topology: tpu7x:2x2x1
jax: 0.10.0
libtpu: 0.0.40
codegen_flags: <defaults>
</compile_context>

<pallas_src>
import jax
import jax.numpy as jnp
from jax import lax
from jax.experimental import pallas as pl
from jax.experimental.pallas import tpu as pltpu


# ----------------------------------------------------------------------------
# Fused Pallas kernel: conv1 -> slice -> conv2 -> slice -> fc1 -> fc2 -> out
# (convs + slices already folded into dense, lane-padded matrices)
# ----------------------------------------------------------------------------

def _fused_forward_kernel(x_ref,
                          w1_ref, b1_ref,     # densified conv1 (+slice): 784 -> 896
                          w2_ref, b2_ref,     # densified conv2 (+slice): 896 -> 256
                          w3_ref, b3_ref,     # fc1: 256 -> 128
                          w4_ref, b4_ref,     # fc2: 128 -> 128
                          w5_ref, b5_ref,     # out: 128 -> 128 (cols 10.. are 0)
                          o_ref):
    f32, bf16 = jnp.float32, jnp.bfloat16

    def layer(h, w_ref, b_ref, relu=True):
        y = jnp.dot(h, w_ref[...], preferred_element_type=f32) + b_ref[...]
        return jnp.maximum(y, 0.0) if relu else y

    h = x_ref[...]                                      # (TB, 784) bf16
    h = layer(h, w1_ref, b1_ref).astype(bf16)           # relu(conv1 fold) (TB, 896)
    h = layer(h, w2_ref, b2_ref).astype(bf16)           # relu(conv2 fold) (TB, 256)
    h = layer(h, w3_ref, b3_ref).astype(bf16)           # relu(fc1)        (TB, 128)
    h = layer(h, w4_ref, b4_ref).astype(bf16)           # relu(fc2)        (TB, 128)
    o_ref[...] = layer(h, w5_ref, b5_ref, relu=False)   # out, f32         (TB, 128)


def _round_up(x, m):
    return ((x + m - 1) // m) * m


def _const_spec(shape, single_buffer):
    # Weights/biases: constant index_map -> fetched once, VMEM-resident.
    # Single-buffer them to halve their VMEM footprint when supported.
    if single_buffer and hasattr(pl, "Buffered"):
        try:
            return pl.BlockSpec(shape, lambda b: (0, 0), pipeline_mode=pl.Buffered(1))
        except TypeError:
            pass
    return pl.BlockSpec(shape, lambda b: (0, 0))


def cnn_new_forward(prep, x, *, max_batch_tile=512, single_buffer_weights=True):
    """Forward pass of CNN_NEW. `prep` = prepare_params(params); x: (B, 1, 28, 28)."""
    B = x.shape[0]
    xf = x.reshape(B, 28 * 28).astype(jnp.bfloat16)   # NCHW flatten (C=1) -> 784

    # Batch tile: multiple of 8 (sublane), capped by max_batch_tile.  When the
    # batch allows it, force >= 2 grid steps so both v7x TensorCores run.
    tb = min(max_batch_tile, _round_up(B, 8))
    if B > 8 and _round_up(B, tb) // tb < 2:
        tb = _round_up(pl.cdiv(B, 2), 8)
    bp = _round_up(B, tb)
    if bp != B:
        xf = jnp.pad(xf, ((0, bp - B), (0, 0)))

    # Input streamed over the batch grid; weights/biases resident (constant maps).
    in_specs = [pl.BlockSpec((tb, 28 * 28), lambda b: (b, 0))]
    in_specs += [_const_spec(p.shape, single_buffer_weights) for p in prep]

    out = pl.pallas_call(
        _fused_forward_kernel,
        out_shape=jax.ShapeDtypeStruct((bp, 128), jnp.float32),   # lane-dense slab
        grid=(bp // tb,),
        in_specs=in_specs,
        out_specs=pl.BlockSpec((tb, 128), lambda b: (b, 0)),
        compiler_params=pltpu.CompilerParams(
            dimension_semantics=("parallel",),       # batch tiles -> megacore / 2 TCs
            vmem_limit_bytes=32 * 1024 * 1024,
        ),
    )(xf, *prep)
    return out[:B, :10]


# ----------------------------------------------------------------------------
# One-time weight preparation: fold conv1/conv2 and the dead-channel slices
# into dense matrices (exact), then pad lane dims to 128 and cast to bf16.
# ----------------------------------------------------------------------------

def _densify_convs(params):
    """Fold conv1/conv2 + the slice tricks into exact dense f32 matrices."""
    w1 = params["conv1_w"]          # (6, 1, 5, 5)
    b1 = params["conv1_b"]          # (6,)
    w2 = params["conv2_w"]          # (12, 6, 5, 5)
    b2 = params["conv2_b"]          # (12,)

    # conv1 (+ slice to first 864 NCHW-flattened values): 784 -> 864.
    # q < 576 -> channel 0 (full); 576 <= q < 864 -> channel 1 rows 0..11.
    q = jnp.arange(6 * 12 * 12)
    oc1 = q // (24 * 24)
    p = q - oc1 * (24 * 24)
    r1, c1 = p // 24, p % 24
    tap1 = jnp.arange(25)
    ki1, kj1 = tap1 // 5, tap1 % 5
    rows1 = (r1[None, :] + ki1[:, None]) * 28 + (c1[None, :] + kj1[:, None])   # (25, 864)
    cols1 = jnp.broadcast_to(q[None, :], rows1.shape)
    vals1 = w1.reshape(6, 25)[oc1[None, :], tap1[:, None]]                     # (25, 864)
    w1d = jnp.zeros((784, 864), jnp.float32).at[rows1, cols1].add(vals1)
    b1d = b1[oc1]                                                              # (864,)

    # conv2 (+ slice to first 192 values == channels 0..2): 864 -> 192.
    m = jnp.arange(12 * 4 * 4)
    oc2 = m // 64
    oh, ow = (m % 64) // 8, m % 8
    tap2 = jnp.arange(150)
    ic2, ki2, kj2 = tap2 // 25, (tap2 % 25) // 5, tap2 % 5
    rows2 = (ic2[:, None] * 144
             + (oh[None, :] + ki2[:, None]) * 12
             + (ow[None, :] + kj2[:, None]))                                   # (150, 192)
    cols2 = jnp.broadcast_to(m[None, :], rows2.shape)
    vals2 = w2.reshape(12, 150)[oc2[None, :], tap2[:, None]]                   # (150, 192)
    w2d = jnp.zeros((864, 192), jnp.float32).at[rows2, cols2].add(vals2)
    b2d = b2[oc2]                                                              # (192,)

    return w1d, b1d, w2d, b2d


def prepare_params(params, compute_dtype=jnp.bfloat16):
    w1d, b1d, w2d, b2d = _densify_convs(params)

    def pad_w(w, rows, cols):
        w = jnp.pad(w, ((0, rows - w.shape[0]), (0, cols - w.shape[1])))
        return w.astype(compute_dtype)

    def pad_b(b, cols):
        b = b.reshape(1, -1).astype(jnp.float32)
        return jnp.pad(b, ((0, 0), (0, cols - b.shape[1])))

    return (
        pad_w(w1d, 784, 896),              pad_b(b1d, 896),
        pad_w(w2d, 896, 256),              pad_b(b2d, 256),
        pad_w(params["fc1_w"], 256, 128),  pad_b(params["fc1_b"], 128),
        pad_w(params["fc2_w"], 128, 128),  pad_b(params["fc2_b"], 128),
        pad_w(params["out_w"], 128, 128),  pad_b(params["out_b"], 128),
    )


# ----------------------------------------------------------------------------
# Parameter init (PyTorch-style U(-1/sqrt(fan_in), 1/sqrt(fan_in)))
# ----------------------------------------------------------------------------

def init_params(key):
    ks = jax.random.split(key, 10)

    def lin(kw, kb, fan_in, shape_w, shape_b):
        s = 1.0 / jnp.sqrt(jnp.float32(fan_in))
        w = jax.random.uniform(kw, shape_w, jnp.float32, -s, s)
        b = jax.random.uniform(kb, shape_b, jnp.float32, -s, s)
        return w, b

    p = {}
    p["conv1_w"], p["conv1_b"] = lin(ks[0], ks[1], 1 * 5 * 5, (6, 1, 5, 5), (6,))
    p["conv2_w"], p["conv2_b"] = lin(ks[2], ks[3], 6 * 5 * 5, (12, 6, 5, 5), (12,))
    p["fc1_w"], p["fc1_b"] = lin(ks[4], ks[5], 192, (192, 120), (120,))
    p["fc2_w"], p["fc2_b"] = lin(ks[6], ks[7], 120, (120, 60), (60,))
    p["out_w"], p["out_b"] = lin(ks[8], ks[9], 60, (60, 10), (10,))
    return p


# ----------------------------------------------------------------------------
# Pure-JAX references for validation
# ----------------------------------------------------------------------------

def reference_forward(params, x):
    """Step-by-step mirror of the PyTorch module (f32, HIGHEST precision)."""
    dn = ("NCHW", "OIHW", "NCHW")
    hp = lax.Precision.HIGHEST
    t = lax.conv_general_dilated(x, params["conv1_w"], (1, 1), "VALID",
                                 dimension_numbers=dn, precision=hp)
    t = jax.nn.relu(t + params["conv1_b"].reshape(1, -1, 1, 1))
    t = t.reshape(-1, 6 * 24 * 24)[:, : 6 * 12 * 12].reshape(-1, 6, 12, 12)
    t = lax.conv_general_dilated(t, params["conv2_w"], (1, 1), "VALID",
                                 dimension_numbers=dn, precision=hp)
    t = jax.nn.relu(t + params["conv2_b"].reshape(1, -1, 1, 1))
    t = t.reshape(-1, 12 * 8 * 8)[:, : 12 * 4 * 4].reshape(-1, 12 * 4 * 4)
    t = jax.nn.relu(jnp.dot(t, params["fc1_w"], precision=hp) + params["fc1_b"])
    t = jax.nn.relu(jnp.dot(t, params["fc2_w"], precision=hp) + params["fc2_b"])
    return jnp.dot(t, params["out_w"], precision=hp) + params["out_b"]


def dense_fold_reference(params, x):
    """f32 check of the conv/slice -> dense-matrix fold (tight tolerance)."""
    hp = lax.Precision.HIGHEST
    w1d, b1d, w2d, b2d = _densify_convs(params)
    h = x.reshape(x.shape[0], 784)
    h = jax.nn.relu(jnp.dot(h, w1d, precision=hp) + b1d)
    h = jax.nn.relu(jnp.dot(h, w2d, precision=hp) + b2d)
    h = jax.nn.relu(jnp.dot(h, params["fc1_w"], precision=hp) + params["fc1_b"])
    h = jax.nn.relu(jnp.dot(h, params["fc2_w"], precision=hp) + params["fc2_b"])
    return jnp.dot(h, params["out_w"], precision=hp) + params["out_b"]


if __name__ == "__main__":
    key = jax.random.PRNGKey(0)
    k_in, k_par = jax.random.split(key)

    # Input shape is dictated by the module: fc1 expects 12*4*4 features after
    # the conv/slice pipeline, which requires a 28x28 single-channel input.
    x = jax.random.normal(k_in, (2, 1, 28, 28), jnp.float32)
    params = init_params(k_par)

    # (a) Exact weight-fold check in f32 (tight tolerance, independent of bf16).
    ref = jax.block_until_ready(reference_forward(params, x))
    fold = jax.block_until_ready(dense_fold_reference(params, x))
    fold_err = float(jnp.max(jnp.abs(fold - ref)))
    assert fold_err < 1e-3, f"weight-fold mismatch vs reference: max abs err {fold_err}"

    # (b) Fused bf16 Pallas kernel vs the same reference (bf16 tolerance).
    prep = prepare_params(params)              # one-time, weight-only preprocessing
    try:
        fwd = jax.jit(lambda p, xx: cnn_new_forward(p, xx, single_buffer_weights=True))
        out = jax.block_until_ready(fwd(prep, x))
    except Exception:
        # Fallback if this JAX/Mosaic version rejects pl.Buffered(1) block specs.
        fwd = jax.jit(lambda p, xx: cnn_new_forward(p, xx, single_buffer_weights=False))
        out = jax.block_until_ready(fwd(prep, x))

    assert out.shape == (2, 10) and out.dtype == jnp.float32
    max_err = float(jnp.max(jnp.abs(out - ref)))
    assert max_err < 5e-2, f"kernel mismatch vs reference: max abs err {max_err}"

    print("KERNEL_OK")
</pallas_src>

<mosaic_0001>
module attributes {stable_mosaic.version = 11 : i64} {
  func.func @_fused_forward_kernel(%arg0: i32, %arg1: memref<8x784xbf16, #tpu.memory_space<vmem>>, %arg2: memref<784x896xbf16, #tpu.memory_space<vmem>>, %arg3: memref<1x896xf32, #tpu.memory_space<vmem>>, %arg4: memref<896x256xbf16, #tpu.memory_space<vmem>>, %arg5: memref<1x256xf32, #tpu.memory_space<vmem>>, %arg6: memref<256x128xbf16, #tpu.memory_space<vmem>>, %arg7: memref<1x128xf32, #tpu.memory_space<vmem>>, %arg8: memref<128x128xbf16, #tpu.memory_space<vmem>>, %arg9: memref<1x128xf32, #tpu.memory_space<vmem>>, %arg10: memref<128x128xbf16, #tpu.memory_space<vmem>>, %arg11: memref<1x128xf32, #tpu.memory_space<vmem>>, %arg12: memref<8x128xf32, #tpu.memory_space<vmem>>) attributes {dimension_semantics = [#tpu.dimension_semantics<parallel>], iteration_bounds = array<i64: 1>, scalar_prefetch = 0 : i64, scratch_operands = 0 : i64, tpu.core_type = #tpu.core_type<tc>, window_params = [{transform_indices = @transform_0, window_bounds = array<i64: 8, 784>}, {pipeline_mode = #tpu.pipeline_mode<synchronous>, transform_indices = @transform_1, window_bounds = array<i64: 784, 896>}, {pipeline_mode = #tpu.pipeline_mode<synchronous>, transform_indices = @transform_2, window_bounds = array<i64: 1, 896>}, {pipeline_mode = #tpu.pipeline_mode<synchronous>, transform_indices = @transform_3, window_bounds = array<i64: 896, 256>}, {pipeline_mode = #tpu.pipeline_mode<synchronous>, transform_indices = @transform_4, window_bounds = array<i64: 1, 256>}, {pipeline_mode = #tpu.pipeline_mode<synchronous>, transform_indices = @transform_5, window_bounds = array<i64: 256, 128>}, {pipeline_mode = #tpu.pipeline_mode<synchronous>, transform_indices = @transform_6, window_bounds = array<i64: 1, 128>}, {pipeline_mode = #tpu.pipeline_mode<synchronous>, transform_indices = @transform_7, window_bounds = array<i64: 128, 128>}, {pipeline_mode = #tpu.pipeline_mode<synchronous>, transform_indices = @transform_8, window_bounds = array<i64: 1, 128>}, {pipeline_mode = #tpu.pipeline_mode<synchronous>, transform_indices = @transform_9, window_bounds = array<i64: 128, 128>}, {pipeline_mode = #tpu.pipeline_mode<synchronous>, transform_indices = @transform_10, window_bounds = array<i64: 1, 128>}, {transform_indices = @transform_11, window_bounds = array<i64: 8, 128>}]} {
    %c0 = arith.constant 0 : index
    %c0_0 = arith.constant 0 : index
    %0 = vector.load %arg1[%c0, %c0_0] : memref<8x784xbf16, #tpu.memory_space<vmem>>, vector<8x784xbf16>
    %c0_1 = arith.constant 0 : index
    %c0_2 = arith.constant 0 : index
    %1 = vector.load %arg2[%c0_1, %c0_2] : memref<784x896xbf16, #tpu.memory_space<vmem>>, vector<784x896xbf16>
    %cst = arith.constant dense<0.000000e+00> : vector<8x896xf32>
    %2 = tpu.matmul %0, %1, %cst {dimension_numbers = #tpu.dot_dimension_numbers<[1], [0], [0], [1], [0, 0, 1, 1], [], []>} : vector<8x784xbf16>, vector<784x896xbf16>, vector<8x896xf32> -> vector<8x896xf32>
    %c0_3 = arith.constant 0 : index
    %c0_4 = arith.constant 0 : index
    %3 = vector.load %arg3[%c0_3, %c0_4] : memref<1x896xf32, #tpu.memory_space<vmem>>, vector<1x896xf32>
    %4 = vector.broadcast %3 : vector<1x896xf32> to vector<8x896xf32>
    %5 = arith.addf %2, %4 : vector<8x896xf32>
    %cst_5 = arith.constant 0.000000e+00 : f32
    %6 = vector.broadcast %cst_5 : f32 to vector<8x896xf32>
    %7 = arith.maximumf %5, %6 : vector<8x896xf32>
    %8 = arith.truncf %7 : vector<8x896xf32> to vector<8x896xbf16>
    %c0_6 = arith.constant 0 : index
    %c0_7 = arith.constant 0 : index
    %9 = vector.load %arg4[%c0_6, %c0_7] : memref<896x256xbf16, #tpu.memory_space<vmem>>, vector<896x256xbf16>
    %cst_8 = arith.constant dense<0.000000e+00> : vector<8x256xf32>
    %10 = tpu.matmul %8, %9, %cst_8 {dimension_numbers = #tpu.dot_dimension_numbers<[1], [0], [0], [1], [0, 0, 1, 1], [], []>} : vector<8x896xbf16>, vector<896x256xbf16>, vector<8x256xf32> -> vector<8x256xf32>
    %c0_9 = arith.constant 0 : index
    %c0_10 = arith.constant 0 : index
    %11 = vector.load %arg5[%c0_9, %c0_10] : memref<1x256xf32, #tpu.memory_space<vmem>>, vector<1x256xf32>
    %12 = vector.broadcast %11 : vector<1x256xf32> to vector<8x256xf32>
    %13 = arith.addf %10, %12 : vector<8x256xf32>
    %cst_11 = arith.constant 0.000000e+00 : f32
    %14 = vector.broadcast %cst_11 : f32 to vector<8x256xf32>
    %15 = arith.maximumf %13, %14 : vector<8x256xf32>
    %16 = arith.truncf %15 : vector<8x256xf32> to vector<8x256xbf16>
    %c0_12 = arith.constant 0 : index
    %c0_13 = arith.constant 0 : index
    %17 = vector.load %arg6[%c0_12, %c0_13] : memref<256x128xbf16, #tpu.memory_space<vmem>>, vector<256x128xbf16>
    %cst_14 = arith.constant dense<0.000000e+00> : vector<8x128xf32>
    %18 = tpu.matmul %16, %17, %cst_14 {dimension_numbers = #tpu.dot_dimension_numbers<[1], [0], [0], [1], [0, 0, 1, 1], [], []>} : vector<8x256xbf16>, vector<256x128xbf16>, vector<8x128xf32> -> vector<8x128xf32>
    %c0_15 = arith.constant 0 : index
    %c0_16 = arith.constant 0 : index
    %19 = vector.load %arg7[%c0_15, %c0_16] : memref<1x128xf32, #tpu.memory_space<vmem>>, vector<1x128xf32>
    %20 = vector.broadcast %19 : vector<1x128xf32> to vector<8x128xf32>
    %21 = arith.addf %18, %20 : vector<8x128xf32>
    %cst_17 = arith.constant 0.000000e+00 : f32
    %22 = vector.broadcast %cst_17 : f32 to vector<8x128xf32>
    %23 = arith.maximumf %21, %22 : vector<8x128xf32>
    %24 = arith.truncf %23 : vector<8x128xf32> to vector<8x128xbf16>
    %c0_18 = arith.constant 0 : index
    %c0_19 = arith.constant 0 : index
    %25 = vector.load %arg8[%c0_18, %c0_19] : memref<128x128xbf16, #tpu.memory_space<vmem>>, vector<128x128xbf16>
    %cst_20 = arith.constant dense<0.000000e+00> : vector<8x128xf32>
    %26 = tpu.matmul %24, %25, %cst_20 {dimension_numbers = #tpu.dot_dimension_numbers<[1], [0], [0], [1], [0, 0, 1, 1], [], []>} : vector<8x128xbf16>, vector<128x128xbf16>, vector<8x128xf32> -> vector<8x128xf32>
    %c0_21 = arith.constant 0 : index
    %c0_22 = arith.constant 0 : index
    %27 = vector.load %arg9[%c0_21, %c0_22] : memref<1x128xf32, #tpu.memory_space<vmem>>, vector<1x128xf32>
    %28 = vector.broadcast %27 : vector<1x128xf32> to vector<8x128xf32>
    %29 = arith.addf %26, %28 : vector<8x128xf32>
    %cst_23 = arith.constant 0.000000e+00 : f32
    %30 = vector.broadcast %cst_23 : f32 to vector<8x128xf32>
    %31 = arith.maximumf %29, %30 : vector<8x128xf32>
    %32 = arith.truncf %31 : vector<8x128xf32> to vector<8x128xbf16>
    %c0_24 = arith.constant 0 : index
    %c0_25 = arith.constant 0 : index
    %33 = vector.load %arg10[%c0_24, %c0_25] : memref<128x128xbf16, #tpu.memory_space<vmem>>, vector<128x128xbf16>
    %cst_26 = arith.constant dense<0.000000e+00> : vector<8x128xf32>
    %34 = tpu.matmul %32, %33, %cst_26 {dimension_numbers = #tpu.dot_dimension_numbers<[1], [0], [0], [1], [0, 0, 1, 1], [], []>} : vector<8x128xbf16>, vector<128x128xbf16>, vector<8x128xf32> -> vector<8x128xf32>
    %c0_27 = arith.constant 0 : index
    %c0_28 = arith.constant 0 : index
    %35 = vector.load %arg11[%c0_27, %c0_28] : memref<1x128xf32, #tpu.memory_space<vmem>>, vector<1x128xf32>
    %36 = vector.broadcast %35 : vector<1x128xf32> to vector<8x128xf32>
    %37 = arith.addf %34, %36 : vector<8x128xf32>
    %c0_29 = arith.constant 0 : index
    %c0_30 = arith.constant 0 : index
    %38 = vector.load %arg12[%c0_29, %c0_30] : memref<8x128xf32, #tpu.memory_space<vmem>>, vector<8x128xf32>
    tpu.vector_store %arg12[%c0_29, %c0_30], %37 {strides = array<i32>} : memref<8x128xf32, #tpu.memory_space<vmem>>, vector<8x128xf32>,
    return
  }
  func.func @transform_0(%arg0: i32) -> (i32, i32) {
    %c0_i32 = arith.constant 0 : i32
    %c0_i32_0 = arith.constant 0 : i32
    return %arg0, %c0_i32 : i32, i32
  }
  func.func @transform_1(%arg0: i32) -> (i32, i32) {
    %c0_i32 = arith.constant 0 : i32
    %c0_i32_0 = arith.constant 0 : i32
    %c0_i32_1 = arith.constant 0 : i32
    return %c0_i32, %c0_i32_0 : i32, i32
  }
  func.func @transform_2(%arg0: i32) -> (i32, i32) {
    %c0_i32 = arith.constant 0 : i32
    %c0_i32_0 = arith.constant 0 : i32
    %c0_i32_1 = arith.constant 0 : i32
    return %c0_i32, %c0_i32_0 : i32, i32
  }
  func.func @transform_3(%arg0: i32) -> (i32, i32) {
    %c0_i32 = arith.constant 0 : i32
    %c0_i32_0 = arith.constant 0 : i32
    %c0_i32_1 = arith.constant 0 : i32
    return %c0_i32, %c0_i32_0 : i32, i32
  }
  func.func @transform_4(%arg0: i32) -> (i32, i32) {
    %c0_i32 = arith.constant 0 : i32
    %c0_i32_0 = arith.constant 0 : i32
    %c0_i32_1 = arith.constant 0 : i32
    return %c0_i32, %c0_i32_0 : i32, i32
  }
  func.func @transform_5(%arg0: i32) -> (i32, i32) {
    %c0_i32 = arith.constant 0 : i32
    %c0_i32_0 = arith.constant 0 : i32
    %c0_i32_1 = arith.constant 0 : i32
    return %c0_i32, %c0_i32_0 : i32, i32
  }
  func.func @transform_6(%arg0: i32) -> (i32, i32) {
    %c0_i32 = arith.constant 0 : i32
    %c0_i32_0 = arith.constant 0 : i32
    %c0_i32_1 = arith.constant 0 : i32
    return %c0_i32, %c0_i32_0 : i32, i32
  }
  func.func @transform_7(%arg0: i32) -> (i32, i32) {
    %c0_i32 = arith.constant 0 : i32
    %c0_i32_0 = arith.constant 0 : i32
    %c0_i32_1 = arith.constant 0 : i32
    return %c0_i32, %c0_i32_0 : i32, i32
  }
  func.func @transform_8(%arg0: i32) -> (i32, i32) {
    %c0_i32 = arith.constant 0 : i32
    %c0_i32_0 = arith.constant 0 : i32
    %c0_i32_1 = arith.constant 0 : i32
    return %c0_i32, %c0_i32_0 : i32, i32
  }
  func.func @transform_9(%arg0: i32) -> (i32, i32) {
    %c0_i32 = arith.constant 0 : i32
    %c0_i32_0 = arith.constant 0 : i32
    %c0_i32_1 = arith.constant 0 : i32
    return %c0_i32, %c0_i32_0 : i32, i32
  }
  func.func @transform_10(%arg0: i32) -> (i32, i32) {
    %c0_i32 = arith.constant 0 : i32
    %c0_i32_0 = arith.constant 0 : i32
    %c0_i32_1 = arith.constant 0 : i32
    return %c0_i32, %c0_i32_0 : i32, i32
  }
  func.func @transform_11(%arg0: i32) -> (i32, i32) {
    %c0_i32 = arith.constant 0 : i32
    %c0_i32_0 = arith.constant 0 : i32
    return %arg0, %c0_i32 : i32, i32
  }
}

module attributes {stable_mosaic.version = 11 : i64} {
  func.func @_fused_forward_kernel(%arg0: i32, %arg1: memref<8x784xbf16, #tpu.memory_space<vmem>>, %arg2: memref<784x896xbf16, #tpu.memory_space<vmem>>, %arg3: memref<1x896xf32, #tpu.memory_space<vmem>>, %arg4: memref<896x256xbf16, #tpu.memory_space<vmem>>, %arg5: memref<1x256xf32, #tpu.memory_space<vmem>>, %arg6: memref<256x128xbf16, #tpu.memory_space<vmem>>, %arg7: memref<1x128xf32, #tpu.memory_space<vmem>>, %arg8: memref<128x128xbf16, #tpu.memory_space<vmem>>, %arg9: memref<1x128xf32, #tpu.memory_space<vmem>>, %arg10: memref<128x128xbf16, #tpu.memory_space<vmem>>, %arg11: memref<1x128xf32, #tpu.memory_space<vmem>>, %arg12: memref<8x128xf32, #tpu.memory_space<vmem>>) attributes {dimension_semantics = [#tpu.dimension_semantics<parallel>], iteration_bounds = array<i64: 1>, scalar_prefetch = 0 : i64, scratch_operands = 0 : i64, tpu.core_type = #tpu.core_type<tc>, window_params = [{transform_indices = @transform_0, window_bounds = array<i64: 8, 784>}, {pipeline_mode = #tpu.pipeline_mode<synchronous>, transform_indices = @transform_1, window_bounds = array<i64: 784, 896>}, {pipeline_mode = #tpu.pipeline_mode<synchronous>, transform_indices = @transform_2, window_bounds = array<i64: 1, 896>}, {pipeline_mode = #tpu.pipeline_mode<synchronous>, transform_indices = @transform_3, window_bounds = array<i64: 896, 256>}, {pipeline_mode = #tpu.pipeline_mode<synchronous>, transform_indices = @transform_4, window_bounds = array<i64: 1, 256>}, {pipeline_mode = #tpu.pipeline_mode<synchronous>, transform_indices = @transform_5, window_bounds = array<i64: 256, 128>}, {pipeline_mode = #tpu.pipeline_mode<synchronous>, transform_indices = @transform_6, window_bounds = array<i64: 1, 128>}, {pipeline_mode = #tpu.pipeline_mode<synchronous>, transform_indices = @transform_7, window_bounds = array<i64: 128, 128>}, {pipeline_mode = #tpu.pipeline_mode<synchronous>, transform_indices = @transform_8, window_bounds = array<i64: 1, 128>}, {pipeline_mode = #tpu.pipeline_mode<synchronous>, transform_indices = @transform_9, window_bounds = array<i64: 128, 128>}, {pipeline_mode = #tpu.pipeline_mode<synchronous>, transform_indices = @transform_10, window_bounds = array<i64: 1, 128>}, {transform_indices = @transform_11, window_bounds = array<i64: 8, 128>}]} {
    %c0 = arith.constant 0 : index
    %c0_0 = arith.constant 0 : index
    %0 = vector.load %arg1[%c0, %c0_0] : memref<8x784xbf16, #tpu.memory_space<vmem>>, vector<8x784xbf16>
    %c0_1 = arith.constant 0 : index
    %c0_2 = arith.constant 0 : index
    %1 = vector.load %arg2[%c0_1, %c0_2] : memref<784x896xbf16, #tpu.memory_space<vmem>>, vector<784x896xbf16>
    %cst = arith.constant dense<0.000000e+00> : vector<8x896xf32>
    %2 = tpu.matmul %0, %1, %cst {dimension_numbers = #tpu.dot_dimension_numbers<[1], [0], [0], [1], [0, 0, 1, 1], [], []>} : vector<8x784xbf16>, vector<784x896xbf16>, vector<8x896xf32> -> vector<8x896xf32>
    %c0_3 = arith.constant 0 : index
    %c0_4 = arith.constant 0 : index
    %3 = vector.load %arg3[%c0_3, %c0_4] : memref<1x896xf32, #tpu.memory_space<vmem>>, vector<1x896xf32>
    %4 = vector.broadcast %3 : vector<1x896xf32> to vector<8x896xf32>
    %5 = arith.addf %2, %4 : vector<8x896xf32>
    %cst_5 = arith.constant 0.000000e+00 : f32
    %6 = vector.broadcast %cst_5 : f32 to vector<8x896xf32>
    %7 = arith.maximumf %5, %6 : vector<8x896xf32>
    %8 = arith.truncf %7 : vector<8x896xf32> to vector<8x896xbf16>
    %c0_6 = arith.constant 0 : index
    %c0_7 = arith.constant 0 : index
    %9 = vector.load %arg4[%c0_6, %c0_7] : memref<896x256xbf16, #tpu.memory_space<vmem>>, vector<896x256xbf16>
    %cst_8 = arith.constant dense<0.000000e+00> : vector<8x256xf32>
    %10 = tpu.matmul %8, %9, %cst_8 {dimension_numbers = #tpu.dot_dimension_numbers<[1], [0], [0], [1], [0, 0, 1, 1], [], []>} : vector<8x896xbf16>, vector<896x256xbf16>, vector<8x256xf32> -> vector<8x256xf32>
    %c0_9 = arith.constant 0 : index
    %c0_10 = arith.constant 0 : index
    %11 = vector.load %arg5[%c0_9, %c0_10] : memref<1x256xf32, #tpu.memory_space<vmem>>, vector<1x256xf32>
    %12 = vector.broadcast %11 : vector<1x256xf32> to vector<8x256xf32>
    %13 = arith.addf %10, %12 : vector<8x256xf32>
    %cst_11 = arith.constant 0.000000e+00 : f32
    %14 = vector.broadcast %cst_11 : f32 to vector<8x256xf32>
    %15 = arith.maximumf %13, %14 : vector<8x256xf32>
    %16 = arith.truncf %15 : vector<8x256xf32> to vector<8x256xbf16>
    %c0_12 = arith.constant 0 : index
    %c0_13 = arith.constant 0 : index
    %17 = vector.load %arg6[%c0_12, %c0_13] : memref<256x128xbf16, #tpu.memory_space<vmem>>, vector<256x128xbf16>
    %cst_14 = arith.constant dense<0.000000e+00> : vector<8x128xf32>
    %18 = tpu.matmul %16, %17, %cst_14 {dimension_numbers = #tpu.dot_dimension_numbers<[1], [0], [0], [1], [0, 0, 1, 1], [], []>} : vector<8x256xbf16>, vector<256x128xbf16>, vector<8x128xf32> -> vector<8x128xf32>
    %c0_15 = arith.constant 0 : index
    %c0_16 = arith.constant 0 : index
    %19 = vector.load %arg7[%c0_15, %c0_16] : memref<1x128xf32, #tpu.memory_space<vmem>>, vector<1x128xf32>
    %20 = vector.broadcast %19 : vector<1x128xf32> to vector<8x128xf32>
    %21 = arith.addf %18, %20 : vector<8x128xf32>
    %cst_17 = arith.constant 0.000000e+00 : f32
    %22 = vector.broadcast %cst_17 : f32 to vector<8x128xf32>
    %23 = arith.maximumf %21, %22 : vector<8x128xf32>
    %24 = arith.truncf %23 : vector<8x128xf32> to vector<8x128xbf16>
    %c0_18 = arith.constant 0 : index
    %c0_19 = arith.constant 0 : index
    %25 = vector.load %arg8[%c0_18, %c0_19] : memref<128x128xbf16, #tpu.memory_space<vmem>>, vector<128x128xbf16>
    %cst_20 = arith.constant dense<0.000000e+00> : vector<8x128xf32>
    %26 = tpu.matmul %24, %25, %cst_20 {dimension_numbers = #tpu.dot_dimension_numbers<[1], [0], [0], [1], [0, 0, 1, 1], [], []>} : vector<8x128xbf16>, vector<128x128xbf16>, vector<8x128xf32> -> vector<8x128xf32>
    %c0_21 = arith.constant 0 : index
    %c0_22 = arith.constant 0 : index
    %27 = vector.load %arg9[%c0_21, %c0_22] : memref<1x128xf32, #tpu.memory_space<vmem>>, vector<1x128xf32>
    %28 = vector.broadcast %27 : vector<1x128xf32> to vector<8x128xf32>
    %29 = arith.addf %26, %28 : vector<8x128xf32>
    %cst_23 = arith.constant 0.000000e+00 : f32
    %30 = vector.broadcast %cst_23 : f32 to vector<8x128xf32>
    %31 = arith.maximumf %29, %30 : vector<8x128xf32>
    %32 = arith.truncf %31 : vector<8x128xf32> to vector<8x128xbf16>
    %c0_24 = arith.constant 0 : index
    %c0_25 = arith.constant 0 : index
    %33 = vector.load %arg10[%c0_24, %c0_25] : memref<128x128xbf16, #tpu.memory_space<vmem>>, vector<128x128xbf16>
    %cst_26 = arith.constant dense<0.000000e+00> : vector<8x128xf32>
    %34 = tpu.matmul %32, %33, %cst_26 {dimension_numbers = #tpu.dot_dimension_numbers<[1], [0], [0], [1], [0, 0, 1, 1], [], []>} : vector<8x128xbf16>, vector<128x128xbf16>, vector<8x128xf32> -> vector<8x128xf32>
    %c0_27 = arith.constant 0 : index
    %c0_28 = arith.constant 0 : index
    %35 = vector.load %arg11[%c0_27, %c0_28] : memref<1x128xf32, #tpu.memory_space<vmem>>, vector<1x128xf32>
    %36 = vector.broadcast %35 : vector<1x128xf32> to vector<8x128xf32>
    %37 = arith.addf %34, %36 : vector<8x128xf32>
    %c0_29 = arith.constant 0 : index
    %c0_30 = arith.constant 0 : index
    %38 = vector.load %arg12[%c0_29, %c0_30] : memref<8x128xf32, #tpu.memory_space<vmem>>, vector<8x128xf32>
    tpu.vector_store %arg12[%c0_29, %c0_30], %37 {strides = array<i32>} : memref<8x128xf32, #tpu.memory_space<vmem>>, vector<8x128xf32>,
    return
  }
  func.func @transform_0(%arg0: i32) -> (i32, i32) {
    %c0_i32 = arith.constant 0 : i32
    %c0_i32_0 = arith.constant 0 : i32
    return %arg0, %c0_i32 : i32, i32
  }
  func.func @transform_1(%arg0: i32) -> (i32, i32) {
    %c0_i32 = arith.constant 0 : i32
    %c0_i32_0 = arith.constant 0 : i32
    %c0_i32_1 = arith.constant 0 : i32
    return %c0_i32, %c0_i32_0 : i32, i32
  }
  func.func @transform_2(%arg0: i32) -> (i32, i32) {
    %c0_i32 = arith.constant 0 : i32
    %c0_i32_0 = arith.constant 0 : i32
    %c0_i32_1 = arith.constant 0 : i32
    return %c0_i32, %c0_i32_0 : i32, i32
  }
  func.func @transform_3(%arg0: i32) -> (i32, i32) {
    %c0_i32 = arith.constant 0 : i32
    %c0_i32_0 = arith.constant 0 : i32
    %c0_i32_1 = arith.constant 0 : i32
    return %c0_i32, %c0_i32_0 : i32, i32
  }
  func.func @transform_4(%arg0: i32) -> (i32, i32) {
    %c0_i32 = arith.constant 0 : i32
    %c0_i32_0 = arith.constant 0 : i32
    %c0_i32_1 = arith.constant 0 : i32
    return %c0_i32, %c0_i32_0 : i32, i32
  }
  func.func @transform_5(%arg0: i32) -> (i32, i32) {
    %c0_i32 = arith.constant 0 : i32
    %c0_i32_0 = arith.constant 0 : i32
    %c0_i32_1 = arith.constant 0 : i32
    return %c0_i32, %c0_i32_0 : i32, i32
  }
  func.func @transform_6(%arg0: i32) -> (i32, i32) {
    %c0_i32 = arith.constant 0 : i32
    %c0_i32_0 = arith.constant 0 : i32
    %c0_i32_1 = arith.constant 0 : i32
    return %c0_i32, %c0_i32_0 : i32, i32
  }
  func.func @transform_7(%arg0: i32) -> (i32, i32) {
    %c0_i32 = arith.constant 0 : i32
    %c0_i32_0 = arith.constant 0 : i32
    %c0_i32_1 = arith.constant 0 : i32
    return %c0_i32, %c0_i32_0 : i32, i32
  }
  func.func @transform_8(%arg0: i32) -> (i32, i32) {
    %c0_i32 = arith.constant 0 : i32
    %c0_i32_0 = arith.constant 0 : i32
    %c0_i32_1 = arith.constant 0 : i32
    return %c0_i32, %c0_i32_0 : i32, i32
  }
  func.func @transform_9(%arg0: i32) -> (i32, i32) {
    %c0_i32 = arith.constant 0 : i32
    %c0_i32_0 = arith.constant 0 : i32
    %c0_i32_1 = arith.constant 0 : i32
    return %c0_i32, %c0_i32_0 : i32, i32
  }
  func.func @transform_10(%arg0: i32) -> (i32, i32) {
    %c0_i32 = arith.constant 0 : i32
    %c0_i32_0 = arith.constant 0 : i32
    %c0_i32_1 = arith.constant 0 : i32
    return %c0_i32, %c0_i32_0 : i32, i32
  }
  func.func @transform_11(%arg0: i32) -> (i32, i32) {
    %c0_i32 = arith.constant 0 : i32
    %c0_i32_0 = arith.constant 0 : i32
    return %arg0, %c0_i32 : i32, i32
  }
}

</mosaic_0001>

<bundles_post_ra>
// kernel: _lambda_.1
= control target key start
LH: loop header
LB: loop body
LE: loop exit
PB: predicated region body
PF: predicated region fallthrough
CT: control target
= control target key end

     0   :  { %16 = vsyncpa [#allocation3], 0  ;;  %s6315_s0 = inlined_call_operand.vmem [shape: bf16[8,784], index: 0, kind: input, shape index: {}]   ;;  %s6316_s1 = inlined_call_operand.hbm [shape: bf16[784,896], index: 1, kind: input, shape index: {}]   ;;  %s6317_s2 = inlined_call_operand.hbm [shape: f32[1,896], index: 2, kind: input, shape index: {}]   ;;  %s6318_s3 = inlined_call_operand.hbm [shape: bf16[896,256], index: 3, kind: input, shape index: {}]   ;;  %s6319_s4 = inlined_call_operand.hbm [shape: f32[1,256], index: 4, kind: input, shape index: {}]   ;;  %s6320_s5 = inlined_call_operand.hbm [shape: bf16[256,128], index: 5, kind: input, shape index: {}]   ;;  %s6321_s6 = inlined_call_operand.hbm [shape: f32[1,128], index: 6, kind: input, shape index: {}]   ;;  %s6322_s7 = inlined_call_operand.hbm [shape: bf16[128,128], index: 7, kind: input, shape index: {}]   ;;  %s6323_s8 = inlined_call_operand.hbm [shape: f32[1,128], index: 8, kind: input, shape index: {}]   ;;  %s6324_s9 = inlined_call_operand.hbm [shape: bf16[128,128], index: 9, kind: input, shape index: {}]   ;;  %s6325_s10 = inlined_call_operand.hbm [shape: f32[1,128], index: 10, kind: input, shape index: {}]   ;;  %s6326_s11 = inlined_call_operand.vmem [shape: f32[8,128], index: 11, kind: output, shape index: {}]  }
   0x1   :  { %17 = vsyncpa [#allocation5], 0 }
   0x2   :  { %18 = vsyncpa [#allocation8], 0 }
   0x3   :  { %19 = vsyncpa [#allocation11], 0 }
   0x4   :  { %20 = vsyncpa [#allocation14], 0 }
   0x5   :  { %21 = vsyncpa [#allocation17], 0  ;;  %s5978_s17 = smov [#allocation4]   ;;  %s5979_s19 = smov [#allocation7]  }
   0x6   :  { %s42_s18 = sshll.u32 %s5978_s17, 4  ;;  %s64_s20 = sshll.u32 %s5979_s19, 4  ;;  %s43_s18 = int_to_ptr.vmem [resolvable:$true] %s42_s18  ;;  %s65_s20 = int_to_ptr.vmem [resolvable:$true] %s64_s20 }
   0x7   :  { %s5746_s23 = scalar_lea.hbm %s6317_s2, 112 }
   0x8   :  { %p5747_p0 = scmp.ne.s32.totalorder %s6317_s2, %s5746_s23  ;;  %p5750_p1 = scmp.lt.u32.totalorder %s5746_s23, %s6317_s2 }
   0xa   :  { %p5752_p2 = pnand %p5750_p1, %p5747_p0 }
   0xc   :  { %5755 = shalt.err (!%p5752_p2)
}
   0xd   :  { %s5756_s28 = scalar_lea.vmem %s43_s18, 112  ;;  %s5760_s29 = scalar_lea.vmem %s43_s18, 128 }
   0xe   :  { %p5757_p3 = scmp.ne.s32.totalorder %s43_s18, %s5756_s28  ;;  %p5761_p4 = scmp.lt.s32.totalorder %s43_s18, %s43_s18 }
   0xf   :  { %p5762_p5 = scmp.lt.s32.totalorder %s5760_s29, %s5756_s28 }
  0x11   :  { %p5763_p6 = por %p5762_p5, %p5761_p4 }
  0x13   :  { %p5764_p7 = pnand %p5763_p6, %p5757_p3 }
  0x15   :  { %5767 = shalt.err (!%p5764_p7)
}
  0x16   :  { %45 = dma.hbm_to_vmem [thread:$0]  %s6317_s2, 112, %s43_s18, [#allocation5]  }
  0x17   :  { %s5768_s15 = scalar_lea.hbm %s6319_s4, 32 }
  0x18   :  { %p5769_p8 = scmp.ne.s32.totalorder %s6319_s4, %s5768_s15  ;;  %p5772_p9 = scmp.lt.u32.totalorder %s5768_s15, %s6319_s4 }
  0x1a   :  { %p5774_p10 = pnand %p5772_p9, %p5769_p8 }
  0x1c   :  { %5777 = shalt.err (!%p5774_p10)
}
  0x1d   :  { %s5778_s22 = scalar_lea.vmem %s65_s20, 32  ;;  %p5783_p12 = scmp.lt.s32.totalorder %s65_s20, %s65_s20 }
  0x1e   :  { %p5779_p11 = scmp.ne.s32.totalorder %s65_s20, %s5778_s22  ;;  %p5784_p13 = scmp.lt.s32.totalorder %s5778_s22, %s5778_s22 }
  0x20   :  { %p5785_p0 = por %p5784_p13, %p5783_p12 }
  0x22   :  { %p5786_p1 = pnand %p5785_p0, %p5779_p11 }
  0x24   :  { %5789 = shalt.err (!%p5786_p1)
}
  0x25   :  { %67 = dma.hbm_to_vmem [thread:$0]  %s6319_s4, 32, %s65_s20, [#allocation8]  }
  0x26   :  { %s5980_s23 = smov [#allocation10]   ;;  %s5981_s25 = smov [#allocation13]  }
  0x27   :  { %s86_s24 = sshll.u32 %s5980_s23, 4  ;;  %s108_s26 = sshll.u32 %s5981_s25, 4  ;;  %s87_s24 = int_to_ptr.vmem [resolvable:$true] %s86_s24  ;;  %s109_s26 = int_to_ptr.vmem [resolvable:$true] %s108_s26 }
  0x28   :  { %s5790_s29 = scalar_lea.hbm %s6321_s6, 16 }
  0x29   :  { %p5791_p2 = scmp.ne.s32.totalorder %s6321_s6, %s5790_s29  ;;  %p5794_p3 = scmp.lt.u32.totalorder %s5790_s29, %s6321_s6 }
  0x2b   :  { %p5796_p4 = pnand %p5794_p3, %p5791_p2 }
  0x2d   :  { %5799 = shalt.err (!%p5796_p4)
}
  0x2e   :  { %s5800_s4 = scalar_lea.vmem %s87_s24, 16  ;;  %s5804_s20 = scalar_lea.vmem %s87_s24, 32 }
  0x2f   :  { %p5801_p5 = scmp.ne.s32.totalorder %s87_s24, %s5800_s4  ;;  %p5805_p6 = scmp.lt.s32.totalorder %s87_s24, %s87_s24 }
  0x30   :  { %p5806_p7 = scmp.lt.s32.totalorder %s5804_s20, %s5800_s4 }
  0x32   :  { %p5807_p8 = por %p5806_p7, %p5805_p6 }
  0x34   :  { %p5808_p9 = pnand %p5807_p8, %p5801_p5 }
  0x36   :  { %5811 = shalt.err (!%p5808_p9)
}
  0x37   :  { %89 = dma.hbm_to_vmem [thread:$0]  %s6321_s6, 16, %s87_s24, [#allocation11]  }
  0x38   :  { %s5812_s21 = scalar_lea.hbm %s6323_s8, 16 }
  0x39   :  { %p5813_p10 = scmp.ne.s32.totalorder %s6323_s8, %s5812_s21  ;;  %p5816_p11 = scmp.lt.u32.totalorder %s5812_s21, %s6323_s8 }
  0x3b   :  { %p5818_p12 = pnand %p5816_p11, %p5813_p10 }
  0x3d   :  { %5821 = shalt.err (!%p5818_p12)
}
  0x3e   :  { %s5822_s25 = scalar_lea.vmem %s109_s26, 16  ;;  %s5826_s27 = scalar_lea.vmem %s109_s26, 32 }
  0x3f   :  { %p5823_p13 = scmp.ne.s32.totalorder %s109_s26, %s5822_s25  ;;  %p5827_p0 = scmp.lt.s32.totalorder %s109_s26, %s109_s26 }
  0x40   :  { %p5828_p1 = scmp.lt.s32.totalorder %s5826_s27, %s5822_s25 }
  0x42   :  { %p5829_p2 = por %p5828_p1, %p5827_p0 }
  0x44   :  { %p5830_p3 = pnand %p5829_p2, %p5823_p13 }
  0x46   :  { %5833 = shalt.err (!%p5830_p3)
}
  0x47   :  { %111 = dma.hbm_to_vmem [thread:$0]  %s6323_s8, 16, %s109_s26, [#allocation14]  }
  0x48   :  { %s5982_s28 = smov [#allocation2]   ;;  %s5834_s13 = scalar_lea.hbm %s6316_s1, 43904 }
  0x49   :  { %s29_s29 = sshll.u32 %s5982_s28, 4  ;;  %p5835_p4 = scmp.ne.s32.totalorder %s6316_s1, %s5834_s13  ;;  %s30_s29 = int_to_ptr.vmem [resolvable:$true] %s29_s29 }
  0x4a   :  { %p5838_p5 = scmp.lt.u32.totalorder %s5834_s13, %s6316_s1 }
  0x4c   :  { %p5840_p6 = pnand %p5838_p5, %p5835_p4 }
  0x4e   :  { %5843 = shalt.err (!%p5840_p6)
}
  0x4f   :  { %s5844_s16 = scalar_lea.vmem %s30_s29, 43904  ;;  %p5849_p8 = scmp.lt.s32.totalorder %s30_s29, %s30_s29 }
  0x50   :  { %p5845_p7 = scmp.ne.s32.totalorder %s30_s29, %s5844_s16  ;;  %p5850_p9 = scmp.lt.s32.totalorder %s5844_s16, %s5844_s16 }
  0x52   :  { %p5851_p10 = por %p5850_p9, %p5849_p8 }
  0x54   :  { %p5852_p11 = pnand %p5851_p10, %p5845_p7 }
  0x56   :  { %5855 = shalt.err (!%p5852_p11)
}
  0x57   :  { %s5983_s8 = smov 448   ;;  %s5984_s26 = smov 28  }
  0x58   :  { %35 = dma.hbm_to_vmem [thread:$0]  %s6316_s1, 43904, %s30_s29, [#allocation3], %s5983_s8, %s5983_s8, %s5984_s26  }
  0x59   :  { %s5985_s21 = smov [#allocation6]   ;;  %s5856_s23 = scalar_lea.hbm %s6318_s3, 14336 }
  0x5a   :  { %s51_s22 = sshll.u32 %s5985_s21, 4  ;;  %p5857_p12 = scmp.ne.s32.totalorder %s6318_s3, %s5856_s23  ;;  %s52_s22 = int_to_ptr.vmem [resolvable:$true] %s51_s22 }
  0x5b   :  { %p5860_p13 = scmp.lt.u32.totalorder %s5856_s23, %s6318_s3 }
  0x5d   :  { %p5862_p0 = pnand %p5860_p13, %p5857_p12 }
  0x5f   :  { %5865 = shalt.err (!%p5862_p0)
}
  0x60   :  { %s5866_s28 = scalar_lea.vmem %s52_s22, 14336  ;;  %p5871_p2 = scmp.lt.s32.totalorder %s52_s22, %s52_s22 }
  0x61   :  { %p5867_p1 = scmp.ne.s32.totalorder %s52_s22, %s5866_s28  ;;  %p5872_p3 = scmp.lt.s32.totalorder %s5866_s28, %s5866_s28 }
  0x63   :  { %p5873_p4 = por %p5872_p3, %p5871_p2 }
  0x65   :  { %p5874_p5 = pnand %p5873_p4, %p5867_p1 }
  0x67   :  { %5877 = shalt.err (!%p5874_p5)
}
  0x68   :  { %s5986_s1 = smov 128   ;;  %s5987_s29 = smov 8  }
  0x69   :  { %57 = dma.hbm_to_vmem [thread:$0]  %s6318_s3, 14336, %s52_s22, [#allocation5], %s5986_s1, %s5986_s1, %s5987_s29  }
  0x6a   :  { %s5988_s13 = smov [#allocation9]   ;;  %s5878_s15 = scalar_lea.hbm %s6320_s5, 2048 }
  0x6b   :  { %s73_s14 = sshll.u32 %s5988_s13, 4  ;;  %p5879_p6 = scmp.ne.s32.totalorder %s6320_s5, %s5878_s15  ;;  %s74_s14 = int_to_ptr.vmem [resolvable:$true] %s73_s14 }
  0x6c   :  { %p5882_p7 = scmp.lt.u32.totalorder %s5878_s15, %s6320_s5 }
  0x6e   :  { %p5884_p8 = pnand %p5882_p7, %p5879_p6 }
  0x70   :  { %5887 = shalt.err (!%p5884_p8)
}
  0x71   :  { %s5888_s19 = scalar_lea.vmem %s74_s14, 2048  ;;  %p5893_p10 = scmp.lt.s32.totalorder %s74_s14, %s74_s14 }
  0x72   :  { %p5889_p9 = scmp.ne.s32.totalorder %s74_s14, %s5888_s19  ;;  %p5894_p11 = scmp.lt.s32.totalorder %s5888_s19, %s5888_s19 }
  0x74   :  { %p5895_p12 = por %p5894_p11, %p5893_p10 }
  0x76   :  { %p5896_p13 = pnand %p5895_p12, %p5889_p9 }
  0x78   :  { %5899 = shalt.err (!%p5896_p13)
}
  0x79   :  { %s5989_s3 = smov 64   ;;  %s5990_s21 = smov 4  }
  0x7a   :  { %79 = dma.hbm_to_vmem [thread:$0]  %s6320_s5, 2048, %s74_s14, [#allocation8], %s5989_s3, %s5989_s3, %s5990_s21  }
  0x7b   :  { %s5991_s18 = smov [#allocation12]   ;;  %s5992_s25 = smov [#allocation15]  }
  0x7c   :  { %s95_s23 = sshll.u32 %s5991_s18, 4  ;;  %s117_s27 = sshll.u32 %s5992_s25, 4  ;;  %s96_s23 = int_to_ptr.vmem [resolvable:$true] %s95_s23  ;;  %s118_s27 = int_to_ptr.vmem [resolvable:$true] %s117_s27 }
  0x7d   :  { %s5900_s28 = scalar_lea.hbm %s6322_s7, 1024 }
  0x7e   :  { %p5901_p0 = scmp.ne.s32.totalorder %s6322_s7, %s5900_s28  ;;  %p5904_p1 = scmp.lt.u32.totalorder %s5900_s28, %s6322_s7 }
  0x80   :  { %p5906_p2 = pnand %p5904_p1, %p5901_p0 }
  0x82   :  { %5909 = shalt.err (!%p5906_p2)
}
  0x83   :  { %s5910_s5 = scalar_lea.vmem %s96_s23, 1024  ;;  %p5915_p4 = scmp.lt.s32.totalorder %s96_s23, %s96_s23 }
  0x84   :  { %p5911_p3 = scmp.ne.s32.totalorder %s96_s23, %s5910_s5  ;;  %p5916_p5 = scmp.lt.s32.totalorder %s5910_s5, %s5910_s5 }
  0x86   :  { %p5917_p6 = por %p5916_p5, %p5915_p4 }
  0x88   :  { %p5918_p7 = pnand %p5917_p6, %p5911_p3 }
  0x8a   :  { %5921 = shalt.err (!%p5918_p7)
}
  0x8b   :  { %101 = dma.hbm_to_vmem [thread:$0]  %s6322_s7, 1024, %s96_s23, [#allocation11], %s5989_s3, %s5989_s3, %s5990_s21  }
  0x8c   :  { %s5922_s15 = scalar_lea.hbm %s6324_s9, 1024 }
  0x8d   :  { %p5923_p8 = scmp.ne.s32.totalorder %s6324_s9, %s5922_s15  ;;  %p5926_p9 = scmp.lt.u32.totalorder %s5922_s15, %s6324_s9 }
  0x8f   :  { %p5928_p10 = pnand %p5926_p9, %p5923_p8 }
  0x91   :  { %5931 = shalt.err (!%p5928_p10)
}
  0x92   :  { %s5932_s19 = scalar_lea.vmem %s118_s27, 1024  ;;  %p5937_p12 = scmp.lt.s32.totalorder %s118_s27, %s118_s27 }
  0x93   :  { %p5933_p11 = scmp.ne.s32.totalorder %s118_s27, %s5932_s19  ;;  %p5938_p13 = scmp.lt.s32.totalorder %s5932_s19, %s5932_s19 }
  0x95   :  { %p5939_p0 = por %p5938_p13, %p5937_p12 }
  0x97   :  { %p5940_p1 = pnand %p5939_p0, %p5933_p11 }
  0x99   :  { %5943 = shalt.err (!%p5940_p1)
}
  0x9a   :  { %123 = dma.hbm_to_vmem [thread:$0]  %s6324_s9, 1024, %s118_s27, [#allocation14], %s5989_s3, %s5989_s3, %s5990_s21  }
  0x9b   :  { %s5993_s2 = smov [#allocation16]   ;;  %s5944_s6 = scalar_lea.hbm %s6325_s10, 16 }
  0x9c   :  { %s130_s18 = sshll.u32 %s5993_s2, 4  ;;  %p5945_p2 = scmp.ne.s32.totalorder %s6325_s10, %s5944_s6  ;;  %s131_s18 = int_to_ptr.vmem [resolvable:$true] %s130_s18 }
  0x9d   :  { %p5948_p3 = scmp.lt.u32.totalorder %s5944_s6, %s6325_s10 }
  0x9f   :  { %p5950_p4 = pnand %p5948_p3, %p5945_p2 }
  0xa1   :  { %5953 = shalt.err (!%p5950_p4)
}
  0xa2   :  { %s5954_s30 = scalar_lea.vmem %s131_s18, 16  ;;  %s5958_s9 = scalar_lea.vmem %s131_s18, 32 }
  0xa3   :  { %p5955_p5 = scmp.ne.s32.totalorder %s131_s18, %s5954_s30  ;;  %p5959_p6 = scmp.lt.s32.totalorder %s131_s18, %s131_s18 }
  0xa4   :  { %p5960_p7 = scmp.lt.s32.totalorder %s5958_s9, %s5954_s30 }
  0xa6   :  { %p5961_p8 = por %p5960_p7, %p5959_p6 }
  0xa8   :  { %p5962_p9 = pnand %p5961_p8, %p5955_p5 }
  0xaa   :  { %5965 = shalt.err (!%p5962_p9)
}
  0xab   :  { %133 = dma.hbm_to_vmem [thread:$0]  %s6325_s10, 16, %s131_s18, [#allocation17]  }
  0xac   :  { %5966 = dma.done.wait [#allocation3], 43904  }
  0xad   :  { %5967 = vsyncadd [#allocation3], 4294923392 }
  0xae   :  { %5968 = dma.done.wait [#allocation5], 14448  }
  0xaf   :  { %5969 = vsyncadd [#allocation5], 4294952848 }
  0xb0   :  { %5970 = dma.done.wait [#allocation8], 2080  }
  0xb1   :  { %5971 = vsyncadd [#allocation8], 4294965216 }
  0xb2   :  { %5972 = dma.done.wait [#allocation11], 1040  }
  0xb3   :  { %5973 = vsyncadd [#allocation11], 4294966256 }
  0xb4   :  { %5974 = dma.done.wait [#allocation14], 1040  }
  0xb5   :  { %5975 = vsyncadd [#allocation14], 4294966256 }
  0xb6   :  { %5976 = dma.done.wait [#allocation17], 16  }
  0xb7   :  { %5977 = vsyncadd [#allocation17], 4294967280  ;;  %v5048_v0 = vld [vmem:[#allocation2 + $0x4] ss:$28 sps:$4 sm:$0xff]   ;;  %v5051_v2 = vld [vmem:[#allocation2 + $0x3c] ss:$28 sps:$4 sm:$0xff]  }
  0xb8   :  { %v5050_v1 = vld [vmem:[#allocation2] ss:$28 sps:$4 sm:$0xff]   ;;  %2390 = vmatprep.subr.bf16.mxu0 %v5048_v0  ;;  %v5053_v3 = vld [vmem:[#allocation2 + $0x38] ss:$28 sps:$4 sm:$0xff]   ;;  %v5056_v5 = vld [vmem:[#allocation2 + $0x70] ss:$28 sps:$4 sm:$0xff]  }
  0xb9   :  { %2391 = vmatpush1.bf16.msra.mxu0 %v5050_v1  ;;  %v5054_v4 = vld [vmem:[#allocation2 + $0x74] ss:$28 sps:$4 sm:$0xff]   ;;  %v5063_v6 = vld [vmem:[#allocation2 + $0xc] ss:$28 sps:$4 sm:$0xff]   ;;  %v5069_v9 = vld [vmem:[#allocation2 + $0x44] ss:$28 sps:$4 sm:$0xff]  }
  0xba   :  { %2392 = vmatprep.subr.bf16.mxu0 %v5051_v2  ;;  %v5065_v7 = vld [vmem:[#allocation2 + $0x8] ss:$28 sps:$4 sm:$0xff]   ;;  %2554 = vmatprep.subr.bf16.mxu1 %v5063_v6  ;;  %v5071_v10 = vld [vmem:[#allocation2 + $0x40] ss:$28 sps:$4 sm:$0xff]   ;;  %v5077_v14 = vld [vmem:[#allocation2 + $0x78] ss:$28 sps:$4 sm:$0xff]  }
  0xbb   :  { %v5057_v8 = vld [vmem:[#allocation2 + $0xac] ss:$28 sps:$4 sm:$0xff]   ;;  %2555 = vmatpush1.bf16.msra.mxu1 %v5065_v7  ;;  %v5060_v12 = vld [vmem:[#allocation2 + $0xe4] ss:$28 sps:$4 sm:$0xff]   ;;  %v5075_v13 = vld [vmem:[#allocation2 + $0x7c] ss:$28 sps:$4 sm:$0xff]  }
  0xbc   :  { %v5059_v11 = vld [vmem:[#allocation2 + $0xa8] ss:$28 sps:$4 sm:$0xff]   ;;  %2556 = vmatprep.subr.bf16.mxu1 %v5069_v9  ;;  %v5062_v15 = vld [vmem:[#allocation2 + $0xe0] ss:$28 sps:$4 sm:$0xff]   ;;  %v5081_v16 = vld [vmem:[#allocation2 + $0xb4] ss:$28 sps:$4 sm:$0xff]  }
  0xbd   :  { %2393 = vmatpush1.bf16.msra.mxu0 %v5053_v3  ;;  %v5066_v17 = vld [vmem:[#allocation2 + $0x11c] ss:$28 sps:$4 sm:$0xff]   ;;  %v5083_v18 = vld [vmem:[#allocation2 + $0xb0] ss:$28 sps:$4 sm:$0xff]   ;;  %v5089_v22 = vld [vmem:[#allocation2 + $0xe8] ss:$28 sps:$4 sm:$0xff]  }
  0xbe   :  { %2394 = vmatprep.subr.bf16.mxu0 %v5054_v4  ;;  %v5068_v19 = vld [vmem:[#allocation2 + $0x118] ss:$28 sps:$4 sm:$0xff]   ;;  %v5087_v20 = vld [vmem:[#allocation2 + $0xec] ss:$28 sps:$4 sm:$0xff]   ;;  %v5093_v24 = vld [vmem:[#allocation2 + $0x124] ss:$28 sps:$4 sm:$0xff]  }
  0xbf   :  { %2557 = vmatpush1.bf16.msra.mxu1 %v5071_v10  ;;  %v5072_v21 = vld [vmem:[#allocation2 + $0x154] ss:$28 sps:$4 sm:$0xff]   ;;  %v5078_v25 = vld [vmem:[#allocation2 + $0x18c] ss:$28 sps:$4 sm:$0xff]   ;;  %v5095_v26 = vld [vmem:[#allocation2 + $0x120] ss:$28 sps:$4 sm:$0xff]  }
  0xc0   :  { %2558 = vmatprep.subr.bf16.mxu1 %v5075_v13  ;;  %v5074_v23 = vld [vmem:[#allocation2 + $0x150] ss:$28 sps:$4 sm:$0xff]   ;;  %v5080_v27 = vld [vmem:[#allocation2 + $0x188] ss:$28 sps:$4 sm:$0xff]   ;;  %v5099_v28 = vld [vmem:[#allocation2 + $0x15c] ss:$28 sps:$4 sm:$0xff]  }
  0xc1   :  { %2395 = vmatpush1.bf16.msra.mxu0 %v5056_v5  ;;  %v5084_v29 = vld [vmem:[#allocation2 + $0x1c4] ss:$28 sps:$4 sm:$0xff]   ;;  %v5101_v30 = vld [vmem:[#allocation2 + $0x158] ss:$28 sps:$4 sm:$0xff]   ;;  %v5107_v34 = vld [vmem:[#allocation2 + $0x190] ss:$28 sps:$4 sm:$0xff]  }
  0xc2   :  { %2396 = vmatprep.subr.bf16.mxu0 %v5057_v8  ;;  %v5086_v31 = vld [vmem:[#allocation2 + $0x1c0] ss:$28 sps:$4 sm:$0xff]   ;;  %v5105_v32 = vld [vmem:[#allocation2 + $0x194] ss:$28 sps:$4 sm:$0xff]   ;;  %v5111_v36 = vld [vmem:[#allocation2 + $0x1cc] ss:$28 sps:$4 sm:$0xff]  }
  0xc3   :  { %2559 = vmatpush1.bf16.msra.mxu1 %v5077_v14  ;;  %v5090_v33 = vld [vmem:[#allocation2 + $0x1fc] ss:$28 sps:$4 sm:$0xff]   ;;  %v5096_v37 = vld [vmem:[#allocation2 + $0x234] ss:$28 sps:$4 sm:$0xff]   ;;  %v165_v38 = vld [vmem:[%s6315_s0] sm:$0xff]  ;;  %vm2386_vm0 = vcmask 130048  }
  0xc4   :  { %2560 = vmatprep.subr.bf16.mxu1 %v5081_v16  ;;  %v5092_v35 = vld [vmem:[#allocation2 + $0x1f8] ss:$28 sps:$4 sm:$0xff]   ;;  %v5098_v39 = vld [vmem:[#allocation2 + $0x230] ss:$28 sps:$4 sm:$0xff]   ;;  %v5113_v40 = vld [vmem:[#allocation2 + $0x1c8] ss:$28 sps:$4 sm:$0xff]   ;;  %v6189_v41 = vcombine.high %v165_v38, %v165_v38  ;;  %v6193_v1 = vcombine.low %v165_v38, %v165_v38 }
  0xc5   :  { %2397 = vmatpush1.bf16.msra.mxu0 %v5059_v11  ;;  %v5117_v42 = vld [vmem:[#allocation2 + $0x204] ss:$28 sps:$4 sm:$0xff]   ;;  %v5102_v43 = vld [vmem:[#allocation2 + $0x26c] ss:$28 sps:$4 sm:$0xff]   ;;  %v5123_v46 = vld [vmem:[#allocation2 + $0x23c] ss:$28 sps:$4 sm:$0xff]  }
  0xc6   :  { %2398 = vmatprep.subr.bf16.mxu0 %v5060_v12  ;;  %2422 = vmatprep.mubr.bf16.mxu0 %v6189_v41  ;;  %v5104_v44 = vld [vmem:[#allocation2 + $0x268] ss:$28 sps:$4 sm:$0xff]   ;;  %v5119_v45 = vld [vmem:[#allocation2 + $0x200] ss:$28 sps:$4 sm:$0xff]   ;;  %v5125_v49 = vld [vmem:[#allocation2 + $0x238] ss:$28 sps:$4 sm:$0xff]  }
  0xc7   :  { %2561 = vmatpush1.bf16.msra.mxu1 %v5083_v18  ;;  %2586 = vmatprep.mubr.bf16.mxu1 %v6189_v41  ;;  %v5108_v47 = vld [vmem:[#allocation2 + $0x2a4] ss:$28 sps:$4 sm:$0xff]   ;;  %v5129_v50 = vld [vmem:[#allocation2 + $0x274] ss:$28 sps:$4 sm:$0xff]   ;;  %v5114_v51 = vld [vmem:[#allocation2 + $0x2dc] ss:$28 sps:$4 sm:$0xff]  }
  0xc8   :  { %2562 = vmatprep.subr.bf16.mxu1 %v5087_v20  ;;  %v5110_v48 = vld [vmem:[#allocation2 + $0x2a0] ss:$28 sps:$4 sm:$0xff]   ;;  %v5116_v52 = vld [vmem:[#allocation2 + $0x2d8] ss:$28 sps:$4 sm:$0xff]   ;;  %v5131_v53 = vld [vmem:[#allocation2 + $0x270] ss:$28 sps:$4 sm:$0xff]  }
  0xc9   :  { %2399 = vmatpush1.bf16.msra.mxu0 %v5062_v15  ;;  %v5137_v54 = vld [vmem:[#allocation2 + $0x2ac] ss:$28 sps:$4 sm:$0xff]   ;;  %v5120_v55 = vld [vmem:[#allocation2 + $0x314] ss:$28 sps:$4 sm:$0xff]   ;;  %v5143_v58 = vld [vmem:[#allocation2 + $0x2e4] ss:$28 sps:$4 sm:$0xff]  }
  0xca   :  { %2400 = vmatprep.subr.bf16.mxu0 %v5066_v17  ;;  %v5122_v56 = vld [vmem:[#allocation2 + $0x310] ss:$28 sps:$4 sm:$0xff]   ;;  %v5139_v57 = vld [vmem:[#allocation2 + $0x2a8] ss:$28 sps:$4 sm:$0xff]   ;;  %v5145_v61 = vld [vmem:[#allocation2 + $0x2e0] ss:$28 sps:$4 sm:$0xff]  }
  0xcb   :  { %2563 = vmatpush1.bf16.msra.mxu1 %v5089_v22  ;;  %v5126_v59 = vld [vmem:[#allocation2 + $0x34c] ss:$28 sps:$4 sm:$0xff]   ;;  %v5149_v62 = vld [vmem:[#allocation2 + $0x31c] ss:$28 sps:$4 sm:$0xff]   ;;  %v5135_v63 = vld [vmem:[#allocation2 + $0x384] ss:$28 sps:$4 sm:$0xff]  }
  0xcc   :  { %2564 = vmatprep.subr.bf16.mxu1 %v5093_v24  ;;  %v5128_v60 = vld [vmem:[#allocation2 + $0x348] ss:$28 sps:$4 sm:$0xff]   ;;  %v5133_v0 = vld [vmem:[#allocation2 + $0x380] ss:$28 sps:$4 sm:$0xff]   ;;  %v5151_v2 = vld [vmem:[#allocation2 + $0x318] ss:$28 sps:$4 sm:$0xff]  }
  0xcd   :  { %2401 = vmatpush1.bf16.msra.mxu0 %v5068_v19  ;;  %v5155_v3 = vld [vmem:[#allocation2 + $0x354] ss:$28 sps:$4 sm:$0xff]   ;;  %v5142_v4 = vld [vmem:[#allocation2 + $0x3bc] ss:$28 sps:$4 sm:$0xff]   ;;  %v5163_v7 = vld [vmem:[#allocation2 + $0x38c] ss:$28 sps:$4 sm:$0xff]  }
  0xce   :  { %2402 = vmatprep.subr.bf16.mxu0 %v5072_v21  ;;  %v5140_v5 = vld [vmem:[#allocation2 + $0x3b8] ss:$28 sps:$4 sm:$0xff]   ;;  %v5157_v6 = vld [vmem:[#allocation2 + $0x350] ss:$28 sps:$4 sm:$0xff]   ;;  %v5161_v10 = vld [vmem:[#allocation2 + $0x388] ss:$28 sps:$4 sm:$0xff]  }
  0xcf   :  { %2565 = vmatpush1.bf16.msra.mxu1 %v5095_v26  ;;  %v5148_v8 = vld [vmem:[#allocation2 + $0x3f4] ss:$28 sps:$4 sm:$0xff]   ;;  %v5169_v11 = vld [vmem:[#allocation2 + $0x3c4] ss:$28 sps:$4 sm:$0xff]   ;;  %v5154_v12 = vld [vmem:[#allocation2 + $0x42c] ss:$28 sps:$4 sm:$0xff]  }
  0xd0   :  { %2566 = vmatprep.subr.bf16.mxu1 %v5099_v28  ;;  %v5146_v9 = vld [vmem:[#allocation2 + $0x3f0] ss:$28 sps:$4 sm:$0xff]   ;;  %v5152_v13 = vld [vmem:[#allocation2 + $0x428] ss:$28 sps:$4 sm:$0xff]   ;;  %v5167_v14 = vld [vmem:[#allocation2 + $0x3c0] ss:$28 sps:$4 sm:$0xff]  }
  0xd1   :  { %2403 = vmatpush1.bf16.msra.mxu0 %v5074_v23  ;;  %v5175_v15 = vld [vmem:[#allocation2 + $0x3fc] ss:$28 sps:$4 sm:$0xff]   ;;  %v5160_v16 = vld [vmem:[#allocation2 + $0x464] ss:$28 sps:$4 sm:$0xff]   ;;  %v5181_v19 = vld [vmem:[#allocation2 + $0x434] ss:$28 sps:$4 sm:$0xff]  }
  0xd2   :  { %2404 = vmatprep.subr.bf16.mxu0 %v5078_v25  ;;  %v5158_v17 = vld [vmem:[#allocation2 + $0x460] ss:$28 sps:$4 sm:$0xff]   ;;  %v5173_v18 = vld [vmem:[#allocation2 + $0x3f8] ss:$28 sps:$4 sm:$0xff]   ;;  %v6200_v21 = vld [vmem:[%s6315_s0 + $0x8] sm:$0xff]  ;;  %vm5996_vm1 = vmmov 0  }
  0xd3   :  { %2567 = vmatpush1.bf16.msra.mxu1 %v5101_v30  ;;  %v5166_v20 = vld [vmem:[#allocation2 + $0x49c] ss:$28 sps:$4 sm:$0xff]   ;;  %v6204_v23 = vcombine.high %v6200_v21, %v6200_v21  ;;  %v5179_v24 = vld [vmem:[#allocation2 + $0x430] ss:$28 sps:$4 sm:$0xff]   ;;  %v5185_v28 = vld [vmem:[#allocation2 + $0x468] ss:$28 sps:$4 sm:$0xff]  }
  0xd4   :  { %2568 = vmatprep.subr.bf16.mxu1 %v5105_v32  ;;  %v5164_v22 = vld [vmem:[#allocation2 + $0x498] ss:$28 sps:$4 sm:$0xff]   ;;  %v5187_v25 = vld [vmem:[#allocation2 + $0x46c] ss:$28 sps:$4 sm:$0xff]   ;;  %v5191_v32 = vld [vmem:[#allocation2 + $0x4a0] ss:$28 sps:$4 sm:$0xff]  }
  0xd5   :  { %2405 = vmatpush1.bf16.msra.mxu0 %v5080_v27  ;;  %v5172_v26 = vld [vmem:[#allocation2 + $0x4d4] ss:$28 sps:$4 sm:$0xff]   ;;  %v5178_v30 = vld [vmem:[#allocation2 + $0x50c] ss:$28 sps:$4 sm:$0xff]   ;;  %v5190_v38 = vld [vmem:[#allocation2 + $0x57c] ss:$28 sps:$4 sm:$0xff]  }
  0xd6   :  { %2406 = vmatprep.subr.bf16.mxu0 %v5084_v29  ;;  %v5170_v27 = vld [vmem:[#allocation2 + $0x4d0] ss:$28 sps:$4 sm:$0xff]   ;;  %v5193_v29 = vld [vmem:[#allocation2 + $0x4a4] ss:$28 sps:$4 sm:$0xff]  }
  0xd7   :  { %2569 = vmatpush1.bf16.msra.mxu1 %v5107_v34  ;;  %v5184_v34 = vld [vmem:[#allocation2 + $0x544] ss:$28 sps:$4 sm:$0xff]  }
  0xd8   :  { %2570 = vmatprep.subr.bf16.mxu1 %v5111_v36  ;;  %v5197_v36 = vld [vmem:[#allocation2 + $0x4d8] ss:$28 sps:$4 sm:$0xff]  }
  0xd9   :  { %2407 = vmatpush1.bf16.msra.mxu0 %v5086_v31  ;;  %v5176_v31 = vld [vmem:[#allocation2 + $0x508] ss:$28 sps:$4 sm:$0xff]  }
  0xda   :  { %2408 = vmatprep.subr.bf16.mxu0 %v5090_v33  ;;  %v5199_v33 = vld [vmem:[#allocation2 + $0x4dc] ss:$28 sps:$4 sm:$0xff]  }
  0xdb   :  { %2571 = vmatpush1.bf16.msra.mxu1 %v5113_v40  ;;  %v5203_v40 = vld [vmem:[#allocation2 + $0x510] ss:$28 sps:$4 sm:$0xff]  }
  0xdc   :  { %2572 = vmatprep.subr.bf16.mxu1 %v5117_v42  ;;  %v5211_v42 = vld [vmem:[#allocation2 + $0x54c] ss:$28 sps:$4 sm:$0xff]  }
  0xdd   :  { %2409 = vmatpush1.bf16.msra.mxu0 %v5092_v35  ;;  %v5182_v35 = vld [vmem:[#allocation2 + $0x540] ss:$28 sps:$4 sm:$0xff]  }
  0xde   :  { %2410 = vmatprep.subr.bf16.mxu0 %v5096_v37  ;;  %v5205_v37 = vld [vmem:[#allocation2 + $0x514] ss:$28 sps:$4 sm:$0xff]  }
  0xdf   :  { %2573 = vmatpush1.bf16.msra.mxu1 %v5119_v45  ;;  %v5209_v45 = vld [vmem:[#allocation2 + $0x548] ss:$28 sps:$4 sm:$0xff]  }
  0xe0   :  { %2574 = vmatprep.subr.bf16.mxu1 %v5123_v46  ;;  %v5217_v46 = vld [vmem:[#allocation2 + $0x584] ss:$28 sps:$4 sm:$0xff]  }
  0xe1   :  { %2411 = vmatpush1.bf16.msra.mxu0 %v5098_v39  ;;  %v5188_v39 = vld [vmem:[#allocation2 + $0x578] ss:$28 sps:$4 sm:$0xff]  }
  0xe2   :  { %2412 = vmatprep.subr.bf16.mxu0 %v5102_v43  ;;  %v5196_v43 = vld [vmem:[#allocation2 + $0x5b4] ss:$28 sps:$4 sm:$0xff]  }
  0xe3   :  { %2575 = vmatpush1.bf16.msra.mxu1 %v5125_v49  ;;  %v5215_v49 = vld [vmem:[#allocation2 + $0x580] ss:$28 sps:$4 sm:$0xff]  }
  0xe4   :  { %2576 = vmatprep.subr.bf16.mxu1 %v5129_v50  ;;  %v5223_v50 = vld [vmem:[#allocation2 + $0x5bc] ss:$28 sps:$4 sm:$0xff]  }
  0xe5   :  { %2413 = vmatpush1.bf16.msra.mxu0 %v5104_v44  ;;  %v5194_v44 = vld [vmem:[#allocation2 + $0x5b0] ss:$28 sps:$4 sm:$0xff]  }
  0xe6   :  { %2414 = vmatprep.subr.bf16.mxu0 %v5108_v47  ;;  %v5202_v47 = vld [vmem:[#allocation2 + $0x5ec] ss:$28 sps:$4 sm:$0xff]  }
  0xe7   :  { %2577 = vmatpush1.bf16.msra.mxu1 %v5131_v53  ;;  %v5221_v53 = vld [vmem:[#allocation2 + $0x5b8] ss:$28 sps:$4 sm:$0xff]  }
  0xe8   :  { %2578 = vmatprep.subr.bf16.mxu1 %v5137_v54  ;;  %v5229_v54 = vld [vmem:[#allocation2 + $0x5f4] ss:$28 sps:$4 sm:$0xff]  }
  0xe9   :  { %2415 = vmatpush1.bf16.msra.mxu0 %v5110_v48  ;;  %v5200_v48 = vld [vmem:[#allocation2 + $0x5e8] ss:$28 sps:$4 sm:$0xff]  }
  0xea   :  { %2416 = vmatprep.subr.bf16.mxu0 %v5114_v51  ;;  %v5208_v51 = vld [vmem:[#allocation2 + $0x624] ss:$28 sps:$4 sm:$0xff]  }
  0xeb   :  { %2579 = vmatpush1.bf16.msra.mxu1 %v5139_v57  ;;  %v5227_v57 = vld [vmem:[#allocation2 + $0x5f0] ss:$28 sps:$4 sm:$0xff]  }
  0xec   :  { %2580 = vmatprep.subr.bf16.mxu1 %v5143_v58  ;;  %v5237_v58 = vld [vmem:[#allocation2 + $0x62c] ss:$28 sps:$4 sm:$0xff]  }
  0xed   :  { %2417 = vmatpush1.bf16.msra.mxu0 %v5116_v52  ;;  %v5206_v52 = vld [vmem:[#allocation2 + $0x620] ss:$28 sps:$4 sm:$0xff]  }
  0xee   :  { %2418 = vmatprep.subr.bf16.mxu0 %v5120_v55  ;;  %v5214_v55 = vld [vmem:[#allocation2 + $0x65c] ss:$28 sps:$4 sm:$0xff]  }
  0xef   :  { %2581 = vmatpush1.bf16.msra.mxu1 %v5145_v61  ;;  %v5235_v61 = vld [vmem:[#allocation2 + $0x628] ss:$28 sps:$4 sm:$0xff]  }
  0xf0   :  { %2582 = vmatprep.subr.bf16.mxu1 %v5149_v62  ;;  %v5243_v62 = vld [vmem:[#allocation2 + $0x664] ss:$28 sps:$4 sm:$0xff]  }
  0xf1   :  { %2419 = vmatpush1.bf16.msra.mxu0 %v5122_v56  ;;  %v5212_v56 = vld [vmem:[#allocation2 + $0x658] ss:$28 sps:$4 sm:$0xff]  }
  0xf2   :  { %2420 = vmatprep.subr.bf16.mxu0 %v5126_v59  ;;  %v5220_v59 = vld [vmem:[#allocation2 + $0x694] ss:$28 sps:$4 sm:$0xff]  }
  0xf3   :  { %2583 = vmatpush1.bf16.msra.mxu1 %v5151_v2  ;;  %v5224_v2 = vld [vmem:[#allocation2 + $0x6c8] ss:$28 sps:$4 sm:$0xff]  }
  0xf4   :  { %2584 = vmatprep.subr.bf16.mxu1 %v5155_v3  ;;  %v5249_v3 = vld [vmem:[#allocation2 + $0x69c] ss:$28 sps:$4 sm:$0xff]  }
  0xf5   :  { %2421 = vmatpush1.bf16.msra.mxu0 %v5128_v60  ;;  %v5218_v60 = vld [vmem:[#allocation2 + $0x690] ss:$28 sps:$4 sm:$0xff]  }
  0xf6   :  { %2431 = vmatprep.subr.bf16.mxu0 %v5135_v63  ;;  %v5226_v63 = vld [vmem:[#allocation2 + $0x6cc] ss:$28 sps:$4 sm:$0xff]  }
  0xf7   :  { %2585 = vmatpush1.bf16.msra.mxu1 %v5157_v6  ;;  %v6215_v6 = vcombine.low %v6200_v21, %v6200_v21  ;;  %v5265_v21 = vld [vmem:[#allocation2 + $0x740] ss:$28 sps:$4 sm:$0xff]  }
  0xf8   :  { %2423 = vmatmul.mubr.bf16.vlgmr.msra.gmra.mrb[0].mxu0 %v6193_v1  ;;  %2595 = vmatprep.subr.bf16.mxu1 %v5163_v7  ;;  %v5247_v7 = vld [vmem:[#allocation2 + $0x698] ss:$28 sps:$4 sm:$0xff]  }
  0xf9   :  { %2432 = vmatpush1.bf16.msra.mxu0 %v5133_v0  ;;  %2463 = vmatprep.mubr.bf16.mxu0 %v6204_v23  ;;  %v5241_v0 = vld [vmem:[#allocation2 + $0x660] ss:$28 sps:$4 sm:$0xff]  }
  0xfa   :  { %2433 = vmatprep.subr.bf16.mxu0 %v5142_v4  ;;  %2587 = vmatmul.mubr.bf16.vlgmr.msra.gmra.mrb[0].mxu1 %v6193_v1  ;;  %v5233_v4 = vld [vmem:[#allocation2 + $0x704] ss:$28 sps:$4 sm:$0xff]  }
  0xfb   :  { %2596 = vmatpush1.bf16.msra.mxu1 %v5161_v10  ;;  %2627 = vmatprep.mubr.bf16.mxu1 %v6204_v23  ;;  %v5240_v10 = vld [vmem:[#allocation2 + $0x73c] ss:$28 sps:$4 sm:$0xff]  }
  0xfc   :  { %2597 = vmatprep.subr.bf16.mxu1 %v5169_v11 }
  0xfd   :  { %2434 = vmatpush1.bf16.msra.mxu0 %v5140_v5  ;;  %v6211_v5 = vld [vmem:[%s6315_s0 + $0x10] sm:$0xff] }
  0xfe   :  { %2435 = vmatprep.subr.bf16.mxu0 %v5148_v8  ;;  %v5231_v8 = vld [vmem:[#allocation2 + $0x700] ss:$28 sps:$4 sm:$0xff]   ;;  %v6219_v11 = vcombine.high %v6211_v5, %v6211_v5 }
  0xff   :  { %2598 = vmatpush1.bf16.msra.mxu1 %v5167_v14  ;;  %v5261_v14 = vld [vmem:[#allocation2 + $0x70c] ss:$28 sps:$4 sm:$0xff]  }
 0x100   :  { %2599 = vmatprep.subr.bf16.mxu1 %v5175_v15  ;;  %v5246_v15 = vld [vmem:[#allocation2 + $0x774] ss:$28 sps:$4 sm:$0xff]  }
 0x101   :  { %2436 = vmatpush1.bf16.msra.mxu0 %v5146_v9  ;;  %v5255_v9 = vld [vmem:[#allocation2 + $0x6d4] ss:$28 sps:$4 sm:$0xff]  }
 0x102   :  { %2437 = vmatprep.subr.bf16.mxu0 %v5154_v12  ;;  %v5238_v12 = vld [vmem:[#allocation2 + $0x738] ss:$28 sps:$4 sm:$0xff]  }
 0x103   :  { %2600 = vmatpush1.bf16.msra.mxu1 %v5173_v18  ;;  %v5267_v18 = vld [vmem:[#allocation2 + $0x744] ss:$28 sps:$4 sm:$0xff]  }
 0x104   :  { %2601 = vmatprep.subr.bf16.mxu1 %v5181_v19  ;;  %v5252_v19 = vld [vmem:[#allocation2 + $0x7ac] ss:$28 sps:$4 sm:$0xff]  }
 0x105   :  { %2438 = vmatpush1.bf16.msra.mxu0 %v5152_v13  ;;  %v5253_v13 = vld [vmem:[#allocation2 + $0x6d0] ss:$28 sps:$4 sm:$0xff]  }
 0x106   :  { %2439 = vmatprep.subr.bf16.mxu0 %v5160_v16  ;;  %v5244_v16 = vld [vmem:[#allocation2 + $0x770] ss:$28 sps:$4 sm:$0xff]  }
 0x107   :  { %2602 = vmatpush1.bf16.msra.mxu1 %v5179_v24  ;;  %v5258_v24 = vld [vmem:[#allocation2 + $0x7e4] ss:$28 sps:$4 sm:$0xff]  }
 0x108   :  { %2603 = vmatprep.subr.bf16.mxu1 %v5187_v25  ;;  %v5256_v25 = vld [vmem:[#allocation2 + $0x7e0] ss:$28 sps:$4 sm:$0xff]  }
 0x109   :  { %2440 = vmatpush1.bf16.msra.mxu0 %v5158_v17  ;;  %v5259_v17 = vld [vmem:[#allocation2 + $0x708] ss:$28 sps:$4 sm:$0xff]  }
 0x10a   :  { %2441 = vmatprep.subr.bf16.mxu0 %v5166_v20  ;;  %v5250_v20 = vld [vmem:[#allocation2 + $0x7a8] ss:$28 sps:$4 sm:$0xff]  }
 0x10b   :  { %2604 = vmatpush1.bf16.msra.mxu1 %v5185_v28  ;;  %v5264_v28 = vld [vmem:[#allocation2 + $0x81c] ss:$28 sps:$4 sm:$0xff]  }
 0x10c   :  { %2605 = vmatprep.subr.bf16.mxu1 %v5193_v29  ;;  %v5262_v29 = vld [vmem:[#allocation2 + $0x818] ss:$28 sps:$4 sm:$0xff]  }
 0x10d   :  { %2442 = vmatpush1.bf16.msra.mxu0 %v5164_v22  ;;  %v5273_v22 = vld [vmem:[#allocation2 + $0x77c] ss:$28 sps:$4 sm:$0xff]  }
 0x10e   :  { %2443 = vmatprep.subr.bf16.mxu0 %v5172_v26  ;;  %v5271_v26 = vld [vmem:[#allocation2 + $0x778] ss:$28 sps:$4 sm:$0xff]  }
 0x10f   :  { %2606 = vmatpush1.bf16.msra.mxu1 %v5191_v32  ;;  %v5270_v32 = vld [vmem:[#allocation2 + $0x854] ss:$28 sps:$4 sm:$0xff]  }
 0x110   :  { %2607 = vmatprep.subr.bf16.mxu1 %v5199_v33  ;;  %v5268_v33 = vld [vmem:[#allocation2 + $0x850] ss:$28 sps:$4 sm:$0xff]  }
 0x111   :  { %2444 = vmatpush1.bf16.msra.mxu0 %v5170_v27  ;;  %v5279_v27 = vld [vmem:[#allocation2 + $0x7b4] ss:$28 sps:$4 sm:$0xff]  }
 0x112   :  { %2445 = vmatprep.subr.bf16.mxu0 %v5178_v30  ;;  %v5277_v30 = vld [vmem:[#allocation2 + $0x7b0] ss:$28 sps:$4 sm:$0xff]  }
 0x113   :  { %2608 = vmatpush1.bf16.msra.mxu1 %v5197_v36  ;;  %v5276_v36 = vld [vmem:[#allocation2 + $0x88c] ss:$28 sps:$4 sm:$0xff]  }
 0x114   :  { %2609 = vmatprep.subr.bf16.mxu1 %v5205_v37  ;;  %v5274_v37 = vld [vmem:[#allocation2 + $0x888] ss:$28 sps:$4 sm:$0xff]  }
 0x115   :  { %2446 = vmatpush1.bf16.msra.mxu0 %v5176_v31  ;;  %v5285_v31 = vld [vmem:[#allocation2 + $0x7ec] ss:$28 sps:$4 sm:$0xff]  }
 0x116   :  { %2447 = vmatprep.subr.bf16.mxu0 %v5184_v34  ;;  %v5283_v34 = vld [vmem:[#allocation2 + $0x7e8] ss:$28 sps:$4 sm:$0xff]  }
 0x117   :  { %2610 = vmatpush1.bf16.msra.mxu1 %v5203_v40  ;;  %v5282_v40 = vld [vmem:[#allocation2 + $0x8c4] ss:$28 sps:$4 sm:$0xff]  }
 0x118   :  { %2611 = vmatprep.subr.bf16.mxu1 %v5211_v42  ;;  %v5280_v42 = vld [vmem:[#allocation2 + $0x8c0] ss:$28 sps:$4 sm:$0xff]  }
 0x119   :  { %2448 = vmatpush1.bf16.msra.mxu0 %v5182_v35  ;;  %v5291_v35 = vld [vmem:[#allocation2 + $0x824] ss:$28 sps:$4 sm:$0xff]  }
 0x11a   :  { %2449 = vmatprep.subr.bf16.mxu0 %v5190_v38  ;;  %v5289_v38 = vld [vmem:[#allocation2 + $0x820] ss:$28 sps:$4 sm:$0xff]  }
 0x11b   :  { %2612 = vmatpush1.bf16.msra.mxu1 %v5209_v45  ;;  %v5288_v45 = vld [vmem:[#allocation2 + $0x8fc] ss:$28 sps:$4 sm:$0xff]  }
 0x11c   :  { %2613 = vmatprep.subr.bf16.mxu1 %v5217_v46  ;;  %v5286_v46 = vld [vmem:[#allocation2 + $0x8f8] ss:$28 sps:$4 sm:$0xff]  }
 0x11d   :  { %2450 = vmatpush1.bf16.msra.mxu0 %v5188_v39  ;;  %v5297_v39 = vld [vmem:[#allocation2 + $0x85c] ss:$28 sps:$4 sm:$0xff]  }
 0x11e   :  { %2451 = vmatprep.subr.bf16.mxu0 %v5196_v43  ;;  %v5295_v43 = vld [vmem:[#allocation2 + $0x858] ss:$28 sps:$4 sm:$0xff]  }
 0x11f   :  { %2614 = vmatpush1.bf16.msra.mxu1 %v5215_v49  ;;  %v5294_v49 = vld [vmem:[#allocation2 + $0x934] ss:$28 sps:$4 sm:$0xff]  }
 0x120   :  { %2615 = vmatprep.subr.bf16.mxu1 %v5223_v50  ;;  %v5307_v50 = vld [vmem:[#allocation2 + $0x8c8] ss:$28 sps:$4 sm:$0xff]  }
 0x121   :  { %2452 = vmatpush1.bf16.msra.mxu0 %v5194_v44  ;;  %v5303_v44 = vld [vmem:[#allocation2 + $0x894] ss:$28 sps:$4 sm:$0xff]  }
 0x122   :  { %2453 = vmatprep.subr.bf16.mxu0 %v5202_v47  ;;  %v5301_v47 = vld [vmem:[#allocation2 + $0x890] ss:$28 sps:$4 sm:$0xff]  }
 0x123   :  { %2616 = vmatpush1.bf16.msra.mxu1 %v5221_v53  ;;  %v5300_v53 = vld [vmem:[#allocation2 + $0x96c] ss:$28 sps:$4 sm:$0xff]  }
 0x124   :  { %2617 = vmatprep.subr.bf16.mxu1 %v5229_v54  ;;  %v5298_v54 = vld [vmem:[#allocation2 + $0x968] ss:$28 sps:$4 sm:$0xff]  }
 0x125   :  { %2454 = vmatpush1.bf16.msra.mxu0 %v5200_v48  ;;  %v5309_v48 = vld [vmem:[#allocation2 + $0x8cc] ss:$28 sps:$4 sm:$0xff]  }
 0x126   :  { %2455 = vmatprep.subr.bf16.mxu0 %v5208_v51  ;;  %v5292_v51 = vld [vmem:[#allocation2 + $0x930] ss:$28 sps:$4 sm:$0xff]  }
 0x127   :  { %2618 = vmatpush1.bf16.msra.mxu1 %v5227_v57  ;;  %v5306_v57 = vld [vmem:[#allocation2 + $0x9a4] ss:$28 sps:$4 sm:$0xff]  }
 0x128   :  { %2619 = vmatprep.subr.bf16.mxu1 %v5237_v58  ;;  %v5304_v58 = vld [vmem:[#allocation2 + $0x9a0] ss:$28 sps:$4 sm:$0xff]  }
 0x129   :  { %2456 = vmatpush1.bf16.msra.mxu0 %v5206_v52  ;;  %v5315_v52 = vld [vmem:[#allocation2 + $0x904] ss:$28 sps:$4 sm:$0xff]  }
 0x12a   :  { %2457 = vmatprep.subr.bf16.mxu0 %v5214_v55  ;;  %v5313_v55 = vld [vmem:[#allocation2 + $0x900] ss:$28 sps:$4 sm:$0xff]  }
 0x12b   :  { %2620 = vmatpush1.bf16.msra.mxu1 %v5235_v61  ;;  %v5312_v61 = vld [vmem:[#allocation2 + $0x9dc] ss:$28 sps:$4 sm:$0xff]  }
 0x12c   :  { %2621 = vmatprep.subr.bf16.mxu1 %v5243_v62  ;;  %v5310_v62 = vld [vmem:[#allocation2 + $0x9d8] ss:$28 sps:$4 sm:$0xff]  }
 0x12d   :  { %2458 = vmatpush1.bf16.msra.mxu0 %v5212_v56  ;;  %v5321_v56 = vld [vmem:[#allocation2 + $0x93c] ss:$28 sps:$4 sm:$0xff]  }
 0x12e   :  { %2459 = vmatprep.subr.bf16.mxu0 %v5220_v59  ;;  %v5319_v59 = vld [vmem:[#allocation2 + $0x938] ss:$28 sps:$4 sm:$0xff]  }
 0x12f   :  { %2622 = vmatpush1.bf16.msra.mxu1 %v5241_v0  ;;  %v5335_v0 = vld [vmem:[#allocation2 + $0x9ac] ss:$28 sps:$4 sm:$0xff]  }
 0x130   :  { %2623 = vmatprep.subr.bf16.mxu1 %v5249_v3  ;;  %v5316_v3 = vld [vmem:[#allocation2 + $0xa10] ss:$28 sps:$4 sm:$0xff]  }
 0x131   :  { %2460 = vmatpush1.bf16.msra.mxu0 %v5218_v60  ;;  %v5327_v60 = vld [vmem:[#allocation2 + $0x974] ss:$28 sps:$4 sm:$0xff]  }
 0x132   :  { %2461 = vmatprep.subr.bf16.mxu0 %v5226_v63  ;;  %v5325_v63 = vld [vmem:[#allocation2 + $0x970] ss:$28 sps:$4 sm:$0xff]  }
 0x133   :  { %2624 = vmatpush1.bf16.msra.mxu1 %v5247_v7  ;;  %v5338_v7 = vld [vmem:[#allocation2 + $0x9e4] ss:$28 sps:$4 sm:$0xff]  }
 0x134   :  { %2625 = vmatprep.subr.bf16.mxu1 %v5255_v9  ;;  %v5336_v9 = vld [vmem:[#allocation2 + $0x9e0] ss:$28 sps:$4 sm:$0xff]  }
 0x135   :  { %2462 = vmatpush1.bf16.msra.mxu0 %v5224_v2  ;;  %v5318_v2 = vld [vmem:[#allocation2 + $0xa14] ss:$28 sps:$4 sm:$0xff]  }
 0x136   :  { %2472 = vmatprep.subr.bf16.mxu0 %v5233_v4  ;;  %v5333_v4 = vld [vmem:[#allocation2 + $0x9a8] ss:$28 sps:$4 sm:$0xff]  }
 0x137   :  { %2626 = vmatpush1.bf16.msra.mxu1 %v5253_v13  ;;  %v5332_v13 = vld [vmem:[#allocation2 + $0xa84] ss:$28 sps:$4 sm:$0xff]  }
 0x138   :  { %2464 = vmatmul.mubr.bf16.vlgmr.msra.gmra.mrb[0].mxu0 %v6215_v6  ;;  %2636 = vmatprep.subr.bf16.mxu1 %v5261_v14  ;;  %v6227_v14 = vcombine.low %v6211_v5, %v6211_v5  ;;  %v5392_v5 = vld [vmem:[#allocation2 + $0x18] ss:$28 sps:$4 sm:$0xff]  }
 0x139   :  { %2473 = vmatpush1.bf16.msra.mxu0 %v5231_v8  ;;  %2504 = vmatprep.mubr.bf16.mxu0 %v6219_v11  ;;  %v5324_v8 = vld [vmem:[#allocation2 + $0xa4c] ss:$28 sps:$4 sm:$0xff]  }
 0x13a   :  { %2474 = vmatprep.subr.bf16.mxu0 %v5240_v10  ;;  %2628 = vmatmul.mubr.bf16.vlgmr.msra.gmra.mrb[0].mxu1 %v6215_v6  ;;  %v5322_v10 = vld [vmem:[#allocation2 + $0xa48] ss:$28 sps:$4 sm:$0xff]  }
 0x13b   :  { %2637 = vmatpush1.bf16.msra.mxu1 %v5259_v17  ;;  %2668 = vmatprep.mubr.bf16.mxu1 %v6219_v11  ;;  %v5345_v17 = vld [vmem:[#allocation2 + $0xa8c] ss:$28 sps:$4 sm:$0xff]  }
 0x13c   :  { %2638 = vmatprep.subr.bf16.mxu1 %v5267_v18  ;;  %v5348_v18 = vld [vmem:[#allocation2 + $0xa54] ss:$28 sps:$4 sm:$0xff]  }
 0x13d   :  { %2475 = vmatpush1.bf16.msra.mxu0 %v5238_v12  ;;  %v5341_v12 = vld [vmem:[#allocation2 + $0xa1c] ss:$28 sps:$4 sm:$0xff]  }
 0x13e   :  { %2476 = vmatprep.subr.bf16.mxu0 %v5246_v15  ;;  %v5330_v15 = vld [vmem:[#allocation2 + $0xa80] ss:$28 sps:$4 sm:$0xff]  }
 0x13f   :  { %2639 = vmatpush1.bf16.msra.mxu1 %v5265_v21  ;;  %v5391_v21 = vld [vmem:[#allocation2 + $0x1d8] ss:$28 sps:$4 sm:$0xff]  }
 0x140   :  { %2640 = vmatprep.subr.bf16.mxu1 %v5273_v22  ;;  %v5396_v22 = vld [vmem:[#allocation2 + $0x210] ss:$28 sps:$4 sm:$0xff]  }
 0x141   :  { %2477 = vmatpush1.bf16.msra.mxu0 %v5244_v16  ;;  %v5339_v16 = vld [vmem:[#allocation2 + $0xa18] ss:$28 sps:$4 sm:$0xff]  }
 0x142   :  { %2478 = vmatprep.subr.bf16.mxu0 %v5252_v19  ;;  %v5346_v19 = vld [vmem:[#allocation2 + $0xa50] ss:$28 sps:$4 sm:$0xff]  }
 0x143   :  { %2641 = vmatpush1.bf16.msra.mxu1 %v5271_v26  ;;  %v5397_v26 = vld [vmem:[#allocation2 + $0x50] ss:$28 sps:$4 sm:$0xff]  }
 0x144   :  { %2642 = vmatprep.subr.bf16.mxu1 %v5279_v27  ;;  %v5351_v27 = vld [vmem:[#allocation2 + $0x14] ss:$28 sps:$4 sm:$0xff]  }
 0x145   :  { %2479 = vmatpush1.bf16.msra.mxu0 %v5250_v20  ;;  %v5994_v20 = vmov 0  }
 0x146   :  { %2480 = vmatprep.subr.bf16.mxu0 %v5258_v24  ;;  %v5342_v24 = vld [vmem:[%s6315_s0 + $0x18] ss:$0 sps:$4 sm:$0xff]  }
 0x147   :  { %2643 = vmatpush1.bf16.msra.mxu1 %v5277_v30  ;;  %v5406_v30 = vld [vmem:[#allocation2 + $0x280] ss:$28 sps:$4 sm:$0xff]  }
 0x148   :  { %2644 = vmatprep.subr.bf16.mxu1 %v5285_v31  ;;  %v5349_v31 = vld [vmem:[#allocation2 + $0x10] ss:$28 sps:$4 sm:$0xff]  }
 0x149   :  { %2481 = vmatpush1.bf16.msra.mxu0 %v5256_v25  ;;  %v5343_v25 = vld [vmem:[#allocation2 + $0xa88] ss:$28 sps:$4 sm:$0xff]  }
 0x14a   :  { %2482 = vmatprep.subr.bf16.mxu0 %v5264_v28  ;;  %v5401_v28 = vld [vmem:[#allocation2 + $0x248] ss:$28 sps:$4 sm:$0xff]  }
 0x14b   :  { %2645 = vmatpush1.bf16.msra.mxu1 %v5283_v34  ;;  %v5411_v34 = vld [vmem:[#allocation2 + $0x2b8] ss:$28 sps:$4 sm:$0xff]  }
 0x14c   :  { %2646 = vmatprep.subr.bf16.mxu1 %v5291_v35  ;;  %v5352_v35 = vld [vmem:[#allocation2 + $0x48] ss:$28 sps:$4 sm:$0xff]  }
 0x14d   :  { %2483 = vmatpush1.bf16.msra.mxu0 %v5262_v29  ;;  %v5402_v29 = vld [vmem:[#allocation2 + $0x88] ss:$28 sps:$4 sm:$0xff]  }
 0x14e   :  { %2484 = vmatprep.subr.bf16.mxu0 %v5270_v32  ;;  %v5407_v32 = vld [vmem:[#allocation2 + $0xc0] ss:$28 sps:$4 sm:$0xff]  }
 0x14f   :  { %2647 = vmatpush1.bf16.msra.mxu1 %v5289_v38  ;;  %v5357_v38 = vld [vmem:[#allocation2 + $0x84] ss:$28 sps:$4 sm:$0xff]  }
 0x150   :  { %2648 = vmatprep.subr.bf16.mxu1 %v5297_v39  ;;  %v5355_v39 = vld [vmem:[#allocation2 + $0x80] ss:$28 sps:$4 sm:$0xff]  }
 0x151   :  { %2485 = vmatpush1.bf16.msra.mxu0 %v5268_v33  ;;  %v5354_v33 = vld [vmem:[#allocation2 + $0x4c] ss:$28 sps:$4 sm:$0xff]  }
 0x152   :  { %2486 = vmatprep.subr.bf16.mxu0 %v5276_v36  ;;  %v5412_v36 = vld [vmem:[#allocation2 + $0xf8] ss:$28 sps:$4 sm:$0xff]  }
 0x153   :  { %2649 = vmatpush1.bf16.msra.mxu1 %v5295_v43  ;;  %v5360_v43 = vld [vmem:[#allocation2 + $0xbc] ss:$28 sps:$4 sm:$0xff]  }
 0x154   :  { %2650 = vmatprep.subr.bf16.mxu1 %v5303_v44  ;;  %v5358_v44 = vld [vmem:[#allocation2 + $0xb8] ss:$28 sps:$4 sm:$0xff]  }
 0x155   :  { %2487 = vmatpush1.bf16.msra.mxu0 %v5274_v37  ;;  %v5416_v37 = vld [vmem:[#allocation2 + $0x2f0] ss:$28 sps:$4 sm:$0xff]  }
 0x156   :  { %2488 = vmatprep.subr.bf16.mxu0 %v5282_v40  ;;  %v5417_v40 = vld [vmem:[#allocation2 + $0x130] ss:$28 sps:$4 sm:$0xff]  }
 0x157   :  { %2651 = vmatpush1.bf16.msra.mxu1 %v5301_v47  ;;  %v5427_v47 = vld [vmem:[#allocation2 + $0x1a0] ss:$28 sps:$4 sm:$0xff]  }
 0x158   :  { %2652 = vmatprep.subr.bf16.mxu1 %v5309_v48  ;;  %v5361_v48 = vld [vmem:[#allocation2 + $0xf0] ss:$28 sps:$4 sm:$0xff]  }
 0x159   :  { %2489 = vmatpush1.bf16.msra.mxu0 %v5280_v42  ;;  %v5421_v42 = vld [vmem:[#allocation2 + $0x328] ss:$28 sps:$4 sm:$0xff]  }
 0x15a   :  { %2490 = vmatprep.subr.bf16.mxu0 %v5288_v45  ;;  %v5422_v45 = vld [vmem:[#allocation2 + $0x168] ss:$28 sps:$4 sm:$0xff]  }
 0x15b   :  { %2653 = vmatpush1.bf16.msra.mxu1 %v5307_v50  ;;  %v5366_v50 = vld [vmem:[#allocation2 + $0x12c] ss:$28 sps:$4 sm:$0xff]  }
 0x15c   :  { %2654 = vmatprep.subr.bf16.mxu1 %v5315_v52  ;;  %v5364_v52 = vld [vmem:[#allocation2 + $0x128] ss:$28 sps:$4 sm:$0xff]  }
 0x15d   :  { %2491 = vmatpush1.bf16.msra.mxu0 %v5286_v46  ;;  %v5426_v46 = vld [vmem:[#allocation2 + $0x360] ss:$28 sps:$4 sm:$0xff]  }
 0x15e   :  { %2492 = vmatprep.subr.bf16.mxu0 %v5294_v49  ;;  %v5431_v49 = vld [vmem:[#allocation2 + $0x558] ss:$28 sps:$4 sm:$0xff]  }
 0x15f   :  { %2655 = vmatpush1.bf16.msra.mxu1 %v5313_v55  ;;  %v5437_v55 = vld [vmem:[#allocation2 + $0x3d0] ss:$28 sps:$4 sm:$0xff]  }
 0x160   :  { %2656 = vmatprep.subr.bf16.mxu1 %v5321_v56  ;;  %v5367_v56 = vld [vmem:[#allocation2 + $0x160] ss:$28 sps:$4 sm:$0xff]  }
 0x161   :  { %2493 = vmatpush1.bf16.msra.mxu0 %v5292_v51  ;;  %v5432_v51 = vld [vmem:[#allocation2 + $0x398] ss:$28 sps:$4 sm:$0xff]  }
 0x162   :  { %2494 = vmatprep.subr.bf16.mxu0 %v5300_v53  ;;  %v5436_v53 = vld [vmem:[#allocation2 + $0x590] ss:$28 sps:$4 sm:$0xff]  }
 0x163   :  { %2657 = vmatpush1.bf16.msra.mxu1 %v5319_v59  ;;  %v5442_v59 = vld [vmem:[#allocation2 + $0x408] ss:$28 sps:$4 sm:$0xff]  }
 0x164   :  { %2658 = vmatprep.subr.bf16.mxu1 %v5327_v60  ;;  %v5370_v60 = vld [vmem:[#allocation2 + $0x198] ss:$28 sps:$4 sm:$0xff]  }
 0x165   :  { %2495 = vmatpush1.bf16.msra.mxu0 %v5298_v54  ;;  %v5369_v54 = vld [vmem:[#allocation2 + $0x164] ss:$28 sps:$4 sm:$0xff]  }
 0x166   :  { %2496 = vmatprep.subr.bf16.mxu0 %v5306_v57  ;;  %v5441_v57 = vld [vmem:[#allocation2 + $0x5c8] ss:$28 sps:$4 sm:$0xff]  }
 0x167   :  { %2659 = vmatpush1.bf16.msra.mxu1 %v5325_v63  ;;  %v5447_v63 = vld [vmem:[#allocation2 + $0x440] ss:$28 sps:$4 sm:$0xff]  }
 0x168   :  { %2660 = vmatprep.subr.bf16.mxu1 %v5335_v0  ;;  %v5373_v0 = vld [vmem:[#allocation2 + $0x1d0] ss:$28 sps:$4 sm:$0xff]  }
 0x169   :  { %2497 = vmatpush1.bf16.msra.mxu0 %v5304_v58  ;;  %v5372_v58 = vld [vmem:[#allocation2 + $0x19c] ss:$28 sps:$4 sm:$0xff]  }
 0x16a   :  { %2498 = vmatprep.subr.bf16.mxu0 %v5312_v61  ;;  %v5446_v61 = vld [vmem:[#allocation2 + $0x600] ss:$28 sps:$4 sm:$0xff]  }
 0x16b   :  { %2661 = vmatpush1.bf16.msra.mxu1 %v5333_v4  ;;  %v5452_v4 = vld [vmem:[#allocation2 + $0x478] ss:$28 sps:$4 sm:$0xff]  }
 0x16c   :  { %2662 = vmatprep.subr.bf16.mxu1 %v5338_v7  ;;  %v5376_v7 = vld [vmem:[#allocation2 + $0x208] ss:$28 sps:$4 sm:$0xff]  }
 0x16d   :  { %2499 = vmatpush1.bf16.msra.mxu0 %v5310_v62  ;;  %v5375_v62 = vld [vmem:[#allocation2 + $0x1d4] ss:$28 sps:$4 sm:$0xff]  }
 0x16e   :  { %2500 = vmatprep.subr.bf16.mxu0 %v5318_v2  ;;  %v5451_v2 = vld [vmem:[#allocation2 + $0x638] ss:$28 sps:$4 sm:$0xff]  }
 0x16f   :  { %2663 = vmatpush1.bf16.msra.mxu1 %v5336_v9  ;;  %v5381_v9 = vld [vmem:[#allocation2 + $0x244] ss:$28 sps:$4 sm:$0xff]  }
 0x170   :  { %2664 = vmatprep.subr.bf16.mxu1 %v5341_v12  ;;  %v5379_v12 = vld [vmem:[#allocation2 + $0x240] ss:$28 sps:$4 sm:$0xff]  }
 0x171   :  { %2501 = vmatpush1.bf16.msra.mxu0 %v5316_v3  ;;  %v5378_v3 = vld [vmem:[#allocation2 + $0x20c] ss:$28 sps:$4 sm:$0xff]  }
 0x172   :  { %2502 = vmatprep.subr.bf16.mxu0 %v5324_v8  ;;  %v5456_v8 = vld [vmem:[#allocation2 + $0x670] ss:$28 sps:$4 sm:$0xff]  }
 0x173   :  { %2665 = vmatpush1.bf16.msra.mxu1 %v5339_v16  ;;  %v5462_v16 = vld [vmem:[#allocation2 + $0x4e8] ss:$28 sps:$4 sm:$0xff]  }
 0x174   :  { %2666 = vmatprep.subr.bf16.mxu1 %v5348_v18  ;;  %v5466_v18 = vld [vmem:[#allocation2 + $0x6e0] ss:$28 sps:$4 sm:$0xff]  }
 0x175   :  { %2503 = vmatpush1.bf16.msra.mxu0 %v5322_v10  ;;  %v5457_v10 = vld [vmem:[#allocation2 + $0x4b0] ss:$28 sps:$4 sm:$0xff]  }
 0x176   :  { %2513 = vmatprep.subr.bf16.mxu0 %v5332_v13  ;;  %v5461_v13 = vld [vmem:[#allocation2 + $0x6a8] ss:$28 sps:$4 sm:$0xff]  }
 0x177   :  { %2667 = vmatpush1.bf16.msra.mxu1 %v5346_v19  ;;  %v5387_v19 = vld [vmem:[#allocation2 + $0x2b4] ss:$28 sps:$4 sm:$0xff]  }
 0x178   :  { %2505 = vmatmul.mubr.bf16.vlgmr.msra.gmra.mrb[0].mxu0 %v6227_v14  ;;  %4821 = vmatprep.subr.bf16.mxu1 %v5391_v21  ;;  %v5467_v21 = vld [vmem:[#allocation2 + $0x520] ss:$28 sps:$4 sm:$0xff]  }
 0x179   :  { %2514 = vmatpush1.bf16.msra.mxu0 %v5330_v15  ;;  %2545 = vmatprep.mubr.bf16.mxu0 %v5994_v20  ;;  %v5384_v15 = vld [vmem:[#allocation2 + $0x27c] ss:$28 sps:$4 sm:$0xff]  }
 0x17a   :  { %2677 = vmatprep.subr.bf16.mxu0 %v5345_v17  ;;  %2669 = vmatmul.mubr.bf16.vlgmr.msra.gmra.mrb[0].mxu1 %v6227_v14  ;;  %v5382_v17 = vld [vmem:[#allocation2 + $0x278] ss:$28 sps:$4 sm:$0xff]  }
 0x17b   :  { %4822 = vmatpush3.bf16.msra.mxu1 %v5392_v5  ;;  %2914 = vmatprep.mubr.bf16.mxu1 %v6189_v41  ;;  %v5385_v5 = vld [vmem:[#allocation2 + $0x2b0] ss:$28 sps:$4 sm:$0xff]  }
 0x17c   :  { %4823 = vmatprep.subr.bf16.mxu1 %v5396_v22  ;;  %v5471_v22 = vld [vmem:[#allocation2 + $0x8d8] ss:$28 sps:$4 sm:$0xff]  }
 0x17f   :  { %4824 = vmatpush3.bf16.msra.mxu1 %v5397_v26  ;;  %v5388_v26 = vld [vmem:[#allocation2 + $0x2e8] ss:$28 sps:$4 sm:$0xff]  }
 0x180   :  { %4825 = vmatprep.subr.bf16.mxu1 %v5401_v28  ;;  %v5395_v28 = vld [vmem:[#allocation2 + $0x324] ss:$28 sps:$4 sm:$0xff]  }
 0x183   :  { %4826 = vmatpush3.bf16.msra.mxu1 %v5402_v29  ;;  %v5477_v29 = vld [vmem:[#allocation2 + $0x750] ss:$28 sps:$4 sm:$0xff]  }
 0x184   :  { %4670 = vmatmul.mubr.msk.bf16.vlgmr.msra.gmra.mrb[0].mxu0 %vm2386_vm0, %v5342_v24  ;;  %4827 = vmatprep.subr.bf16.mxu1 %v5406_v30  ;;  %v5393_v30 = vld [vmem:[#allocation2 + $0x320] ss:$28 sps:$4 sm:$0xff]  }
 0x185   :  { %2678 = vmatpush1.bf16.msra.mxu0 %v5343_v25  ;;  %2709 = vmatprep.mubr.bf16.mxu0 %v5994_v20  ;;  %v5472_v25 = vld [vmem:[#allocation2 + $0x718] ss:$28 sps:$4 sm:$0xff]  }
 0x186   :  { %2718 = vmatprep.subr.bf16.mxu0 %v5351_v27  ;;  %v5476_v27 = vld [vmem:[#allocation2 + $0x910] ss:$28 sps:$4 sm:$0xff]  }
 0x187   :  { %4828 = vmatpush3.bf16.msra.mxu1 %v5407_v32  ;;  %v5400_v32 = vld [vmem:[#allocation2 + $0x35c] ss:$28 sps:$4 sm:$0xff]  }
 0x188   :  { %4829 = vmatprep.subr.bf16.mxu1 %v5411_v34  ;;  %v5398_v34 = vld [vmem:[#allocation2 + $0x358] ss:$28 sps:$4 sm:$0xff]  }
 0x18b   :  { %4830 = vmatpush3.bf16.msra.mxu1 %v5412_v36  ;;  %v5405_v36 = vld [vmem:[#allocation2 + $0x394] ss:$28 sps:$4 sm:$0xff]  }
 0x18c   :  { %4671 = vmatmul.mubr.msk.bf16.vlgmr.msra.gmra.mrb[4].mxu0 %vm2386_vm0, %v5342_v24  ;;  %4831 = vmatprep.subr.bf16.mxu1 %v5416_v37  ;;  %v5390_v24 = vld [vmem:[#allocation2 + $0x2ec] ss:$28 sps:$4 sm:$0xff]   ;;  %v5487_v37 = vld [vmem:[#allocation2 + $0x7c0] ss:$28 sps:$4 sm:$0xff]  }
 0x18d   :  { %2719 = vmatpush1.bf16.msra.mxu0 %v5349_v31  ;;  %2750 = vmatprep.mubr.bf16.mxu0 %v6189_v41  ;;  %v5363_v41 = vld [vmem:[#allocation2 + $0xf4] ss:$28 sps:$4 sm:$0xff]   ;;  %v5481_v31 = vld [vmem:[#allocation2 + $0x948] ss:$28 sps:$4 sm:$0xff]  }
 0x18e   :  { %2720 = vmatprep.subr.bf16.mxu0 %v5354_v33  ;;  %v5482_v33 = vld [vmem:[#allocation2 + $0x788] ss:$28 sps:$4 sm:$0xff]  }
 0x18f   :  { %4832 = vmatpush3.bf16.msra.mxu1 %v5417_v40  ;;  %v5491_v40 = vld [vmem:[#allocation2 + $0x9b8] ss:$28 sps:$4 sm:$0xff]  }
 0x190   :  { %4833 = vmatprep.subr.bf16.mxu1 %v5421_v42  ;;  %v5492_v42 = vld [vmem:[#allocation2 + $0x7f8] ss:$28 sps:$4 sm:$0xff]  }
 0x191   :  { %2721 = vmatpush1.bf16.msra.mxu0 %v5352_v35  ;;  %v5486_v35 = vld [vmem:[#allocation2 + $0x980] ss:$28 sps:$4 sm:$0xff]  }
 0x192   :  { %2722 = vmatprep.subr.bf16.mxu0 %v5357_v38  ;;  %v5403_v38 = vld [vmem:[#allocation2 + $0x390] ss:$28 sps:$4 sm:$0xff]  }
 0x193   :  { %4834 = vmatpush3.bf16.msra.mxu1 %v5422_v45  ;;  %v5415_v45 = vld [vmem:[#allocation2 + $0x404] ss:$28 sps:$4 sm:$0xff]  }
 0x194   :  { %4835 = vmatprep.subr.bf16.mxu1 %v5426_v46  ;;  %v5497_v46 = vld [vmem:[#allocation2 + $0x830] ss:$28 sps:$4 sm:$0xff]  }
 0x195   :  { %2723 = vmatpush1.bf16.msra.mxu0 %v5355_v39  ;;  %v5410_v39 = vld [vmem:[#allocation2 + $0x3cc] ss:$28 sps:$4 sm:$0xff]  }
 0x196   :  { %2724 = vmatprep.subr.bf16.mxu0 %v5360_v43  ;;  %v5408_v43 = vld [vmem:[#allocation2 + $0x3c8] ss:$28 sps:$4 sm:$0xff]  }
 0x197   :  { %4836 = vmatpush3.bf16.msra.mxu1 %v5427_v47  ;;  %v5501_v47 = vld [vmem:[#allocation2 + $0xa28] ss:$28 sps:$4 sm:$0xff]  }
 0x198   :  { %4843 = vmatprep.subr.bf16.mxu1 %v5431_v49  ;;  %v5502_v49 = vld [vmem:[#allocation2 + $0x868] ss:$28 sps:$4 sm:$0xff]  }
 0x199   :  { %2725 = vmatpush1.bf16.msra.mxu0 %v5358_v44  ;;  %v5496_v44 = vld [vmem:[#allocation2 + $0x9f0] ss:$28 sps:$4 sm:$0xff]  }
 0x19a   :  { %2726 = vmatprep.subr.bf16.mxu0 %v5363_v41  ;;  %2915 = vmatmul.mubr.bf16.vlgmr.msra.gmra.mrb[4].mxu1 %v6193_v1  ;;  %v5413_v41 = vld [vmem:[#allocation2 + $0x400] ss:$28 sps:$4 sm:$0xff]  }
 0x19b   :  { %4844 = vmatpush3.bf16.msra.mxu1 %v5432_v51  ;;  %2954 = vmatprep.mubr.bf16.mxu1 %v6204_v23  ;;  %v5425_v51 = vld [vmem:[#allocation2 + $0x474] ss:$28 sps:$4 sm:$0xff]  }
 0x19c   :  { %4845 = vmatprep.subr.bf16.mxu1 %v5436_v53  ;;  %v5513_v53 = vld [vmem:[#allocation6 + $0x4] ss:$8 sps:$4 sm:$0xff]  }
 0x19d   :  { %2727 = vmatpush1.bf16.msra.mxu0 %v5361_v48  ;;  %v5420_v48 = vld [vmem:[#allocation2 + $0x43c] ss:$28 sps:$4 sm:$0xff]  }
 0x19e   :  { %2728 = vmatprep.subr.bf16.mxu0 %v5366_v50  ;;  %v5506_v50 = vld [vmem:[#allocation2 + $0xa60] ss:$28 sps:$4 sm:$0xff]  }
 0x19f   :  { %4846 = vmatpush3.bf16.msra.mxu1 %v5437_v55  ;;  %v5428_v55 = vld [vmem:[#allocation2 + $0x4a8] ss:$28 sps:$4 sm:$0xff]  }
 0x1a0   :  { %4847 = vmatprep.subr.bf16.mxu1 %v5441_v57  ;;  %v5519_v57 = vld [vmem:[#allocation6 + $0x14] ss:$8 sps:$4 sm:$0xff]  }
 0x1a1   :  { %2729 = vmatpush1.bf16.msra.mxu0 %v5364_v52  ;;  %v5423_v52 = vld [vmem:[#allocation2 + $0x470] ss:$28 sps:$4 sm:$0xff]  }
 0x1a2   :  { %2730 = vmatprep.subr.bf16.mxu0 %v5369_v54  ;;  %v5430_v54 = vld [vmem:[#allocation2 + $0x4ac] ss:$28 sps:$4 sm:$0xff]  }
 0x1a3   :  { %4848 = vmatpush3.bf16.msra.mxu1 %v5442_v59  ;;  %v5517_v59 = vld [vmem:[#allocation6 + $0x10] ss:$8 sps:$4 sm:$0xff]  }
 0x1a4   :  { %4849 = vmatprep.subr.bf16.mxu1 %v5446_v61  ;;  %v5525_v61 = vld [vmem:[#allocation6 + $0x24] ss:$8 sps:$4 sm:$0xff]  }
 0x1a5   :  { %2731 = vmatpush1.bf16.msra.mxu0 %v5367_v56  ;;  %v5511_v56 = vld [vmem:[#allocation6] ss:$8 sps:$4 sm:$0xff]  }
 0x1a6   :  { %2732 = vmatprep.subr.bf16.mxu0 %v5372_v58  ;;  %v5435_v58 = vld [vmem:[#allocation2 + $0x4e4] ss:$28 sps:$4 sm:$0xff]  }
 0x1a7   :  { %4850 = vmatpush3.bf16.msra.mxu1 %v5447_v63  ;;  %v5438_v63 = vld [vmem:[#allocation2 + $0x518] ss:$28 sps:$4 sm:$0xff]  }
 0x1a8   :  { %4851 = vmatprep.subr.bf16.mxu1 %v5451_v2  ;;  %v5445_v2 = vld [vmem:[#allocation2 + $0x554] ss:$28 sps:$4 sm:$0xff]  }
 0x1a9   :  { %2733 = vmatpush1.bf16.msra.mxu0 %v5370_v60  ;;  %v5433_v60 = vld [vmem:[#allocation2 + $0x4e0] ss:$28 sps:$4 sm:$0xff]  }
 0x1aa   :  { %2734 = vmatprep.subr.bf16.mxu0 %v5375_v62  ;;  %v5440_v62 = vld [vmem:[#allocation2 + $0x51c] ss:$28 sps:$4 sm:$0xff]  }
 0x1ab   :  { %4852 = vmatpush3.bf16.msra.mxu1 %v5452_v4  ;;  %v5529_v4 = vld [vmem:[#allocation6 + $0x30] ss:$8 sps:$4 sm:$0xff]  }
 0x1ac   :  { %4853 = vmatprep.subr.bf16.mxu1 %v5456_v8  ;;  %v5450_v8 = vld [vmem:[#allocation2 + $0x58c] ss:$28 sps:$4 sm:$0xff]  }
 0x1ad   :  { %2735 = vmatpush1.bf16.msra.mxu0 %v5373_v0  ;;  %v5523_v0 = vld [vmem:[#allocation6 + $0x20] ss:$8 sps:$4 sm:$0xff]  }
 0x1ae   :  { %2736 = vmatprep.subr.bf16.mxu0 %v5378_v3  ;;  %v5531_v3 = vld [vmem:[#allocation6 + $0x34] ss:$8 sps:$4 sm:$0xff]  }
 0x1af   :  { %4854 = vmatpush3.bf16.msra.mxu1 %v5457_v10  ;;  %v5535_v10 = vld [vmem:[#allocation6 + $0x40] ss:$8 sps:$4 sm:$0xff]  }
 0x1b0   :  { %4855 = vmatprep.subr.bf16.mxu1 %v5461_v13  ;;  %v5455_v13 = vld [vmem:[#allocation2 + $0x5c4] ss:$28 sps:$4 sm:$0xff]  }
 0x1b1   :  { %2737 = vmatpush1.bf16.msra.mxu0 %v5376_v7  ;;  %v5443_v7 = vld [vmem:[#allocation2 + $0x550] ss:$28 sps:$4 sm:$0xff]  }
 0x1b2   :  { %2738 = vmatprep.subr.bf16.mxu0 %v5381_v9  ;;  %v5537_v9 = vld [vmem:[#allocation6 + $0x44] ss:$8 sps:$4 sm:$0xff]  }
 0x1b3   :  { %4856 = vmatpush3.bf16.msra.mxu1 %v5462_v16  ;;  %v5541_v16 = vld [vmem:[#allocation6 + $0x50] ss:$8 sps:$4 sm:$0xff]  }
 0x1b4   :  { %4857 = vmatprep.subr.bf16.mxu1 %v5466_v18  ;;  %v5460_v18 = vld [vmem:[#allocation2 + $0x5fc] ss:$28 sps:$4 sm:$0xff]  }
 0x1b5   :  { %2739 = vmatpush1.bf16.msra.mxu0 %v5379_v12  ;;  %v5448_v12 = vld [vmem:[#allocation2 + $0x588] ss:$28 sps:$4 sm:$0xff]  }
 0x1b6   :  { %2740 = vmatprep.subr.bf16.mxu0 %v5384_v15  ;;  %v5543_v15 = vld [vmem:[#allocation6 + $0x54] ss:$8 sps:$4 sm:$0xff]  }
 0x1b7   :  { %4858 = vmatpush3.bf16.msra.mxu1 %v5467_v21  ;;  %v5547_v21 = vld [vmem:[#allocation6 + $0x60] ss:$8 sps:$4 sm:$0xff]  }
 0x1b8   :  { %4865 = vmatprep.subr.bf16.mxu1 %v5471_v22  ;;  %v5465_v22 = vld [vmem:[#allocation2 + $0x634] ss:$28 sps:$4 sm:$0xff]  }
 0x1b9   :  { %2741 = vmatpush1.bf16.msra.mxu0 %v5382_v17  ;;  %v5453_v17 = vld [vmem:[#allocation2 + $0x5c0] ss:$28 sps:$4 sm:$0xff]  }
 0x1ba   :  { %2742 = vmatprep.subr.bf16.mxu0 %v5387_v19  ;;  %2955 = vmatmul.mubr.bf16.vlgmr.msra.gmra.mrb[8].mxu1 %v6215_v6  ;;  %v5549_v19 = vld [vmem:[#allocation6 + $0x64] ss:$8 sps:$4 sm:$0xff]  }
 0x1bb   :  { %4866 = vmatpush3.bf16.msra.mxu1 %v5472_v25  ;;  %2994 = vmatprep.mubr.bf16.mxu1 %v6219_v11  ;;  %v5553_v25 = vld [vmem:[#allocation6 + $0x70] ss:$8 sps:$4 sm:$0xff]  }
 0x1bc   :  { %4867 = vmatprep.subr.bf16.mxu1 %v5476_v27  ;;  %v5561_v27 = vld [vmem:[#allocation6 + $0x84] ss:$8 sps:$4 sm:$0xff]  }
 0x1bd   :  { %2743 = vmatpush1.bf16.msra.mxu0 %v5385_v5  ;;  %v5458_v5 = vld [vmem:[#allocation2 + $0x5f8] ss:$28 sps:$4 sm:$0xff]  }
 0x1be   :  { %2744 = vmatprep.subr.bf16.mxu0 %v5390_v24  ;;  %v5555_v24 = vld [vmem:[#allocation6 + $0x74] ss:$8 sps:$4 sm:$0xff]  }
 0x1bf   :  { %4868 = vmatpush3.bf16.msra.mxu1 %v5477_v29  ;;  %v5559_v29 = vld [vmem:[#allocation6 + $0x80] ss:$8 sps:$4 sm:$0xff]  }
 0x1c0   :  { %4869 = vmatprep.subr.bf16.mxu1 %v5481_v31  ;;  %v5567_v31 = vld [vmem:[#allocation6 + $0x94] ss:$8 sps:$4 sm:$0xff]  }
 0x1c1   :  { %2745 = vmatpush1.bf16.msra.mxu0 %v5388_v26  ;;  %v5463_v26 = vld [vmem:[#allocation2 + $0x630] ss:$28 sps:$4 sm:$0xff]  }
 0x1c2   :  { %2746 = vmatprep.subr.bf16.mxu0 %v5395_v28  ;;  %v5470_v28 = vld [vmem:[#allocation2 + $0x66c] ss:$28 sps:$4 sm:$0xff]  }
 0x1c3   :  { %4870 = vmatpush3.bf16.msra.mxu1 %v5482_v33  ;;  %v5565_v33 = vld [vmem:[#allocation6 + $0x90] ss:$8 sps:$4 sm:$0xff]  }
 0x1c4   :  { %4871 = vmatprep.subr.bf16.mxu1 %v5486_v35  ;;  %v5573_v35 = vld [vmem:[#allocation6 + $0xa4] ss:$8 sps:$4 sm:$0xff]  }
 0x1c5   :  { %2747 = vmatpush1.bf16.msra.mxu0 %v5393_v30  ;;  %v5468_v30 = vld [vmem:[#allocation2 + $0x668] ss:$28 sps:$4 sm:$0xff]  }
 0x1c6   :  { %2748 = vmatprep.subr.bf16.mxu0 %v5400_v32  ;;  %v5475_v32 = vld [vmem:[#allocation2 + $0x6a4] ss:$28 sps:$4 sm:$0xff]  }
 0x1c7   :  { %4872 = vmatpush3.bf16.msra.mxu1 %v5487_v37  ;;  %v5571_v37 = vld [vmem:[#allocation6 + $0xa0] ss:$8 sps:$4 sm:$0xff]  }
 0x1c8   :  { %4873 = vmatprep.subr.bf16.mxu1 %v5491_v40  ;;  %v5485_v40 = vld [vmem:[#allocation2 + $0x714] ss:$28 sps:$4 sm:$0xff]  }
 0x1c9   :  { %2749 = vmatpush1.bf16.msra.mxu0 %v5398_v34  ;;  %v5473_v34 = vld [vmem:[#allocation2 + $0x6a0] ss:$28 sps:$4 sm:$0xff]  }
 0x1ca   :  { %2759 = vmatprep.subr.bf16.mxu0 %v5405_v36  ;;  %v5480_v36 = vld [vmem:[#allocation2 + $0x6dc] ss:$28 sps:$4 sm:$0xff]  }
 0x1cb   :  { %4874 = vmatpush3.bf16.msra.mxu1 %v5492_v42  ;;  %v5577_v42 = vld [vmem:[#allocation6 + $0xb0] ss:$8 sps:$4 sm:$0xff]  }
 0x1cc   :  { %2751 = vmatmul.mubr.bf16.vlgmr.msra.gmra.mrb[8].mxu0 %v6193_v1  ;;  %4875 = vmatprep.subr.bf16.mxu1 %v5496_v44  ;;  %v5418_v1 = vld [vmem:[#allocation2 + $0x438] ss:$28 sps:$4 sm:$0xff]   ;;  %v5490_v44 = vld [vmem:[#allocation2 + $0x74c] ss:$28 sps:$4 sm:$0xff]  }
 0x1cd   :  { %2760 = vmatpush1.bf16.msra.mxu0 %v5403_v38  ;;  %2791 = vmatprep.mubr.bf16.mxu0 %v6204_v23  ;;  %v5507_v23 = vld [vmem:[#allocation2 + $0x8a0] ss:$28 sps:$4 sm:$0xff]   ;;  %v5478_v38 = vld [vmem:[#allocation2 + $0x6d8] ss:$28 sps:$4 sm:$0xff]  }
 0x1ce   :  { %2761 = vmatprep.subr.bf16.mxu0 %v5410_v39  ;;  %v5579_v39 = vld [vmem:[#allocation6 + $0xb4] ss:$8 sps:$4 sm:$0xff]  }
 0x1cf   :  { %4876 = vmatpush3.bf16.msra.mxu1 %v5497_v46  ;;  %v5580_v46 = vld [vmem:[#allocation6 + $0xc0] ss:$8 sps:$4 sm:$0xff]  }
 0x1d0   :  { %4877 = vmatprep.subr.bf16.mxu1 %v5501_v47  ;;  %v5585_v47 = vld [vmem:[#allocation6 + $0xd4] ss:$8 sps:$4 sm:$0xff]  }
 0x1d1   :  { %2762 = vmatpush1.bf16.msra.mxu0 %v5408_v43  ;;  %v5483_v43 = vld [vmem:[#allocation2 + $0x710] ss:$28 sps:$4 sm:$0xff]  }
 0x1d2   :  { %2763 = vmatprep.subr.bf16.mxu0 %v5415_v45  ;;  %v5582_v45 = vld [vmem:[#allocation6 + $0xc4] ss:$8 sps:$4 sm:$0xff]  }
 0x1d3   :  { %4878 = vmatpush3.bf16.msra.mxu1 %v5502_v49  ;;  %v5583_v49 = vld [vmem:[#allocation6 + $0xd0] ss:$8 sps:$4 sm:$0xff]  }
 0x1d4   :  { %4879 = vmatprep.subr.bf16.mxu1 %v5506_v50  ;;  %v5588_v50 = vld [vmem:[#allocation6 + $0xe4] ss:$8 sps:$4 sm:$0xff]  }
 0x1d5   :  { %2764 = vmatpush1.bf16.msra.mxu0 %v5413_v41  ;;  %v5488_v41 = vld [vmem:[#allocation2 + $0x748] ss:$28 sps:$4 sm:$0xff]  }
 0x1d6   :  { %2765 = vmatprep.subr.bf16.mxu0 %v5420_v48  ;;  %v5495_v48 = vld [vmem:[#allocation2 + $0x784] ss:$28 sps:$4 sm:$0xff]  }
 0x1d7   :  { %4880 = vmatpush3.bf16.msra.mxu1 %v5507_v23  ;;  %v5498_v23 = vld [vmem:[#allocation2 + $0x7b8] ss:$28 sps:$4 sm:$0xff]  }
 0x1d8   :  { %3740 = vmatprep.subr.bf16.mxu1 %v5513_v53  ;;  %v5589_v53 = vld [vmem:[#allocation6 + $0xf0] ss:$8 sps:$4 sm:$0xff]  }
 0x1d9   :  { %2766 = vmatpush1.bf16.msra.mxu0 %v5418_v1  ;;  %v5493_v1 = vld [vmem:[#allocation2 + $0x780] ss:$28 sps:$4 sm:$0xff]  }
 0x1da   :  { %2767 = vmatprep.subr.bf16.mxu0 %v5425_v51  ;;  %2995 = vmatmul.mubr.bf16.vlgmr.msra.gmra.mrb[12].mxu1 %v6227_v14  ;;  %v5500_v51 = vld [vmem:[#allocation2 + $0x7bc] ss:$28 sps:$4 sm:$0xff]  }
 0x1db   :  { %3741 = vmatpush1.bf16.msra.mxu1 %v5511_v56  ;;  %v5510_v56 = vld [vmem:[#allocation2 + $0x82c] ss:$28 sps:$4 sm:$0xff]  }
 0x1dc   :  { %3742 = vmatprep.subr.bf16.mxu1 %v5519_v57  ;;  %v5508_v57 = vld [vmem:[#allocation2 + $0x828] ss:$28 sps:$4 sm:$0xff]  }
 0x1dd   :  { %2768 = vmatpush1.bf16.msra.mxu0 %v5423_v52  ;;  %v5591_v52 = vld [vmem:[#allocation6 + $0xf4] ss:$8 sps:$4 sm:$0xff]  }
 0x1de   :  { %2769 = vmatprep.subr.bf16.mxu0 %v5430_v54  ;;  %v5503_v54 = vld [vmem:[#allocation2 + $0x7f0] ss:$28 sps:$4 sm:$0xff]  }
 0x1df   :  { %3743 = vmatpush1.bf16.msra.mxu1 %v5517_v59  ;;  %v5514_v59 = vld [vmem:[#allocation2 + $0x860] ss:$28 sps:$4 sm:$0xff]  }
 0x1e0   :  { %3744 = vmatprep.subr.bf16.mxu1 %v5525_v61  ;;  %v5520_v61 = vld [vmem:[#allocation2 + $0x898] ss:$28 sps:$4 sm:$0xff]  }
 0x1e1   :  { %2770 = vmatpush1.bf16.msra.mxu0 %v5428_v55  ;;  %v5595_v55 = vld [vmem:[#allocation6 + $0x104] ss:$8 sps:$4 sm:$0xff]  }
 0x1e2   :  { %2771 = vmatprep.subr.bf16.mxu0 %v5435_v58  ;;  %v5516_v58 = vld [vmem:[#allocation2 + $0x864] ss:$28 sps:$4 sm:$0xff]  }
 0x1e3   :  { %3745 = vmatpush1.bf16.msra.mxu1 %v5523_v0  ;;  %v5534_v0 = vld [vmem:[#allocation2 + $0x90c] ss:$28 sps:$4 sm:$0xff]  }
 0x1e4   :  { %3746 = vmatprep.subr.bf16.mxu1 %v5531_v3  ;;  %v5540_v3 = vld [vmem:[#allocation2 + $0x944] ss:$28 sps:$4 sm:$0xff]  }
 0x1e5   :  { %2772 = vmatpush1.bf16.msra.mxu0 %v5433_v60  ;;  %v5522_v60 = vld [vmem:[#allocation2 + $0x89c] ss:$28 sps:$4 sm:$0xff]  }
 0x1e6   :  { %2773 = vmatprep.subr.bf16.mxu0 %v5440_v62  ;;  %v5528_v62 = vld [vmem:[#allocation2 + $0x8d4] ss:$28 sps:$4 sm:$0xff]  }
 0x1e7   :  { %3747 = vmatpush1.bf16.msra.mxu1 %v5529_v4  ;;  %v5538_v4 = vld [vmem:[#allocation2 + $0x940] ss:$28 sps:$4 sm:$0xff]  }
 0x1e8   :  { %3748 = vmatprep.subr.bf16.mxu1 %v5537_v9  ;;  %v5552_v9 = vld [vmem:[#allocation2 + $0x9b4] ss:$28 sps:$4 sm:$0xff]  }
 0x1e9   :  { %2774 = vmatpush1.bf16.msra.mxu0 %v5438_v63  ;;  %v5526_v63 = vld [vmem:[#allocation2 + $0x8d0] ss:$28 sps:$4 sm:$0xff]  }
 0x1ea   :  { %2775 = vmatprep.subr.bf16.mxu0 %v5445_v2  ;;  %v5532_v2 = vld [vmem:[#allocation2 + $0x908] ss:$28 sps:$4 sm:$0xff]  }
 0x1eb   :  { %3749 = vmatpush1.bf16.msra.mxu1 %v5535_v10  ;;  %v5550_v10 = vld [vmem:[#allocation2 + $0x9b0] ss:$28 sps:$4 sm:$0xff]  }
 0x1ec   :  { %3750 = vmatprep.subr.bf16.mxu1 %v5543_v15  ;;  %v5564_v15 = vld [vmem:[#allocation2 + $0xa24] ss:$28 sps:$4 sm:$0xff]  }
 0x1ed   :  { %2776 = vmatpush1.bf16.msra.mxu0 %v5443_v7  ;;  %v5546_v7 = vld [vmem:[#allocation2 + $0x97c] ss:$28 sps:$4 sm:$0xff]  }
 0x1ee   :  { %2777 = vmatprep.subr.bf16.mxu0 %v5450_v8  ;;  %v5544_v8 = vld [vmem:[#allocation2 + $0x978] ss:$28 sps:$4 sm:$0xff]  }
 0x1ef   :  { %3751 = vmatpush1.bf16.msra.mxu1 %v5541_v16  ;;  %v5562_v16 = vld [vmem:[#allocation2 + $0xa20] ss:$28 sps:$4 sm:$0xff]  }
 0x1f0   :  { %3752 = vmatprep.subr.bf16.mxu1 %v5549_v19  ;;  %v5576_v19 = vld [vmem:[#allocation2 + $0xa94] ss:$28 sps:$4 sm:$0xff]  }
 0x1f1   :  { %2778 = vmatpush1.bf16.msra.mxu0 %v5448_v12  ;;  %v5558_v12 = vld [vmem:[#allocation2 + $0x9ec] ss:$28 sps:$4 sm:$0xff]  }
 0x1f2   :  { %2779 = vmatprep.subr.bf16.mxu0 %v5455_v13  ;;  %v5556_v13 = vld [vmem:[#allocation2 + $0x9e8] ss:$28 sps:$4 sm:$0xff]  }
 0x1f3   :  { %3753 = vmatpush1.bf16.msra.mxu1 %v5547_v21  ;;  %v563_v21 = vlaneseq }
 0x1f4   :  { %3754 = vmatprep.subr.bf16.mxu1 %v5555_v24  ;;  %v5995_v24 = vmov 0.0  }
 0x1f5   :  { %2780 = vmatpush1.bf16.msra.mxu0 %v5453_v17  ;;  %v5570_v17 = vld [vmem:[#allocation2 + $0xa5c] ss:$28 sps:$4 sm:$0xff]  }
 0x1f6   :  { %2781 = vmatprep.subr.bf16.mxu0 %v5460_v18  ;;  %v5568_v18 = vld [vmem:[#allocation2 + $0xa58] ss:$28 sps:$4 sm:$0xff]  }
 0x1f7   :  { %3755 = vmatpush1.bf16.msra.mxu1 %v5553_v25 }
 0x1f8   :  { %3756 = vmatprep.subr.bf16.mxu1 %v5561_v27 }
 0x1f9   :  { %2782 = vmatpush1.bf16.msra.mxu0 %v5458_v5  ;;  %v5574_v5 = vld [vmem:[#allocation2 + $0xa90] ss:$28 sps:$4 sm:$0xff]  }
 0x1fa   :  { %2783 = vmatprep.subr.bf16.mxu0 %v5465_v22  ;;  %v6250_v22 = vshrl.u32 %v563_v21, 7  ;;  %v5625_v21 = vld [vmem:[#allocation6 + $0x1a4] ss:$8 sps:$4 sm:$0xff]  }
 0x1fb   :  { %3757 = vmatpush1.bf16.msra.mxu1 %v5559_v29 }
 0x1fc   :  { %3758 = vmatprep.subr.bf16.mxu1 %v5567_v31  ;;  %v565_v25 = vsub.s32 0, %v6250_v22  ;;  %v569_v27 = vsub.s32 1, %v6250_v22 }
 0x1fd   :  { %2784 = vmatpush1.bf16.msra.mxu0 %v5463_v26  ;;  %v6255_v26 = vld [vmem:[#allocation4] sm:$0xff] }
 0x1fe   :  { %2785 = vmatprep.subr.bf16.mxu0 %v5470_v28 }
 0x1ff   :  { %3759 = vmatpush1.bf16.msra.mxu1 %v5565_v33  ;;  %v5592_v33 = vld [vmem:[#allocation2 + $0xa98] ss:$28 sps:$4 sm:$0xff]  }
 0x200   :  { %3760 = vmatprep.subr.bf16.mxu1 %v5573_v35 }
 0x201   :  { %2786 = vmatpush1.bf16.msra.mxu0 %v5468_v30  ;;  %v573_v30 = vsub.s32 2, %v6250_v22 }
 0x202   :  { %2787 = vmatprep.subr.bf16.mxu0 %v5475_v32  ;;  %v570_v32 = vrot.slane %v6255_v26, %v569_v27 }
 0x203   :  { %3761 = vmatpush1.bf16.msra.mxu1 %v5571_v37 }
 0x204   :  { %3762 = vmatprep.subr.bf16.mxu1 %v5579_v39 }
 0x205   :  { %2788 = vmatpush1.bf16.msra.mxu0 %v5473_v34  ;;  %v577_v34 = vsub.s32 3, %v6250_v22 }
 0x206   :  { %2789 = vmatprep.subr.bf16.mxu0 %v5480_v36 }
 0x207   :  { %3763 = vmatpush1.bf16.msra.mxu1 %v5577_v42 }
 0x208   :  { %3764 = vmatprep.subr.bf16.mxu1 %v5582_v45 }
 0x209   :  { %2790 = vmatpush1.bf16.msra.mxu0 %v5478_v38  ;;  %v5745_v38 = vld [vmem:[%s6315_s0 + $0x18] ss:$0 sps:$4 sm:$0xff]  }
 0x20a   :  { %2800 = vmatprep.subr.bf16.mxu0 %v5485_v40  ;;  %v574_v40 = vrot.slane %v6255_v26, %v573_v30  ;;  %v589_v30 = vsub.s32 6, %v6250_v22 }
 0x20b   :  { %3765 = vmatpush1.bf16.msra.mxu1 %v5580_v46 }
 0x20c   :  { %2792 = vmatmul.mubr.bf16.vlgmr.msra.gmra.mrb[8].mxu0 %v6215_v6  ;;  %3766 = vmatprep.subr.bf16.mxu1 %v5585_v47  ;;  %v5586_v6 = vld [vmem:[#allocation6 + $0xe0] ss:$8 sps:$4 sm:$0xff]  }
 0x20d   :  { %2801 = vmatpush1.bf16.msra.mxu0 %v5483_v43  ;;  %2832 = vmatprep.mubr.bf16.mxu0 %v6219_v11  ;;  %v5505_v11 = vld [vmem:[#allocation2 + $0x7f4] ss:$28 sps:$4 sm:$0xff]  }
 0x20e   :  { %2802 = vmatprep.subr.bf16.mxu0 %v5490_v44  ;;  %v578_v44 = vrot.slane %v6255_v26, %v577_v34  ;;  %v5632_v34 = vld [vmem:[#allocation6 + $0x1d0] ss:$8 sps:$4 sm:$0xff]  }
 0x20f   :  { %3767 = vmatpush1.bf16.msra.mxu1 %v5583_v49 }
 0x210   :  { %3768 = vmatprep.subr.bf16.mxu1 %v5588_v50 }
 0x211   :  { %2803 = vmatpush1.bf16.msra.mxu0 %v5488_v41 }
 0x212   :  { %2804 = vmatprep.subr.bf16.mxu0 %v5495_v48 }
 0x213   :  { %3769 = vmatpush1.bf16.msra.mxu1 %v5586_v6 }
 0x214   :  { %3770 = vmatprep.subr.bf16.mxu1 %v5591_v52 }
 0x215   :  { %2805 = vmatpush1.bf16.msra.mxu0 %v5493_v1  ;;  %v5593_v1 = vld [vmem:[#allocation6 + $0x100] ss:$8 sps:$4 sm:$0xff]  }
 0x216   :  { %2806 = vmatprep.subr.bf16.mxu0 %v5500_v51  ;;  %v5598_v51 = vld [vmem:[#allocation6 + $0x114] ss:$8 sps:$4 sm:$0xff]  }
 0x217   :  { %3771 = vmatpush1.bf16.msra.mxu1 %v5589_v53 }
 0x218   :  { %3781 = vmatprep.subr.bf16.mxu1 %v5595_v55 }
 0x219   :  { %2807 = vmatpush1.bf16.msra.mxu0 %v5498_v23 }
 0x21a   :  { %2808 = vmatprep.subr.bf16.mxu0 %v5505_v11 }
 0x21d   :  { %2809 = vmatpush1.bf16.msra.mxu0 %v5503_v54  ;;  %v5596_v54 = vld [vmem:[#allocation6 + $0x110] ss:$8 sps:$4 sm:$0xff]  }
 0x21e   :  { %2810 = vmatprep.subr.bf16.mxu0 %v5510_v56  ;;  %v5601_v56 = vld [vmem:[#allocation6 + $0x124] ss:$8 sps:$4 sm:$0xff]  }
 0x221   :  { %2811 = vmatpush1.bf16.msra.mxu0 %v5508_v57 }
 0x222   :  { %2812 = vmatprep.subr.bf16.mxu0 %v5516_v58 }
 0x225   :  { %2813 = vmatpush1.bf16.msra.mxu0 %v5514_v59  ;;  %v5599_v59 = vld [vmem:[#allocation6 + $0x120] ss:$8 sps:$4 sm:$0xff]  }
 0x226   :  { %2814 = vmatprep.subr.bf16.mxu0 %v5522_v60  ;;  %v5604_v60 = vld [vmem:[#allocation6 + $0x134] ss:$8 sps:$4 sm:$0xff]  }
 0x229   :  { %2815 = vmatpush1.bf16.msra.mxu0 %v5520_v61  ;;  %v5602_v61 = vld [vmem:[#allocation6 + $0x130] ss:$8 sps:$4 sm:$0xff]  }
 0x22a   :  { %2816 = vmatprep.subr.bf16.mxu0 %v5528_v62  ;;  %v5607_v62 = vld [vmem:[#allocation6 + $0x144] ss:$8 sps:$4 sm:$0xff]  }
 0x22d   :  { %2817 = vmatpush1.bf16.msra.mxu0 %v5526_v63  ;;  %v5605_v63 = vld [vmem:[#allocation6 + $0x140] ss:$8 sps:$4 sm:$0xff]  }
 0x22e   :  { %2818 = vmatprep.subr.bf16.mxu0 %v5534_v0  ;;  %v5610_v0 = vld [vmem:[#allocation6 + $0x154] ss:$8 sps:$4 sm:$0xff]  }
 0x231   :  { %2819 = vmatpush1.bf16.msra.mxu0 %v5532_v2  ;;  %v5608_v2 = vld [vmem:[#allocation6 + $0x150] ss:$8 sps:$4 sm:$0xff]  }
 0x232   :  { %2820 = vmatprep.subr.bf16.mxu0 %v5540_v3  ;;  %v5613_v3 = vld [vmem:[#allocation6 + $0x164] ss:$8 sps:$4 sm:$0xff]  }
 0x235   :  { %2821 = vmatpush1.bf16.msra.mxu0 %v5538_v4 }
 0x236   :  { %2822 = vmatprep.subr.bf16.mxu0 %v5546_v7 }
 0x239   :  { %2823 = vmatpush1.bf16.msra.mxu0 %v5544_v8 }
 0x23a   :  { %2824 = vmatprep.subr.bf16.mxu0 %v5552_v9 }
 0x23d   :  { %2825 = vmatpush1.bf16.msra.mxu0 %v5550_v10  ;;  %v5611_v10 = vld [vmem:[#allocation6 + $0x160] ss:$8 sps:$4 sm:$0xff]  }
 0x23e   :  { %2826 = vmatprep.subr.bf16.mxu0 %v5558_v12 }
 0x241   :  { %2827 = vmatpush1.bf16.msra.mxu0 %v5556_v13  ;;  %v5616_v13 = vld [vmem:[#allocation6 + $0x174] ss:$8 sps:$4 sm:$0xff]  }
 0x242   :  { %2828 = vmatprep.subr.bf16.mxu0 %v5564_v15  ;;  %v5614_v15 = vld [vmem:[#allocation6 + $0x170] ss:$8 sps:$4 sm:$0xff]  }
 0x245   :  { %2829 = vmatpush1.bf16.msra.mxu0 %v5562_v16  ;;  %v5619_v16 = vld [vmem:[#allocation6 + $0x184] ss:$8 sps:$4 sm:$0xff]  }
 0x246   :  { %2830 = vmatprep.subr.bf16.mxu0 %v5570_v17  ;;  %v5617_v17 = vld [vmem:[#allocation6 + $0x180] ss:$8 sps:$4 sm:$0xff]  }
 0x249   :  { %2831 = vmatpush1.bf16.msra.mxu0 %v5568_v18  ;;  %v5622_v18 = vld [vmem:[#allocation6 + $0x194] ss:$8 sps:$4 sm:$0xff]  }
 0x24a   :  { %2841 = vmatprep.subr.bf16.mxu0 %v5576_v19  ;;  %v5620_v19 = vld [vmem:[#allocation6 + $0x190] ss:$8 sps:$4 sm:$0xff]  }
 0x24c   :  { %2833 = vmatmul.mubr.bf16.vlgmr.msra.gmra.mrb[8].mxu0 %v6227_v14  ;;  %v566_v14 = vrot.slane %v6255_v26, %v565_v25 }
 0x24d   :  { %2842 = vmatpush1.bf16.msra.mxu0 %v5574_v5  ;;  %2873 = vmatprep.mubr.bf16.mxu0 %v5994_v20  ;;  %v2670_v28 = vpop.f32.mrb[0].mxu1  ;;  %v5623_v5 = vld [vmem:[#allocation6 + $0x1a0] ss:$8 sps:$4 sm:$0xff]  }
 0x24e   :  { %4929 = vmatprep.subr.bf16.mxu0 %v5995_v24  ;;  %v2672_v29 = vpop.f32.mrb[1].mxu1  ;;  %v4977_v47 = vadd.f32 %v2670_v28, %v574_v40  ;;  %v5628_v28 = vld [vmem:[#allocation6 + $0x1b4] ss:$8 sps:$4 sm:$0xff]  }
 0x24f   :  { %v2674_v31 = vpop.f32.mrb[2].mxu1  ;;  %v4979_v49 = vadd.f32 %v2672_v29, %v578_v44  ;;  %v5626_v29 = vld [vmem:[#allocation6 + $0x1b0] ss:$8 sps:$4 sm:$0xff]   ;;  %v5640_v44 = vld [vmem:[#allocation6 + $0x1f4] ss:$8 sps:$4 sm:$0xff]  }
 0x250   :  { %v2675_v35 = vpop.f32.mrb[3].mxu1  ;;  %v5629_v31 = vld [vmem:[#allocation6 + $0x1c0] ss:$8 sps:$4 sm:$0xff]  }
 0x251   :  { %v5637_v35 = vld [vmem:[#allocation6 + $0x1e4] ss:$8 sps:$4 sm:$0xff]  }
 0x257   :  { %v2547_v36 = vpop.f32.mrb[0].mxu0 }
 0x258   :  { %v4975_v37 = vadd.f32 %v2547_v36, %v566_v14  ;;  %4672 = vmatmul.mubr.msk.bf16.vlgmr.msra.gmra.mrb[8].mxu0 %vm2386_vm0, %v5745_v38  ;;  %v2549_v39 = vpop.f32.mrb[1].mxu0  ;;  %v5631_v14 = vld [vmem:[#allocation6 + $0x1c4] ss:$8 sps:$4 sm:$0xff]  }
 0x259   :  { %v4976_v42 = vadd.f32 %v2549_v39, %v570_v32  ;;  %v2551_v43 = vpop.f32.mrb[2].mxu0  ;;  %4930 = vmatpush3.bf16.msra.mxu0 %v5592_v33  ;;  %4931 = vmatprep.mubr.msk.bf16.mxu0 %vm5996_vm1, %v5995_v24  ;;  %v5634_v32 = vld [vmem:[#allocation6 + $0x1d4] ss:$8 sps:$4 sm:$0xff]   ;;  %v590_v33 = vrot.slane %v6255_v26, %v589_v30  ;;  %v5716_v30 = vld [vmem:[#allocation9 + $0x8] sm:$0xff]  }
 0x25a   :  { %v3042_v45 = vmax.f32 %v4975_v37, 0.0  ;;  %v2552_v46 = vpop.f32.mrb[3].mxu0 }
 0x25b   :  { %v3043_v41 = vmax.f32 %v4976_v42, 0.0  ;;  %v5635_v42 = vld [vmem:[#allocation6 + $0x1e0] ss:$8 sps:$4 sm:$0xff]   ;;  %v5638_v46 = vld [vmem:[#allocation6 + $0x1f0] ss:$8 sps:$4 sm:$0xff]  }
 0x25c   :  { %v3049_v50 = vpack.c.bf16 %v3042_v45, %v3042_v45 }
 0x25d   :  { %v3050_v48 = vpack.c.bf16 %v3043_v41, %v3043_v41 }
 0x25f   :  { %v2711_v6 = vpop.f32.mrb[4].mxu0  ;;  %3772 = vmatprep.mubr.bf16.mxu1 %v3050_v48  ;;  %v5641_v48 = vld [vmem:[#allocation6 + $0x200] ss:$8 sps:$4 sm:$0xff]  }
 0x260   :  { %v6274_v23 = vadd.f32 %v4977_v47, %v2711_v6  ;;  %4932 = vmatmul.mubr.msk.bf16.vlgmr.msra.gmra.mrb[12].mxu0 %vm2386_vm0, %v5745_v38  ;;  %v2713_v52 = vpop.f32.mrb[5].mxu0  ;;  %3773 = vmatmul.mubr.bf16.vlgmr.msra.gmra.mrb[16].mxu1 %v3049_v50  ;;  %v5643_v47 = vld [vmem:[#allocation6 + $0x204] ss:$8 sps:$4 sm:$0xff]   ;;  %v5644_v50 = vld [vmem:[#allocation6 + $0x210] ss:$8 sps:$4 sm:$0xff]  }
 0x261   :  { %v4980_v11 = vadd.f32 %v4979_v49, %v2713_v52  ;;  %3782 = vmatpush1.bf16.msra.mxu1 %v5593_v1  ;;  %v2715_v53 = vpop.f32.mrb[6].mxu0  ;;  %v5646_v1 = vld [vmem:[#allocation6 + $0x214] ss:$8 sps:$4 sm:$0xff]   ;;  %v5647_v6 = vld [vmem:[#allocation6 + $0x220] ss:$8 sps:$4 sm:$0xff]  }
 0x262   :  { %v2716_v55 = vpop.f32.mrb[7].mxu0  ;;  %3783 = vmatprep.subr.bf16.mxu1 %v5598_v51  ;;  %v3044_v41 = vmax.f32 %v6274_v23, 0.0  ;;  %v5649_v51 = vld [vmem:[#allocation6 + $0x224] ss:$8 sps:$4 sm:$0xff]   ;;  %v5652_v52 = vld [vmem:[#allocation6 + $0x234] ss:$8 sps:$4 sm:$0xff]  }
 0x263   :  { %v3045_v57 = vmax.f32 %v4980_v11, 0.0  ;;  %v5650_v11 = vld [vmem:[#allocation6 + $0x230] ss:$8 sps:$4 sm:$0xff]   ;;  %v5655_v23 = vld [vmem:[#allocation6 + $0x244] ss:$8 sps:$4 sm:$0xff]  }
 0x264   :  { %v3051_v49 = vpack.c.bf16 %v3044_v41, %v3044_v41  ;;  %v5653_v53 = vld [vmem:[#allocation6 + $0x240] ss:$8 sps:$4 sm:$0xff]   ;;  %v5656_v55 = vld [vmem:[#allocation6 + $0x250] ss:$8 sps:$4 sm:$0xff]  }
 0x265   :  { %v3052_v58 = vpack.c.bf16 %v3045_v57, %v3045_v57  ;;  %3784 = vmatpush1.bf16.msra.mxu1 %v5596_v54  ;;  %v5658_v54 = vld [vmem:[#allocation6 + $0x254] ss:$8 sps:$4 sm:$0xff]   ;;  %v5661_v57 = vld [vmem:[#allocation6 + $0x264] ss:$8 sps:$4 sm:$0xff]  }
 0x266   :  { %3785 = vmatprep.subr.bf16.mxu1 %v5601_v56 }
 0x267   :  { %3813 = vmatprep.mubr.bf16.mxu1 %v3052_v58 }
 0x269   :  { %3786 = vmatpush1.bf16.msra.mxu1 %v5599_v59 }
 0x26a   :  { %3787 = vmatprep.subr.bf16.mxu1 %v5604_v60 }
 0x26d   :  { %3788 = vmatpush1.bf16.msra.mxu1 %v5602_v61  ;;  %v4837_v4 = vpop.f32.mrb[4].mxu1  ;;  %v5659_v61 = vld [vmem:[#allocation6 + $0x260] ss:$8 sps:$4 sm:$0xff]  }
 0x26e   :  { %3789 = vmatprep.subr.bf16.mxu1 %v5607_v62  ;;  %v4838_v7 = vpop.f32.mrb[5].mxu1 }
 0x26f   :  { %v4839_v8 = vadd.f32 %v4838_v7, %v4837_v4  ;;  %v4840_v9 = vpop.f32.mrb[6].mxu1  ;;  %v5665_v4 = vld [vmem:[#allocation6 + $0x280] ss:$8 sps:$4 sm:$0xff]   ;;  %v5670_v7 = vld [vmem:[#allocation6 + $0x294] ss:$8 sps:$4 sm:$0xff]  }
 0x270   :  { %v4841_v12 = vpop.f32.mrb[7].mxu1  ;;  %v5673_v9 = vld [vmem:[#allocation6 + $0x2a4] ss:$8 sps:$4 sm:$0xff]  }
 0x271   :  { %3790 = vmatpush1.bf16.msra.mxu1 %v5605_v63  ;;  %v2917_v36 = vadd.f32 %v4839_v8, %v590_v33  ;;  %v5664_v63 = vld [vmem:[#allocation6 + $0x274] ss:$8 sps:$4 sm:$0xff]   ;;  %v5668_v8 = vld [vmem:[#allocation6 + $0x290] ss:$8 sps:$4 sm:$0xff]   ;;  %v5691_v33 = vld [vmem:[#allocation6 + $0x304] ss:$8 sps:$4 sm:$0xff]  }
 0x272   :  { %3791 = vmatprep.subr.bf16.mxu1 %v5610_v0  ;;  %v5676_v12 = vld [vmem:[#allocation6 + $0x2b4] ss:$8 sps:$4 sm:$0xff]  }
 0x275   :  { %3792 = vmatpush1.bf16.msra.mxu1 %v5608_v2  ;;  %v5662_v2 = vld [vmem:[#allocation6 + $0x270] ss:$8 sps:$4 sm:$0xff]  }
 0x276   :  { %3793 = vmatprep.subr.bf16.mxu1 %v5613_v3  ;;  %v5667_v3 = vld [vmem:[#allocation6 + $0x284] ss:$8 sps:$4 sm:$0xff]  }
 0x279   :  { %3794 = vmatpush1.bf16.msra.mxu1 %v5611_v10  ;;  %v5671_v10 = vld [vmem:[#allocation6 + $0x2a0] ss:$8 sps:$4 sm:$0xff]  }
 0x27a   :  { %3795 = vmatprep.subr.bf16.mxu1 %v5616_v13  ;;  %v5674_v13 = vld [vmem:[#allocation6 + $0x2b0] ss:$8 sps:$4 sm:$0xff]  }
 0x27d   :  { %3796 = vmatpush1.bf16.msra.mxu1 %v5614_v15  ;;  %v5679_v15 = vld [vmem:[#allocation6 + $0x2c4] ss:$8 sps:$4 sm:$0xff]  }
 0x27e   :  { %3797 = vmatprep.subr.bf16.mxu1 %v5619_v16  ;;  %v5677_v16 = vld [vmem:[#allocation6 + $0x2c0] ss:$8 sps:$4 sm:$0xff]  }
 0x281   :  { %3798 = vmatpush1.bf16.msra.mxu1 %v5617_v17  ;;  %v5682_v17 = vld [vmem:[#allocation6 + $0x2d4] ss:$8 sps:$4 sm:$0xff]  }
 0x282   :  { %3799 = vmatprep.subr.bf16.mxu1 %v5622_v18  ;;  %v5680_v18 = vld [vmem:[#allocation6 + $0x2d0] ss:$8 sps:$4 sm:$0xff]  }
 0x285   :  { %3800 = vmatpush1.bf16.msra.mxu1 %v5620_v19  ;;  %v5685_v19 = vld [vmem:[#allocation6 + $0x2e4] ss:$8 sps:$4 sm:$0xff]  }
 0x286   :  { %3801 = vmatprep.subr.bf16.mxu1 %v5625_v21  ;;  %v5713_v21 = vld [vmem:[#allocation9 + $0x40] sm:$0xff]  }
 0x287   :  { %4889 = vmatprep.subr.bf16.mxu0 %v5713_v21 }
 0x289   :  { %3802 = vmatpush1.bf16.msra.mxu1 %v5623_v5  ;;  %v5714_v5 = vld [vmem:[#allocation9] sm:$0xff]  }
 0x28a   :  { %3803 = vmatprep.subr.bf16.mxu1 %v5628_v28  ;;  %v5715_v28 = vld [vmem:[#allocation9 + $0x48] sm:$0xff]   ;;  %4890 = vmatpush3.bf16.msra.mxu0 %v5714_v5 }
 0x28b   :  { %4891 = vmatprep.subr.bf16.mxu0 %v5715_v28 }
 0x28d   :  { %3804 = vmatpush1.bf16.msra.mxu1 %v5626_v29  ;;  %v4859_v37 = vpop.f32.mrb[8].mxu1  ;;  %v5683_v29 = vld [vmem:[#allocation6 + $0x2e0] ss:$8 sps:$4 sm:$0xff]  }
 0x28e   :  { %3805 = vmatprep.subr.bf16.mxu1 %v5631_v14  ;;  %v4860_v38 = vpop.f32.mrb[9].mxu1  ;;  %v5688_v14 = vld [vmem:[#allocation6 + $0x2f4] ss:$8 sps:$4 sm:$0xff]   ;;  %4892 = vmatpush3.bf16.msra.mxu0 %v5716_v30 }
 0x28f   :  { %v4861_v39 = vadd.f32 %v4860_v38, %v4859_v37  ;;  %v4862_v40 = vpop.f32.mrb[10].mxu1  ;;  %v5721_v37 = vld [vmem:[#allocation9 + $0x60] sm:$0xff]  }
 0x290   :  { %v4863_v43 = vpop.f32.mrb[11].mxu1  ;;  %v5722_v38 = vld [vmem:[#allocation9 + $0x20] sm:$0xff]   ;;  %v5724_v40 = vld [vmem:[#allocation9 + $0x28] sm:$0xff]  }
 0x291   :  { %3806 = vmatpush1.bf16.msra.mxu1 %v5629_v31  ;;  %v2957_v45 = vadd.f32 %v4861_v39, %v2917_v36  ;;  %v5717_v31 = vld [vmem:[#allocation9 + $0x50] sm:$0xff]   ;;  %v5720_v36 = vld [vmem:[#allocation9 + $0x18] sm:$0xff]   ;;  %v5723_v39 = vld [vmem:[#allocation9 + $0x68] sm:$0xff]   ;;  %v585_v43 = vsub.s32 5, %v6250_v22 }
 0x292   :  { %3807 = vmatprep.subr.bf16.mxu1 %v5634_v32  ;;  %v5686_v32 = vld [vmem:[#allocation6 + $0x2f0] ss:$8 sps:$4 sm:$0xff]   ;;  %4893 = vmatprep.subr.bf16.mxu0 %v5717_v31 }
 0x295   :  { %3808 = vmatpush1.bf16.msra.mxu1 %v5632_v34  ;;  %v5718_v34 = vld [vmem:[#allocation9 + $0x10] sm:$0xff]  }
 0x296   :  { %3809 = vmatprep.subr.bf16.mxu1 %v5637_v35  ;;  %v5719_v35 = vld [vmem:[#allocation9 + $0x58] sm:$0xff]   ;;  %4894 = vmatpush3.bf16.msra.mxu0 %v5718_v34 }
 0x297   :  { %4895 = vmatprep.subr.bf16.mxu0 %v5719_v35  ;;  %v5730_v35 = vld [vmem:[#allocation12 + $0x8] sm:$0xff]  }
 0x299   :  { %3810 = vmatpush1.bf16.msra.mxu1 %v5635_v42  ;;  %v581_v42 = vsub.s32 4, %v6250_v22  ;;  %v5731_v22 = vld [vmem:[#allocation12 + $0x10] sm:$0xff]  }
 0x29a   :  { %3811 = vmatprep.subr.bf16.mxu1 %v5640_v44  ;;  %4896 = vmatpush3.bf16.msra.mxu0 %v5720_v36  ;;  %v5734_v36 = vld [vmem:[#allocation12 + $0x28] sm:$0xff]  }
 0x29b   :  { %4897 = vmatprep.subr.bf16.mxu0 %v5721_v37  ;;  %v582_v44 = vrot.slane %v6255_v26, %v581_v42  ;;  %v5735_v37 = vld [vmem:[#allocation12 + $0x30] sm:$0xff]  }
 0x29d   :  { %3812 = vmatpush1.bf16.msra.mxu1 %v5638_v46 }
 0x29e   :  { %3822 = vmatprep.subr.bf16.mxu1 %v5643_v47  ;;  %4898 = vmatpush3.bf16.msra.mxu0 %v5722_v38  ;;  %v5736_v38 = vld [vmem:[#allocation12 + $0x38] sm:$0xff]  }
 0x29f   :  { %4899 = vmatprep.subr.bf16.mxu0 %v5723_v39 }
 0x2a0   :  { %3814 = vmatmul.mubr.bf16.vlgmr.msra.gmra.mrb[16].mxu1 %v3051_v49 }
 0x2a1   :  { %3823 = vmatpush1.bf16.msra.mxu1 %v5641_v48 }
 0x2a2   :  { %3824 = vmatprep.subr.bf16.mxu1 %v5646_v1  ;;  %4900 = vmatpush3.bf16.msra.mxu0 %v5724_v40  ;;  %v4786_v40 = vld [vmem:[#allocation10] ss:$0 sm:$0xff] }
 0x2a5   :  { %3825 = vmatpush1.bf16.msra.mxu1 %v5644_v50 }
 0x2a6   :  { %3826 = vmatprep.subr.bf16.mxu1 %v5649_v51 }
 0x2a9   :  { %3827 = vmatpush1.bf16.msra.mxu1 %v5647_v6 }
 0x2aa   :  { %3828 = vmatprep.subr.bf16.mxu1 %v5652_v52  ;;  %v5689_v52 = vld [vmem:[#allocation6 + $0x300] ss:$8 sps:$4 sm:$0xff]  }
 0x2ad   :  { %3829 = vmatpush1.bf16.msra.mxu1 %v5650_v11  ;;  %v4881_v56 = vpop.f32.mrb[12].mxu1 }
 0x2ae   :  { %3830 = vmatprep.subr.bf16.mxu1 %v5655_v23  ;;  %v4882_v58 = vpop.f32.mrb[13].mxu1  ;;  %v5694_v23 = vld [vmem:[#allocation6 + $0x314] ss:$8 sps:$4 sm:$0xff]  }
 0x2af   :  { %v4883_v59 = vadd.f32 %v4882_v58, %v4881_v56  ;;  %v4884_v60 = vpop.f32.mrb[14].mxu1 }
 0x2b0   :  { %v4885_v62 = vpop.f32.mrb[15].mxu1  ;;  %v5700_v60 = vld [vmem:[#allocation6 + $0x334] ss:$8 sps:$4 sm:$0xff]  }
 0x2b1   :  { %3831 = vmatpush1.bf16.msra.mxu1 %v5653_v53  ;;  %v6280_v0 = vadd.f32 %v4883_v59, %v2957_v45  ;;  %v586_v45 = vrot.slane %v6255_v26, %v585_v43  ;;  %v5692_v26 = vld [vmem:[#allocation6 + $0x310] ss:$8 sps:$4 sm:$0xff]   ;;  %v5695_v59 = vld [vmem:[#allocation6 + $0x320] ss:$8 sps:$4 sm:$0xff]   ;;  %v5703_v62 = vld [vmem:[#allocation6 + $0x344] ss:$8 sps:$4 sm:$0xff]  }
 0x2b2   :  { %3832 = vmatprep.subr.bf16.mxu1 %v5658_v54 }
 0x2b5   :  { %3833 = vmatpush1.bf16.msra.mxu1 %v5656_v55 }
 0x2b6   :  { %3834 = vmatprep.subr.bf16.mxu1 %v5661_v57  ;;  %v5697_v57 = vld [vmem:[#allocation6 + $0x324] ss:$8 sps:$4 sm:$0xff]  }
 0x2b9   :  { %3835 = vmatpush1.bf16.msra.mxu1 %v5659_v61  ;;  %v5698_v61 = vld [vmem:[#allocation6 + $0x330] ss:$8 sps:$4 sm:$0xff]  }
 0x2ba   :  { %3836 = vmatprep.subr.bf16.mxu1 %v5664_v63  ;;  %v5701_v63 = vld [vmem:[#allocation6 + $0x340] ss:$8 sps:$4 sm:$0xff]  }
 0x2bd   :  { %3837 = vmatpush1.bf16.msra.mxu1 %v5662_v2  ;;  %v5704_v2 = vld [vmem:[#allocation6 + $0x350] ss:$8 sps:$4 sm:$0xff]  }
 0x2be   :  { %3838 = vmatprep.subr.bf16.mxu1 %v5667_v3  ;;  %v5709_v3 = vld [vmem:[#allocation6 + $0x364] ss:$8 sps:$4 sm:$0xff]  }
 0x2c1   :  { %3839 = vmatpush1.bf16.msra.mxu1 %v5665_v4  ;;  %v5712_v4 = vld [vmem:[#allocation6 + $0x374] ss:$8 sps:$4 sm:$0xff]  }
 0x2c2   :  { %3840 = vmatprep.subr.bf16.mxu1 %v5670_v7  ;;  %v5710_v7 = vld [vmem:[#allocation6 + $0x370] ss:$8 sps:$4 sm:$0xff]  }
 0x2c5   :  { %3841 = vmatpush1.bf16.msra.mxu1 %v5668_v8 }
 0x2c6   :  { %3842 = vmatprep.subr.bf16.mxu1 %v5673_v9 }
 0x2c9   :  { %3843 = vmatpush1.bf16.msra.mxu1 %v5671_v10  ;;  %v5725_v10 = vld [vmem:[#allocation9 + $0x70] sm:$0xff]  }
 0x2ca   :  { %3844 = vmatprep.subr.bf16.mxu1 %v5676_v12  ;;  %v5726_v12 = vld [vmem:[#allocation9 + $0x30] sm:$0xff]   ;;  %4901 = vmatprep.subr.bf16.mxu0 %v5725_v10 }
 0x2cb   :  { %4902 = vmatpush3.bf16.msra.mxu0 %v5726_v12 }
 0x2cd   :  { %3845 = vmatpush1.bf16.msra.mxu1 %v5674_v13  ;;  %v5727_v13 = vld [vmem:[#allocation9 + $0x78] sm:$0xff]  }
 0x2ce   :  { %3846 = vmatprep.subr.bf16.mxu1 %v5679_v15  ;;  %v5728_v15 = vld [vmem:[#allocation9 + $0x38] sm:$0xff]   ;;  %4903 = vmatprep.subr.bf16.mxu0 %v5727_v13 }
 0x2cf   :  { %4904 = vmatpush3.bf16.msra.mxu0 %v5728_v15 }
 0x2d0   :  { %4935 = vmatprep.subr.bf16.mxu0 %v5995_v24 }
 0x2d1   :  { %3847 = vmatpush1.bf16.msra.mxu1 %v5677_v16  ;;  %v3168_v16 = vld [vmem:[#allocation7] sm:$0x3] }
 0x2d2   :  { %3848 = vmatprep.subr.bf16.mxu1 %v5682_v17  ;;  %v3173_v17 = vrot.slane %v3168_v16, %v565_v25  ;;  %v5732_v25 = vld [vmem:[#allocation12 + $0x18] sm:$0xff]  }
 0x2d5   :  { %3849 = vmatpush1.bf16.msra.mxu1 %v5680_v18  ;;  %v3177_v18 = vrot.slane %v3168_v16, %v569_v27  ;;  %v5733_v27 = vld [vmem:[#allocation12 + $0x20] sm:$0xff]  }
 0x2d6   :  { %3850 = vmatprep.subr.bf16.mxu1 %v5685_v19 }
 0x2d9   :  { %3851 = vmatpush1.bf16.msra.mxu1 %v5683_v29 }
 0x2da   :  { %3852 = vmatprep.subr.bf16.mxu1 %v5688_v14 }
 0x2dd   :  { %3853 = vmatpush1.bf16.msra.mxu1 %v5686_v32 }
 0x2de   :  { %3863 = vmatprep.subr.bf16.mxu1 %v5691_v33  ;;  %v5729_v33 = vld [vmem:[#allocation12] sm:$0xff]  }
 0x32b   :  { %v2875_v46 = vpop.f32.mrb[8].mxu0 }
 0x32c   :  { %v4981_v41 = vadd.f32 %v2875_v46, %v582_v44  ;;  %v2877_v47 = vpop.f32.mrb[9].mxu0 }
 0x32d   :  { %v4982_v48 = vadd.f32 %v2877_v47, %v586_v45  ;;  %v2879_v49 = vpop.f32.mrb[10].mxu0  ;;  %v5737_v47 = vld [vmem:[#allocation15] sm:$0xff]  }
 0x32e   :  { %v3046_v1 = vmax.f32 %v4981_v41, 0.0  ;;  %v2880_v50 = vpop.f32.mrb[11].mxu0  ;;  %v5738_v49 = vld [vmem:[#allocation15 + $0x8] sm:$0xff]  }
 0x32f   :  { %v3047_v51 = vmax.f32 %v4982_v48, 0.0  ;;  %v5740_v50 = vld [vmem:[#allocation15 + $0x18] sm:$0xff]  }
 0x330   :  { %v3053_v11 = vpack.c.bf16 %v3046_v1, %v3046_v1  ;;  %v5739_v1 = vld [vmem:[#allocation15 + $0x10] sm:$0xff]  }
 0x331   :  { %v3054_v6 = vpack.c.bf16 %v3047_v51, %v3047_v51  ;;  %v5741_v51 = vld [vmem:[#allocation15 + $0x20] sm:$0xff]  }
 0x333   :  { %v3036_v53 = vpop.f32.mrb[12].mxu0  ;;  %3854 = vmatprep.mubr.bf16.mxu1 %v3054_v6  ;;  %v5742_v6 = vld [vmem:[#allocation15 + $0x28] sm:$0xff]  }
 0x334   :  { %v3037_v54 = vadd.f32 %v3036_v53, %v6280_v0  ;;  %3855 = vmatmul.mubr.bf16.vlgmr.msra.gmra.mrb[16].mxu1 %v3053_v11  ;;  %v4933_v55 = vpop.f32.mrb[13].mxu0  ;;  %v5706_v0 = vld [vmem:[#allocation6 + $0x354] ss:$8 sps:$4 sm:$0xff]  }
 0x335   :  { %3864 = vmatpush1.bf16.msra.mxu1 %v5689_v52  ;;  %v3039_v56 = vpop.f32.mrb[14].mxu0  ;;  %3895 = vmatprep.mubr.bf16.mxu1 %v5994_v20  ;;  %v5707_v20 = vld [vmem:[#allocation6 + $0x360] ss:$8 sps:$4 sm:$0xff]   ;;  %v5743_v52 = vld [vmem:[#allocation15 + $0x30] sm:$0xff]  }
 0x336   :  { %3865 = vmatprep.subr.bf16.mxu1 %v5694_v23  ;;  %v4934_v58 = vpop.f32.mrb[15].mxu0  ;;  %v3048_v8 = vmax.f32 %v3037_v54, 0.0  ;;  %v5744_v11 = vld [vmem:[#allocation15 + $0x38] sm:$0xff]  }
 0x337   :  { %v4803_v23 = vld [vmem:[#allocation13] ss:$0 sm:$0xff] }
 0x338   :  { %v3055_v9 = vpack.c.bf16 %v3048_v8, %v3048_v8 }
 0x339   :  { %3866 = vmatpush1.bf16.msra.mxu1 %v5692_v26 }
 0x33a   :  { %3867 = vmatprep.subr.bf16.mxu1 %v5697_v57 }
 0x33d   :  { %3868 = vmatpush1.bf16.msra.mxu1 %v5695_v59  ;;  %v4812_v59 = vld [vmem:[#allocation16] ss:$0 sm:$0xff] }
 0x33e   :  { %3869 = vmatprep.subr.bf16.mxu1 %v5700_v60 }
 0x341   :  { %3870 = vmatpush1.bf16.msra.mxu1 %v5698_v61 }
 0x342   :  { %3871 = vmatprep.subr.bf16.mxu1 %v5703_v62 }
 0x345   :  { %3872 = vmatpush1.bf16.msra.mxu1 %v5701_v63 }
 0x346   :  { %3873 = vmatprep.subr.bf16.mxu1 %v5706_v0 }
 0x349   :  { %3874 = vmatpush1.bf16.msra.mxu1 %v5704_v2 }
 0x34a   :  { %3875 = vmatprep.subr.bf16.mxu1 %v5709_v3 }
 0x34d   :  { %3876 = vmatpush1.bf16.msra.mxu1 %v5707_v20 }
 0x34e   :  { %3877 = vmatprep.subr.bf16.mxu1 %v5712_v4 }
 0x351   :  { %3878 = vmatpush1.bf16.msra.mxu1 %v5710_v7 }
 0x354   :  { %3896 = vmatmul.mubr.bf16.vlgmr.msra.gmra.mrb[16].mxu1 %v3055_v9 }
 0x427   :  { %v3897_v19 = vpop.f32.mrb[16].mxu1 }
 0x428   :  { %v4983_v21 = vadd.f32 %v3897_v19, %v3173_v17  ;;  %v3899_v5 = vpop.f32.mrb[17].mxu1 }
 0x429   :  { %v4984_v28 = vadd.f32 %v3899_v5, %v3177_v18  ;;  %v3901_v29 = vpop.f32.mrb[18].mxu1 }
 0x42a   :  { %v3904_v14 = vmax.f32 %v4983_v21, 0.0  ;;  %v3902_v30 = vpop.f32.mrb[19].mxu1 }
 0x42b   :  { %v3905_v31 = vmax.f32 %v4984_v28, 0.0 }
 0x42c   :  { %v3906_v34 = vpack.c.bf16 %v3904_v14, %v3904_v14 }
 0x42d   :  { %v3907_v32 = vpack.c.bf16 %v3905_v31, %v3905_v31 }
 0x42f   :  { %4075 = vmatprep.mubr.bf16.mxu0 %v3907_v32 }
 0x430   :  { %4076 = vmatmul.mubr.bf16.vlgmr.msra.gmra.mrb[16].mxu0 %v3906_v34 }
 0x431   :  { %4936 = vmatpush3.bf16.msra.mxu0 %v5729_v33  ;;  %4951 = vmatprep.mubr.msk.bf16.mxu0 %vm5996_vm1, %v5995_v24 }
 0x432   :  { %4937 = vmatprep.subr.bf16.mxu0 %v5995_v24 }
 0x435   :  { %4938 = vmatpush3.bf16.msra.mxu0 %v5730_v35 }
 0x436   :  { %4939 = vmatprep.subr.bf16.mxu0 %v5995_v24 }
 0x439   :  { %4940 = vmatpush3.bf16.msra.mxu0 %v5731_v22 }
 0x43a   :  { %4941 = vmatprep.subr.bf16.mxu0 %v5995_v24 }
 0x43d   :  { %4942 = vmatpush3.bf16.msra.mxu0 %v5732_v25 }
 0x43e   :  { %4943 = vmatprep.subr.bf16.mxu0 %v5995_v24 }
 0x441   :  { %4944 = vmatpush3.bf16.msra.mxu0 %v5733_v27 }
 0x442   :  { %4945 = vmatprep.subr.bf16.mxu0 %v5995_v24 }
 0x445   :  { %4946 = vmatpush3.bf16.msra.mxu0 %v5734_v36 }
 0x446   :  { %4947 = vmatprep.subr.bf16.mxu0 %v5995_v24 }
 0x449   :  { %4948 = vmatpush3.bf16.msra.mxu0 %v5735_v37 }
 0x44a   :  { %4949 = vmatprep.subr.bf16.mxu0 %v5995_v24 }
 0x44d   :  { %4950 = vmatpush3.bf16.msra.mxu0 %v5736_v38 }
 0x44e   :  { %4955 = vmatprep.subr.bf16.mxu0 %v5995_v24 }
 0x503   :  { %v4905_v39 = vpop.f32.mrb[16].mxu0 }
 0x504   :  { %v4906_v42 = vpop.f32.mrb[17].mxu0 }
 0x505   :  { %v4907_v43 = vadd.f32 %v4906_v42, %v4905_v39  ;;  %v4908_v44 = vpop.f32.mrb[18].mxu0 }
 0x506   :  { %v4909_v45 = vpop.f32.mrb[19].mxu0 }
 0x507   :  { %v4078_v46 = vadd.f32 %v4907_v43, %v4786_v40 }
 0x509   :  { %v4083_v41 = vmax.f32 %v4078_v46, 0.0 }
 0x50b   :  { %v4084_v48 = vpack.c.bf16 %v4083_v41, %v4083_v41 }
 0x50d   :  { %4952 = vmatmul.mubr.bf16.vlgmr.msra.gmra.mrb[20].mxu0 %v4084_v48 }
 0x50e   :  { %4956 = vmatpush3.bf16.msra.mxu0 %v5737_v47  ;;  %4971 = vmatprep.mubr.msk.bf16.mxu0 %vm5996_vm1, %v5995_v24 }
 0x50f   :  { %4957 = vmatprep.subr.bf16.mxu0 %v5995_v24 }
 0x512   :  { %4958 = vmatpush3.bf16.msra.mxu0 %v5738_v49 }
 0x513   :  { %4959 = vmatprep.subr.bf16.mxu0 %v5995_v24 }
 0x516   :  { %4960 = vmatpush3.bf16.msra.mxu0 %v5739_v1 }
 0x517   :  { %4961 = vmatprep.subr.bf16.mxu0 %v5995_v24 }
 0x51a   :  { %4962 = vmatpush3.bf16.msra.mxu0 %v5740_v50 }
 0x51b   :  { %4963 = vmatprep.subr.bf16.mxu0 %v5995_v24 }
 0x51e   :  { %4964 = vmatpush3.bf16.msra.mxu0 %v5741_v51 }
 0x51f   :  { %4965 = vmatprep.subr.bf16.mxu0 %v5995_v24 }
 0x522   :  { %4966 = vmatpush3.bf16.msra.mxu0 %v5742_v6 }
 0x523   :  { %4967 = vmatprep.subr.bf16.mxu0 %v5995_v24 }
 0x526   :  { %4968 = vmatpush3.bf16.msra.mxu0 %v5743_v52 }
 0x527   :  { %4969 = vmatprep.subr.bf16.mxu0 %v5995_v24 }
 0x52a   :  { %4970 = vmatpush3.bf16.msra.mxu0 %v5744_v11 }
 0x5e0   :  { %v4190_v53 = vpop.f32.mrb[20].mxu0 }
 0x5e1   :  { %v4191_v54 = vadd.f32 %v4803_v23, %v4190_v53  ;;  %v4953_v55 = vpop.f32.mrb[21].mxu0 }
 0x5e2   :  { %v4193_v26 = vpop.f32.mrb[22].mxu0 }
 0x5e3   :  { %v4196_v56 = vmax.f32 %v4191_v54, 0.0  ;;  %v4954_v57 = vpop.f32.mrb[23].mxu0 }
 0x5e5   :  { %v4197_v58 = vpack.c.bf16 %v4196_v56, %v4196_v56 }
 0x5e7   :  { %4972 = vmatmul.mubr.bf16.vlgmr.msra.gmra.mrb[24].mxu0 %v4197_v58 }
 0x6ba   :  { %v4303_v60 = vpop.f32.mrb[24].mxu0 }
 0x6bb   :  { %v4304_v61 = vadd.f32 %v4812_v59, %v4303_v60  ;;  %v4973_v62 = vpop.f32.mrb[25].mxu0 }
 0x6bc   :  { %v4306_v63 = vpop.f32.mrb[26].mxu0 }
 0x6bd   :  { %4309 = vst [vmem:[%s6326_s11] sm:$0xff] %v4304_v61  ;;  %v4974_v24 = vpop.f32.mrb[27].mxu0 }
 0x6be   :  { %4314 = vsyncpa [#allocation3], 1 }
 0x6bf   :  { %4315 = vsyncpa [#allocation5], 1 }
 0x6c0   :  { %4316 = vsyncpa [#allocation8], 1 }
 0x6c1   :  { %4317 = vsyncpa [#allocation11], 1 }
 0x6c2   :  { %4318 = vsyncpa [#allocation14], 1 }
 0x6c3   :  { %4319 = vsyncpa [#allocation17], 1 }

// kernel: _lambda_.1
= control target key start
LH: loop header
LB: loop body
LE: loop exit
PB: predicated region body
PF: predicated region fallthrough
CT: control target
= control target key end

     0   :  { %16 = vsyncpa [#allocation3], 0  ;;  %s6315_s0 = inlined_call_operand.vmem [shape: bf16[8,784], index: 0, kind: input, shape index: {}]   ;;  %s6316_s1 = inlined_call_operand.hbm [shape: bf16[784,896], index: 1, kind: input, shape index: {}]   ;;  %s6317_s2 = inlined_call_operand.hbm [shape: f32[1,896], index: 2, kind: input, shape index: {}]   ;;  %s6318_s3 = inlined_call_operand.hbm [shape: bf16[896,256], index: 3, kind: input, shape index: {}]   ;;  %s6319_s4 = inlined_call_operand.hbm [shape: f32[1,256], index: 4, kind: input, shape index: {}]   ;;  %s6320_s5 = inlined_call_operand.hbm [shape: bf16[256,128], index: 5, kind: input, shape index: {}]   ;;  %s6321_s6 = inlined_call_operand.hbm [shape: f32[1,128], index: 6, kind: input, shape index: {}]   ;;  %s6322_s7 = inlined_call_operand.hbm [shape: bf16[128,128], index: 7, kind: input, shape index: {}]   ;;  %s6323_s8 = inlined_call_operand.hbm [shape: f32[1,128], index: 8, kind: input, shape index: {}]   ;;  %s6324_s9 = inlined_call_operand.hbm [shape: bf16[128,128], index: 9, kind: input, shape index: {}]   ;;  %s6325_s10 = inlined_call_operand.hbm [shape: f32[1,128], index: 10, kind: input, shape index: {}]   ;;  %s6326_s11 = inlined_call_operand.vmem [shape: f32[8,128], index: 11, kind: output, shape index: {}]  }
   0x1   :  { %17 = vsyncpa [#allocation5], 0 }
   0x2   :  { %18 = vsyncpa [#allocation8], 0 }
   0x3   :  { %19 = vsyncpa [#allocation11], 0 }
   0x4   :  { %20 = vsyncpa [#allocation14], 0 }
   0x5   :  { %21 = vsyncpa [#allocation17], 0  ;;  %s5978_s17 = smov [#allocation4]   ;;  %s5979_s19 = smov [#allocation7]  }
   0x6   :  { %s42_s18 = sshll.u32 %s5978_s17, 4  ;;  %s64_s20 = sshll.u32 %s5979_s19, 4  ;;  %s43_s18 = int_to_ptr.vmem [resolvable:$true] %s42_s18  ;;  %s65_s20 = int_to_ptr.vmem [resolvable:$true] %s64_s20 }
   0x7   :  { %s5746_s23 = scalar_lea.hbm %s6317_s2, 112 }
   0x8   :  { %p5747_p0 = scmp.ne.s32.totalorder %s6317_s2, %s5746_s23  ;;  %p5750_p1 = scmp.lt.u32.totalorder %s5746_s23, %s6317_s2 }
   0xa   :  { %p5752_p2 = pnand %p5750_p1, %p5747_p0 }
   0xc   :  { %5755 = shalt.err (!%p5752_p2)
}
   0xd   :  { %s5756_s28 = scalar_lea.vmem %s43_s18, 112  ;;  %s5760_s29 = scalar_lea.vmem %s43_s18, 128 }
   0xe   :  { %p5757_p3 = scmp.ne.s32.totalorder %s43_s18, %s5756_s28  ;;  %p5761_p4 = scmp.lt.s32.totalorder %s43_s18, %s43_s18 }
   0xf   :  { %p5762_p5 = scmp.lt.s32.totalorder %s5760_s29, %s5756_s28 }
  0x11   :  { %p5763_p6 = por %p5762_p5, %p5761_p4 }
  0x13   :  { %p5764_p7 = pnand %p5763_p6, %p5757_p3 }
  0x15   :  { %5767 = shalt.err (!%p5764_p7)
}
  0x16   :  { %45 = dma.hbm_to_vmem [thread:$0]  %s6317_s2, 112, %s43_s18, [#allocation5]  }
  0x17   :  { %s5768_s15 = scalar_lea.hbm %s6319_s4, 32 }
  0x18   :  { %p5769_p8 = scmp.ne.s32.totalorder %s6319_s4, %s5768_s15  ;;  %p5772_p9 = scmp.lt.u32.totalorder %s5768_s15, %s6319_s4 }
  0x1a   :  { %p5774_p10 = pnand %p5772_p9, %p5769_p8 }
  0x1c   :  { %5777 = shalt.err (!%p5774_p10)
}
  0x1d   :  { %s5778_s22 = scalar_lea.vmem %s65_s20, 32  ;;  %p5783_p12 = scmp.lt.s32.totalorder %s65_s20, %s65_s20 }
  0x1e   :  { %p5779_p11 = scmp.ne.s32.totalorder %s65_s20, %s5778_s22  ;;  %p5784_p13 = scmp.lt.s32.totalorder %s5778_s22, %s5778_s22 }
  0x20   :  { %p5785_p0 = por %p5784_p13, %p5783_p12 }
  0x22   :  { %p5786_p1 = pnand %p5785_p0, %p5779_p11 }
  0x24   :  { %5789 = shalt.err (!%p5786_p1)
}
  0x25   :  { %67 = dma.hbm_to_vmem [thread:$0]  %s6319_s4, 32, %s65_s20, [#allocation8]  }
  0x26   :  { %s5980_s23 = smov [#allocation10]   ;;  %s5981_s25 = smov [#allocation13]  }
  0x27   :  { %s86_s24 = sshll.u32 %s5980_s23, 4  ;;  %s108_s26 = sshll.u32 %s5981_s25, 4  ;;  %s87_s24 = int_to_ptr.vmem [resolvable:$true] %s86_s24  ;;  %s109_s26 = int_to_ptr.vmem [resolvable:$true] %s108_s26 }
  0x28   :  { %s5790_s29 = scalar_lea.hbm %s6321_s6, 16 }
  0x29   :  { %p5791_p2 = scmp.ne.s32.totalorder %s6321_s6, %s5790_s29  ;;  %p5794_p3 = scmp.lt.u32.totalorder %s5790_s29, %s6321_s6 }
  0x2b   :  { %p5796_p4 = pnand %p5794_p3, %p5791_p2 }
  0x2d   :  { %5799 = shalt.err (!%p5796_p4)
}
  0x2e   :  { %s5800_s4 = scalar_lea.vmem %s87_s24, 16  ;;  %s5804_s20 = scalar_lea.vmem %s87_s24, 32 }
  0x2f   :  { %p5801_p5 = scmp.ne.s32.totalorder %s87_s24, %s5800_s4  ;;  %p5805_p6 = scmp.lt.s32.totalorder %s87_s24, %s87_s24 }
  0x30   :  { %p5806_p7 = scmp.lt.s32.totalorder %s5804_s20, %s5800_s4 }
  0x32   :  { %p5807_p8 = por %p5806_p7, %p5805_p6 }
  0x34   :  { %p5808_p9 = pnand %p5807_p8, %p5801_p5 }
  0x36   :  { %5811 = shalt.err (!%p5808_p9)
}
  0x37   :  { %89 = dma.hbm_to_vmem [thread:$0]  %s6321_s6, 16, %s87_s24, [#allocation11]  }
  0x38   :  { %s5812_s21 = scalar_lea.hbm %s6323_s8, 16 }
  0x39   :  { %p5813_p10 = scmp.ne.s32.totalorder %s6323_s8, %s5812_s21  ;;  %p5816_p11 = scmp.lt.u32.totalorder %s5812_s21, %s6323_s8 }
  0x3b   :  { %p5818_p12 = pnand %p5816_p11, %p5813_p10 }
  0x3d   :  { %5821 = shalt.err (!%p5818_p12)
}
  0x3e   :  { %s5822_s25 = scalar_lea.vmem %s109_s26, 16  ;;  %s5826_s27 = scalar_lea.vmem %s109_s26, 32 }
  0x3f   :  { %p5823_p13 = scmp.ne.s32.totalorder %s109_s26, %s5822_s25  ;;  %p5827_p0 = scmp.lt.s32.totalorder %s109_s26, %s109_s26 }
  0x40   :  { %p5828_p1 = scmp.lt.s32.totalorder %s5826_s27, %s5822_s25 }
  0x42   :  { %p5829_p2 = por %p5828_p1, %p5827_p0 }
  0x44   :  { %p5830_p3 = pnand %p5829_p2, %p5823_p13 }
  0x46   :  { %5833 = shalt.err (!%p5830_p3)
}
  0x47   :  { %111 = dma.hbm_to_vmem [thread:$0]  %s6323_s8, 16, %s109_s26, [#allocation14]  }
  0x48   :  { %s5982_s28 = smov [#allocation2]   ;;  %s5834_s13 = scalar_lea.hbm %s6316_s1, 43904 }
  0x49   :  { %s29_s29 = sshll.u32 %s5982_s28, 4  ;;  %p5835_p4 = scmp.ne.s32.totalorder %s6316_s1, %s5834_s13  ;;  %s30_s29 = int_to_ptr.vmem [resolvable:$true] %s29_s29 }
  0x4a   :  { %p5838_p5 = scmp.lt.u32.totalorder %s5834_s13, %s6316_s1 }
  0x4c   :  { %p5840_p6 = pnand %p5838_p5, %p5835_p4 }
  0x4e   :  { %5843 = shalt.err (!%p5840_p6)
}
  0x4f   :  { %s5844_s16 = scalar_lea.vmem %s30_s29, 43904  ;;  %p5849_p8 = scmp.lt.s32.totalorder %s30_s29, %s30_s29 }
  0x50   :  { %p5845_p7 = scmp.ne.s32.totalorder %s30_s29, %s5844_s16  ;;  %p5850_p9 = scmp.lt.s32.totalorder %s5844_s16, %s5844_s16 }
  0x52   :  { %p5851_p10 = por %p5850_p9, %p5849_p8 }
  0x54   :  { %p5852_p11 = pnand %p5851_p10, %p5845_p7 }
  0x56   :  { %5855 = shalt.err (!%p5852_p11)
}
  0x57   :  { %s5983_s8 = smov 448   ;;  %s5984_s26 = smov 28  }
  0x58   :  { %35 = dma.hbm_to_vmem [thread:$0]  %s6316_s1, 43904, %s30_s29, [#allocation3], %s5983_s8, %s5983_s8, %s5984_s26  }
  0x59   :  { %s5985_s21 = smov [#allocation6]   ;;  %s5856_s23 = scalar_lea.hbm %s6318_s3, 14336 }
  0x5a   :  { %s51_s22 = sshll.u32 %s5985_s21, 4  ;;  %p5857_p12 = scmp.ne.s32.totalorder %s6318_s3, %s5856_s23  ;;  %s52_s22 = int_to_ptr.vmem [resolvable:$true] %s51_s22 }
  0x5b   :  { %p5860_p13 = scmp.lt.u32.totalorder %s5856_s23, %s6318_s3 }
  0x5d   :  { %p5862_p0 = pnand %p5860_p13, %p5857_p12 }
  0x5f   :  { %5865 = shalt.err (!%p5862_p0)
}
  0x60   :  { %s5866_s28 = scalar_lea.vmem %s52_s22, 14336  ;;  %p5871_p2 = scmp.lt.s32.totalorder %s52_s22, %s52_s22 }
  0x61   :  { %p5867_p1 = scmp.ne.s32.totalorder %s52_s22, %s5866_s28  ;;  %p5872_p3 = scmp.lt.s32.totalorder %s5866_s28, %s5866_s28 }
  0x63   :  { %p5873_p4 = por %p5872_p3, %p5871_p2 }
  0x65   :  { %p5874_p5 = pnand %p5873_p4, %p5867_p1 }
  0x67   :  { %5877 = shalt.err (!%p5874_p5)
}
  0x68   :  { %s5986_s1 = smov 128   ;;  %s5987_s29 = smov 8  }
  0x69   :  { %57 = dma.hbm_to_vmem [thread:$0]  %s6318_s3, 14336, %s52_s22, [#allocation5], %s5986_s1, %s5986_s1, %s5987_s29  }
  0x6a   :  { %s5988_s13 = smov [#allocation9]   ;;  %s5878_s15 = scalar_lea.hbm %s6320_s5, 2048 }
  0x6b   :  { %s73_s14 = sshll.u32 %s5988_s13, 4  ;;  %p5879_p6 = scmp.ne.s32.totalorder %s6320_s5, %s5878_s15  ;;  %s74_s14 = int_to_ptr.vmem [resolvable:$true] %s73_s14 }
  0x6c   :  { %p5882_p7 = scmp.lt.u32.totalorder %s5878_s15, %s6320_s5 }
  0x6e   :  { %p5884_p8 = pnand %p5882_p7, %p5879_p6 }
  0x70   :  { %5887 = shalt.err (!%p5884_p8)
}
  0x71   :  { %s5888_s19 = scalar_lea.vmem %s74_s14, 2048  ;;  %p5893_p10 = scmp.lt.s32.totalorder %s74_s14, %s74_s14 }
  0x72   :  { %p5889_p9 = scmp.ne.s32.totalorder %s74_s14, %s5888_s19  ;;  %p5894_p11 = scmp.lt.s32.totalorder %s5888_s19, %s5888_s19 }
  0x74   :  { %p5895_p12 = por %p5894_p11, %p5893_p10 }
  0x76   :  { %p5896_p13 = pnand %p5895_p12, %p5889_p9 }
  0x78   :  { %5899 = shalt.err (!%p5896_p13)
}
  0x79   :  { %s5989_s3 = smov 64   ;;  %s5990_s21 = smov 4  }
  0x7a   :  { %79 = dma.hbm_to_vmem [thread:$0]  %s6320_s5, 2048, %s74_s14, [#allocation8], %s5989_s3, %s5989_s3, %s5990_s21  }
  0x7b   :  { %s5991_s18 = smov [#allocation12]   ;;  %s5992_s25 = smov [#allocation15]  }
  0x7c   :  { %s95_s23 = sshll.u32 %s5991_s18, 4  ;;  %s117_s27 = sshll.u32 %s5992_s25, 4  ;;  %s96_s23 = int_to_ptr.vmem [resolvable:$true] %s95_s23  ;;  %s118_s27 = int_to_ptr.vmem [resolvable:$true] %s117_s27 }
  0x7d   :  { %s5900_s28 = scalar_lea.hbm %s6322_s7, 1024 }
  0x7e   :  { %p5901_p0 = scmp.ne.s32.totalorder %s6322_s7, %s5900_s28  ;;  %p5904_p1 = scmp.lt.u32.totalorder %s5900_s28, %s6322_s7 }
  0x80   :  { %p5906_p2 = pnand %p5904_p1, %p5901_p0 }
  0x82   :  { %5909 = shalt.err (!%p5906_p2)
}
  0x83   :  { %s5910_s5 = scalar_lea.vmem %s96_s23, 1024  ;;  %p5915_p4 = scmp.lt.s32.totalorder %s96_s23, %s96_s23 }
  0x84   :  { %p5911_p3 = scmp.ne.s32.totalorder %s96_s23, %s5910_s5  ;;  %p5916_p5 = scmp.lt.s32.totalorder %s5910_s5, %s5910_s5 }
  0x86   :  { %p5917_p6 = por %p5916_p5, %p5915_p4 }
  0x88   :  { %p5918_p7 = pnand %p5917_p6, %p5911_p3 }
  0x8a   :  { %5921 = shalt.err (!%p5918_p7)
}
  0x8b   :  { %101 = dma.hbm_to_vmem [thread:$0]  %s6322_s7, 1024, %s96_s23, [#allocation11], %s5989_s3, %s5989_s3, %s5990_s21  }
  0x8c   :  { %s5922_s15 = scalar_lea.hbm %s6324_s9, 1024 }
  0x8d   :  { %p5923_p8 = scmp.ne.s32.totalorder %s6324_s9, %s5922_s15  ;;  %p5926_p9 = scmp.lt.u32.totalorder %s5922_s15, %s6324_s9 }
  0x8f   :  { %p5928_p10 = pnand %p5926_p9, %p5923_p8 }
  0x91   :  { %5931 = shalt.err (!%p5928_p10)
}
  0x92   :  { %s5932_s19 = scalar_lea.vmem %s118_s27, 1024  ;;  %p5937_p12 = scmp.lt.s32.totalorder %s118_s27, %s118_s27 }
  0x93   :  { %p5933_p11 = scmp.ne.s32.totalorder %s118_s27, %s5932_s19  ;;  %p5938_p13 = scmp.lt.s32.totalorder %s5932_s19, %s5932_s19 }
  0x95   :  { %p5939_p0 = por %p5938_p13, %p5937_p12 }
  0x97   :  { %p5940_p1 = pnand %p5939_p0, %p5933_p11 }
  0x99   :  { %5943 = shalt.err (!%p5940_p1)
}
  0x9a   :  { %123 = dma.hbm_to_vmem [thread:$0]  %s6324_s9, 1024, %s118_s27, [#allocation14], %s5989_s3, %s5989_s3, %s5990_s21  }
  0x9b   :  { %s5993_s2 = smov [#allocation16]   ;;  %s5944_s6 = scalar_lea.hbm %s6325_s10, 16 }
  0x9c   :  { %s130_s18 = sshll.u32 %s5993_s2, 4  ;;  %p5945_p2 = scmp.ne.s32.totalorder %s6325_s10, %s5944_s6  ;;  %s131_s18 = int_to_ptr.vmem [resolvable:$true] %s130_s18 }
  0x9d   :  { %p5948_p3 = scmp.lt.u32.totalorder %s5944_s6, %s6325_s10 }
  0x9f   :  { %p5950_p4 = pnand %p5948_p3, %p5945_p2 }
  0xa1   :  { %5953 = shalt.err (!%p5950_p4)
}
  0xa2   :  { %s5954_s30 = scalar_lea.vmem %s131_s18, 16  ;;  %s5958_s9 = scalar_lea.vmem %s131_s18, 32 }
  0xa3   :  { %p5955_p5 = scmp.ne.s32.totalorder %s131_s18, %s5954_s30  ;;  %p5959_p6 = scmp.lt.s32.totalorder %s131_s18, %s131_s18 }
  0xa4   :  { %p5960_p7 = scmp.lt.s32.totalorder %s5958_s9, %s5954_s30 }
  0xa6   :  { %p5961_p8 = por %p5960_p7, %p5959_p6 }
  0xa8   :  { %p5962_p9 = pnand %p5961_p8, %p5955_p5 }
  0xaa   :  { %5965 = shalt.err (!%p5962_p9)
}
  0xab   :  { %133 = dma.hbm_to_vmem [thread:$0]  %s6325_s10, 16, %s131_s18, [#allocation17]  }
  0xac   :  { %5966 = dma.done.wait [#allocation3], 43904  }
  0xad   :  { %5967 = vsyncadd [#allocation3], 4294923392 }
  0xae   :  { %5968 = dma.done.wait [#allocation5], 14448  }
  0xaf   :  { %5969 = vsyncadd [#allocation5], 4294952848 }
  0xb0   :  { %5970 = dma.done.wait [#allocation8], 2080  }
  0xb1   :  { %5971 = vsyncadd [#allocation8], 4294965216 }
  0xb2   :  { %5972 = dma.done.wait [#allocation11], 1040  }
  0xb3   :  { %5973 = vsyncadd [#allocation11], 4294966256 }
  0xb4   :  { %5974 = dma.done.wait [#allocation14], 1040  }
  0xb5   :  { %5975 = vsyncadd [#allocation14], 4294966256 }
  0xb6   :  { %5976 = dma.done.wait [#allocation17], 16  }
  0xb7   :  { %5977 = vsyncadd [#allocation17], 4294967280  ;;  %v5048_v0 = vld [vmem:[#allocation2 + $0x4] ss:$28 sps:$4 sm:$0xff]   ;;  %v5051_v2 = vld [vmem:[#allocation2 + $0x3c] ss:$28 sps:$4 sm:$0xff]  }
  0xb8   :  { %v5050_v1 = vld [vmem:[#allocation2] ss:$28 sps:$4 sm:$0xff]   ;;  %2390 = vmatprep.subr.bf16.mxu0 %v5048_v0  ;;  %v5053_v3 = vld [vmem:[#allocation2 + $0x38] ss:$28 sps:$4 sm:$0xff]   ;;  %v5056_v5 = vld [vmem:[#allocation2 + $0x70] ss:$28 sps:$4 sm:$0xff]  }
  0xb9   :  { %2391 = vmatpush1.bf16.msra.mxu0 %v5050_v1  ;;  %v5054_v4 = vld [vmem:[#allocation2 + $0x74] ss:$28 sps:$4 sm:$0xff]   ;;  %v5063_v6 = vld [vmem:[#allocation2 + $0xc] ss:$28 sps:$4 sm:$0xff]   ;;  %v5069_v9 = vld [vmem:[#allocation2 + $0x44] ss:$28 sps:$4 sm:$0xff]  }
  0xba   :  { %2392 = vmatprep.subr.bf16.mxu0 %v5051_v2  ;;  %v5065_v7 = vld [vmem:[#allocation2 + $0x8] ss:$28 sps:$4 sm:$0xff]   ;;  %2554 = vmatprep.subr.bf16.mxu1 %v5063_v6  ;;  %v5071_v10 = vld [vmem:[#allocation2 + $0x40] ss:$28 sps:$4 sm:$0xff]   ;;  %v5077_v14 = vld [vmem:[#allocation2 + $0x78] ss:$28 sps:$4 sm:$0xff]  }
  0xbb   :  { %v5057_v8 = vld [vmem:[#allocation2 + $0xac] ss:$28 sps:$4 sm:$0xff]   ;;  %2555 = vmatpush1.bf16.msra.mxu1 %v5065_v7  ;;  %v5060_v12 = vld [vmem:[#allocation2 + $0xe4] ss:$28 sps:$4 sm:$0xff]   ;;  %v5075_v13 = vld [vmem:[#allocation2 + $0x7c] ss:$28 sps:$4 sm:$0xff]  }
  0xbc   :  { %v5059_v11 = vld [vmem:[#allocation2 + $0xa8] ss:$28 sps:$4 sm:$0xff]   ;;  %2556 = vmatprep.subr.bf16.mxu1 %v5069_v9  ;;  %v5062_v15 = vld [vmem:[#allocation2 + $0xe0] ss:$28 sps:$4 sm:$0xff]   ;;  %v5081_v16 = vld [vmem:[#allocation2 + $0xb4] ss:$28 sps:$4 sm:$0xff]  }
  0xbd   :  { %2393 = vmatpush1.bf16.msra.mxu0 %v5053_v3  ;;  %v5066_v17 = vld [vmem:[#allocation2 + $0x11c] ss:$28 sps:$4 sm:$0xff]   ;;  %v5083_v18 = vld [vmem:[#allocation2 + $0xb0] ss:$28 sps:$4 sm:$0xff]   ;;  %v5089_v22 = vld [vmem:[#allocation2 + $0xe8] ss:$28 sps:$4 sm:$0xff]  }
  0xbe   :  { %2394 = vmatprep.subr.bf16.mxu0 %v5054_v4  ;;  %v5068_v19 = vld [vmem:[#allocation2 + $0x118] ss:$28 sps:$4 sm:$0xff]   ;;  %v5087_v20 = vld [vmem:[#allocation2 + $0xec] ss:$28 sps:$4 sm:$0xff]   ;;  %v5093_v24 = vld [vmem:[#allocation2 + $0x124] ss:$28 sps:$4 sm:$0xff]  }
  0xbf   :  { %2557 = vmatpush1.bf16.msra.mxu1 %v5071_v10  ;;  %v5072_v21 = vld [vmem:[#allocation2 + $0x154] ss:$28 sps:$4 sm:$0xff]   ;;  %v5078_v25 = vld [vmem:[#allocation2 + $0x18c] ss:$28 sps:$4 sm:$0xff]   ;;  %v5095_v26 = vld [vmem:[#allocation2 + $0x120] ss:$28 sps:$4 sm:$0xff]  }
  0xc0   :  { %2558 = vmatprep.subr.bf16.mxu1 %v5075_v13  ;;  %v5074_v23 = vld [vmem:[#allocation2 + $0x150] ss:$28 sps:$4 sm:$0xff]   ;;  %v5080_v27 = vld [vmem:[#allocation2 + $0x188] ss:$28 sps:$4 sm:$0xff]   ;;  %v5099_v28 = vld [vmem:[#allocation2 + $0x15c] ss:$28 sps:$4 sm:$0xff]  }
  0xc1   :  { %2395 = vmatpush1.bf16.msra.mxu0 %v5056_v5  ;;  %v5084_v29 = vld [vmem:[#allocation2 + $0x1c4] ss:$28 sps:$4 sm:$0xff]   ;;  %v5101_v30 = vld [vmem:[#allocation2 + $0x158] ss:$28 sps:$4 sm:$0xff]   ;;  %v5107_v34 = vld [vmem:[#allocation2 + $0x190] ss:$28 sps:$4 sm:$0xff]  }
  0xc2   :  { %2396 = vmatprep.subr.bf16.mxu0 %v5057_v8  ;;  %v5086_v31 = vld [vmem:[#allocation2 + $0x1c0] ss:$28 sps:$4 sm:$0xff]   ;;  %v5105_v32 = vld [vmem:[#allocation2 + $0x194] ss:$28 sps:$4 sm:$0xff]   ;;  %v5111_v36 = vld [vmem:[#allocation2 + $0x1cc] ss:$28 sps:$4 sm:$0xff]  }
  0xc3   :  { %2559 = vmatpush1.bf16.msra.mxu1 %v5077_v14  ;;  %v5090_v33 = vld [vmem:[#allocation2 + $0x1fc] ss:$28 sps:$4 sm:$0xff]   ;;  %v5096_v37 = vld [vmem:[#allocation2 + $0x234] ss:$28 sps:$4 sm:$0xff]   ;;  %v165_v38 = vld [vmem:[%s6315_s0] sm:$0xff]  ;;  %vm2386_vm0 = vcmask 130048  }
  0xc4   :  { %2560 = vmatprep.subr.bf16.mxu1 %v5081_v16  ;;  %v5092_v35 = vld [vmem:[#allocation2 + $0x1f8] ss:$28 sps:$4 sm:$0xff]   ;;  %v5098_v39 = vld [vmem:[#allocation2 + $0x230] ss:$28 sps:$4 sm:$0xff]   ;;  %v5113_v40 = vld [vmem:[#allocation2 + $0x1c8] ss:$28 sps:$4 sm:$0xff]   ;;  %v6189_v41 = vcombine.high %v165_v38, %v165_v38  ;;  %v6193_v1 = vcombine.low %v165_v38, %v165_v38 }
  0xc5   :  { %2397 = vmatpush1.bf16.msra.mxu0 %v5059_v11  ;;  %v5117_v42 = vld [vmem:[#allocation2 + $0x204] ss:$28 sps:$4 sm:$0xff]   ;;  %v5102_v43 = vld [vmem:[#allocation2 + $0x26c] ss:$28 sps:$4 sm:$0xff]   ;;  %v5123_v46 = vld [vmem:[#allocation2 + $0x23c] ss:$28 sps:$4 sm:$0xff]  }
  0xc6   :  { %2398 = vmatprep.subr.bf16.mxu0 %v5060_v12  ;;  %2422 = vmatprep.mubr.bf16.mxu0 %v6189_v41  ;;  %v5104_v44 = vld [vmem:[#allocation2 + $0x268] ss:$28 sps:$4 sm:$0xff]   ;;  %v5119_v45 = vld [vmem:[#allocation2 + $0x200] ss:$28 sps:$4 sm:$0xff]   ;;  %v5125_v49 = vld [vmem:[#allocation2 + $0x238] ss:$28 sps:$4 sm:$0xff]  }
  0xc7   :  { %2561 = vmatpush1.bf16.msra.mxu1 %v5083_v18  ;;  %2586 = vmatprep.mubr.bf16.mxu1 %v6189_v41  ;;  %v5108_v47 = vld [vmem:[#allocation2 + $0x2a4] ss:$28 sps:$4 sm:$0xff]   ;;  %v5129_v50 = vld [vmem:[#allocation2 + $0x274] ss:$28 sps:$4 sm:$0xff]   ;;  %v5114_v51 = vld [vmem:[#allocation2 + $0x2dc] ss:$28 sps:$4 sm:$0xff]  }
  0xc8   :  { %2562 = vmatprep.subr.bf16.mxu1 %v5087_v20  ;;  %v5110_v48 = vld [vmem:[#allocation2 + $0x2a0] ss:$28 sps:$4 sm:$0xff]   ;;  %v5116_v52 = vld [vmem:[#allocation2 + $0x2d8] ss:$28 sps:$4 sm:$0xff]   ;;  %v5131_v53 = vld [vmem:[#allocation2 + $0x270] ss:$28 sps:$4 sm:$0xff]  }
  0xc9   :  { %2399 = vmatpush1.bf16.msra.mxu0 %v5062_v15  ;;  %v5137_v54 = vld [vmem:[#allocation2 + $0x2ac] ss:$28 sps:$4 sm:$0xff]   ;;  %v5120_v55 = vld [vmem:[#allocation2 + $0x314] ss:$28 sps:$4 sm:$0xff]   ;;  %v5143_v58 = vld [vmem:[#allocation2 + $0x2e4] ss:$28 sps:$4 sm:$0xff]  }
  0xca   :  { %2400 = vmatprep.subr.bf16.mxu0 %v5066_v17  ;;  %v5122_v56 = vld [vmem:[#allocation2 + $0x310] ss:$28 sps:$4 sm:$0xff]   ;;  %v5139_v57 = vld [vmem:[#allocation2 + $0x2a8] ss:$28 sps:$4 sm:$0xff]   ;;  %v5145_v61 = vld [vmem:[#allocation2 + $0x2e0] ss:$28 sps:$4 sm:$0xff]  }
  0xcb   :  { %2563 = vmatpush1.bf16.msra.mxu1 %v5089_v22  ;;  %v5126_v59 = vld [vmem:[#allocation2 + $0x34c] ss:$28 sps:$4 sm:$0xff]   ;;  %v5149_v62 = vld [vmem:[#allocation2 + $0x31c] ss:$28 sps:$4 sm:$0xff]   ;;  %v5135_v63 = vld [vmem:[#allocation2 + $0x384] ss:$28 sps:$4 sm:$0xff]  }
  0xcc   :  { %2564 = vmatprep.subr.bf16.mxu1 %v5093_v24  ;;  %v5128_v60 = vld [vmem:[#allocation2 + $0x348] ss:$28 sps:$4 sm:$0xff]   ;;  %v5133_v0 = vld [vmem:[#allocation2 + $0x380] ss:$28 sps:$4 sm:$0xff]   ;;  %v5151_v2 = vld [vmem:[#allocation2 + $0x318] ss:$28 sps:$4 sm:$0xff]  }
  0xcd   :  { %2401 = vmatpush1.bf16.msra.mxu0 %v5068_v19  ;;  %v5155_v3 = vld [vmem:[#allocation2 + $0x354] ss:$28 sps:$4 sm:$0xff]   ;;  %v5142_v4 = vld [vmem:[#allocation2 + $0x3bc] ss:$28 sps:$4 sm:$0xff]   ;;  %v5163_v7 = vld [vmem:[#allocation2 + $0x38c] ss:$28 sps:$4 sm:$0xff]  }
  0xce   :  { %2402 = vmatprep.subr.bf16.mxu0 %v5072_v21  ;;  %v5140_v5 = vld [vmem:[#allocation2 + $0x3b8] ss:$28 sps:$4 sm:$0xff]   ;;  %v5157_v6 = vld [vmem:[#allocation2 + $0x350] ss:$28 sps:$4 sm:$0xff]   ;;  %v5161_v10 = vld [vmem:[#allocation2 + $0x388] ss:$28 sps:$4 sm:$0xff]  }
  0xcf   :  { %2565 = vmatpush1.bf16.msra.mxu1 %v5095_v26  ;;  %v5148_v8 = vld [vmem:[#allocation2 + $0x3f4] ss:$28 sps:$4 sm:$0xff]   ;;  %v5169_v11 = vld [vmem:[#allocation2 + $0x3c4] ss:$28 sps:$4 sm:$0xff]   ;;  %v5154_v12 = vld [vmem:[#allocation2 + $0x42c] ss:$28 sps:$4 sm:$0xff]  }
  0xd0   :  { %2566 = vmatprep.subr.bf16.mxu1 %v5099_v28  ;;  %v5146_v9 = vld [vmem:[#allocation2 + $0x3f0] ss:$28 sps:$4 sm:$0xff]   ;;  %v5152_v13 = vld [vmem:[#allocation2 + $0x428] ss:$28 sps:$4 sm:$0xff]   ;;  %v5167_v14 = vld [vmem:[#allocation2 + $0x3c0] ss:$28 sps:$4 sm:$0xff]  }
  0xd1   :  { %2403 = vmatpush1.bf16.msra.mxu0 %v5074_v23  ;;  %v5175_v15 = vld [vmem:[#allocation2 + $0x3fc] ss:$28 sps:$4 sm:$0xff]   ;;  %v5160_v16 = vld [vmem:[#allocation2 + $0x464] ss:$28 sps:$4 sm:$0xff]   ;;  %v5181_v19 = vld [vmem:[#allocation2 + $0x434] ss:$28 sps:$4 sm:$0xff]  }
  0xd2   :  { %2404 = vmatprep.subr.bf16.mxu0 %v5078_v25  ;;  %v5158_v17 = vld [vmem:[#allocation2 + $0x460] ss:$28 sps:$4 sm:$0xff]   ;;  %v5173_v18 = vld [vmem:[#allocation2 + $0x3f8] ss:$28 sps:$4 sm:$0xff]   ;;  %v6200_v21 = vld [vmem:[%s6315_s0 + $0x8] sm:$0xff]  ;;  %vm5996_vm1 = vmmov 0  }
  0xd3   :  { %2567 = vmatpush1.bf16.msra.mxu1 %v5101_v30  ;;  %v5166_v20 = vld [vmem:[#allocation2 + $0x49c] ss:$28 sps:$4 sm:$0xff]   ;;  %v6204_v23 = vcombine.high %v6200_v21, %v6200_v21  ;;  %v5179_v24 = vld [vmem:[#allocation2 + $0x430] ss:$28 sps:$4 sm:$0xff]   ;;  %v5185_v28 = vld [vmem:[#allocation2 + $0x468] ss:$28 sps:$4 sm:$0xff]  }
  0xd4   :  { %2568 = vmatprep.subr.bf16.mxu1 %v5105_v32  ;;  %v5164_v22 = vld [vmem:[#allocation2 + $0x498] ss:$28 sps:$4 sm:$0xff]   ;;  %v5187_v25 = vld [vmem:[#allocation2 + $0x46c] ss:$28 sps:$4 sm:$0xff]   ;;  %v5191_v32 = vld [vmem:[#allocation2 + $0x4a0] ss:$28 sps:$4 sm:$0xff]  }
  0xd5   :  { %2405 = vmatpush1.bf16.msra.mxu0 %v5080_v27  ;;  %v5172_v26 = vld [vmem:[#allocation2 + $0x4d4] ss:$28 sps:$4 sm:$0xff]   ;;  %v5178_v30 = vld [vmem:[#allocation2 + $0x50c] ss:$28 sps:$4 sm:$0xff]   ;;  %v5190_v38 = vld [vmem:[#allocation2 + $0x57c] ss:$28 sps:$4 sm:$0xff]  }
  0xd6   :  { %2406 = vmatprep.subr.bf16.mxu0 %v5084_v29  ;;  %v5170_v27 = vld [vmem:[#allocation2 + $0x4d0] ss:$28 sps:$4 sm:$0xff]   ;;  %v5193_v29 = vld [vmem:[#allocation2 + $0x4a4] ss:$28 sps:$4 sm:$0xff]  }
  0xd7   :  { %2569 = vmatpush1.bf16.msra.mxu1 %v5107_v34  ;;  %v5184_v34 = vld [vmem:[#allocation2 + $0x544] ss:$28 sps:$4 sm:$0xff]  }
  0xd8   :  { %2570 = vmatprep.subr.bf16.mxu1 %v5111_v36  ;;  %v5197_v36 = vld [vmem:[#allocation2 + $0x4d8] ss:$28 sps:$4 sm:$0xff]  }
  0xd9   :  { %2407 = vmatpush1.bf16.msra.mxu0 %v5086_v31  ;;  %v5176_v31 = vld [vmem:[#allocation2 + $0x508] ss:$28 sps:$4 sm:$0xff]  }
  0xda   :  { %2408 = vmatprep.subr.bf16.mxu0 %v5090_v33  ;;  %v5199_v33 = vld [vmem:[#allocation2 + $0x4dc] ss:$28 sps:$4 sm:$0xff]  }
  0xdb   :  { %2571 = vmatpush1.bf16.msra.mxu1 %v5113_v40  ;;  %v5203_v40 = vld [vmem:[#allocation2 + $0x510] ss:$28 sps:$4 sm:$0xff]  }
  0xdc   :  { %2572 = vmatprep.subr.bf16.mxu1 %v5117_v42  ;;  %v5211_v42 = vld [vmem:[#allocation2 + $0x54c] ss:$28 sps:$4 sm:$0xff]  }
  0xdd   :  { %2409 = vmatpush1.bf16.msra.mxu0 %v5092_v35  ;;  %v5182_v35 = vld [vmem:[#allocation2 + $0x540] ss:$28 sps:$4 sm:$0xff]  }
  0xde   :  { %2410 = vmatprep.subr.bf16.mxu0 %v5096_v37  ;;  %v5205_v37 = vld [vmem:[#allocation2 + $0x514] ss:$28 sps:$4 sm:$0xff]  }
  0xdf   :  { %2573 = vmatpush1.bf16.msra.mxu1 %v5119_v45  ;;  %v5209_v45 = vld [vmem:[#allocation2 + $0x548] ss:$28 sps:$4 sm:$0xff]  }
  0xe0   :  { %2574 = vmatprep.subr.bf16.mxu1 %v5123_v46  ;;  %v5217_v46 = vld [vmem:[#allocation2 + $0x584] ss:$28 sps:$4 sm:$0xff]  }
  0xe1   :  { %2411 = vmatpush1.bf16.msra.mxu0 %v5098_v39  ;;  %v5188_v39 = vld [vmem:[#allocation2 + $0x578] ss:$28 sps:$4 sm:$0xff]  }
  0xe2   :  { %2412 = vmatprep.subr.bf16.mxu0 %v5102_v43  ;;  %v5196_v43 = vld [vmem:[#allocation2 + $0x5b4] ss:$28 sps:$4 sm:$0xff]  }
  0xe3   :  { %2575 = vmatpush1.bf16.msra.mxu1 %v5125_v49  ;;  %v5215_v49 = vld [vmem:[#allocation2 + $0x580] ss:$28 sps:$4 sm:$0xff]  }
  0xe4   :  { %2576 = vmatprep.subr.bf16.mxu1 %v5129_v50  ;;  %v5223_v50 = vld [vmem:[#allocation2 + $0x5bc] ss:$28 sps:$4 sm:$0xff]  }
  0xe5   :  { %2413 = vmatpush1.bf16.msra.mxu0 %v5104_v44  ;;  %v5194_v44 = vld [vmem:[#allocation2 + $0x5b0] ss:$28 sps:$4 sm:$0xff]  }
  0xe6   :  { %2414 = vmatprep.subr.bf16.mxu0 %v5108_v47  ;;  %v5202_v47 = vld [vmem:[#allocation2 + $0x5ec] ss:$28 sps:$4 sm:$0xff]  }
  0xe7   :  { %2577 = vmatpush1.bf16.msra.mxu1 %v5131_v53  ;;  %v5221_v53 = vld [vmem:[#allocation2 + $0x5b8] ss:$28 sps:$4 sm:$0xff]  }
  0xe8   :  { %2578 = vmatprep.subr.bf16.mxu1 %v5137_v54  ;;  %v5229_v54 = vld [vmem:[#allocation2 + $0x5f4] ss:$28 sps:$4 sm:$0xff]  }
  0xe9   :  { %2415 = vmatpush1.bf16.msra.mxu0 %v5110_v48  ;;  %v5200_v48 = vld [vmem:[#allocation2 + $0x5e8] ss:$28 sps:$4 sm:$0xff]  }
  0xea   :  { %2416 = vmatprep.subr.bf16.mxu0 %v5114_v51  ;;  %v5208_v51 = vld [vmem:[#allocation2 + $0x624] ss:$28 sps:$4 sm:$0xff]  }
  0xeb   :  { %2579 = vmatpush1.bf16.msra.mxu1 %v5139_v57  ;;  %v5227_v57 = vld [vmem:[#allocation2 + $0x5f0] ss:$28 sps:$4 sm:$0xff]  }
  0xec   :  { %2580 = vmatprep.subr.bf16.mxu1 %v5143_v58  ;;  %v5237_v58 = vld [vmem:[#allocation2 + $0x62c] ss:$28 sps:$4 sm:$0xff]  }
  0xed   :  { %2417 = vmatpush1.bf16.msra.mxu0 %v5116_v52  ;;  %v5206_v52 = vld [vmem:[#allocation2 + $0x620] ss:$28 sps:$4 sm:$0xff]  }
  0xee   :  { %2418 = vmatprep.subr.bf16.mxu0 %v5120_v55  ;;  %v5214_v55 = vld [vmem:[#allocation2 + $0x65c] ss:$28 sps:$4 sm:$0xff]  }
  0xef   :  { %2581 = vmatpush1.bf16.msra.mxu1 %v5145_v61  ;;  %v5235_v61 = vld [vmem:[#allocation2 + $0x628] ss:$28 sps:$4 sm:$0xff]  }
  0xf0   :  { %2582 = vmatprep.subr.bf16.mxu1 %v5149_v62  ;;  %v5243_v62 = vld [vmem:[#allocation2 + $0x664] ss:$28 sps:$4 sm:$0xff]  }
  0xf1   :  { %2419 = vmatpush1.bf16.msra.mxu0 %v5122_v56  ;;  %v5212_v56 = vld [vmem:[#allocation2 + $0x658] ss:$28 sps:$4 sm:$0xff]  }
  0xf2   :  { %2420 = vmatprep.subr.bf16.mxu0 %v5126_v59  ;;  %v5220_v59 = vld [vmem:[#allocation2 + $0x694] ss:$28 sps:$4 sm:$0xff]  }
  0xf3   :  { %2583 = vmatpush1.bf16.msra.mxu1 %v5151_v2  ;;  %v5224_v2 = vld [vmem:[#allocation2 + $0x6c8] ss:$28 sps:$4 sm:$0xff]  }
  0xf4   :  { %2584 = vmatprep.subr.bf16.mxu1 %v5155_v3  ;;  %v5249_v3 = vld [vmem:[#allocation2 + $0x69c] ss:$28 sps:$4 sm:$0xff]  }
  0xf5   :  { %2421 = vmatpush1.bf16.msra.mxu0 %v5128_v60  ;;  %v5218_v60 = vld [vmem:[#allocation2 + $0x690] ss:$28 sps:$4 sm:$0xff]  }
  0xf6   :  { %2431 = vmatprep.subr.bf16.mxu0 %v5135_v63  ;;  %v5226_v63 = vld [vmem:[#allocation2 + $0x6cc] ss:$28 sps:$4 sm:$0xff]  }
  0xf7   :  { %2585 = vmatpush1.bf16.msra.mxu1 %v5157_v6  ;;  %v6215_v6 = vcombine.low %v6200_v21, %v6200_v21  ;;  %v5265_v21 = vld [vmem:[#allocation2 + $0x740] ss:$28 sps:$4 sm:$0xff]  }
  0xf8   :  { %2423 = vmatmul.mubr.bf16.vlgmr.msra.gmra.mrb[0].mxu0 %v6193_v1  ;;  %2595 = vmatprep.subr.bf16.mxu1 %v5163_v7  ;;  %v5247_v7 = vld [vmem:[#allocation2 + $0x698] ss:$28 sps:$4 sm:$0xff]  }
  0xf9   :  { %2432 = vmatpush1.bf16.msra.mxu0 %v5133_v0  ;;  %2463 = vmatprep.mubr.bf16.mxu0 %v6204_v23  ;;  %v5241_v0 = vld [vmem:[#allocation2 + $0x660] ss:$28 sps:$4 sm:$0xff]  }
  0xfa   :  { %2433 = vmatprep.subr.bf16.mxu0 %v5142_v4  ;;  %2587 = vmatmul.mubr.bf16.vlgmr.msra.gmra.mrb[0].mxu1 %v6193_v1  ;;  %v5233_v4 = vld [vmem:[#allocation2 + $0x704] ss:$28 sps:$4 sm:$0xff]  }
  0xfb   :  { %2596 = vmatpush1.bf16.msra.mxu1 %v5161_v10  ;;  %2627 = vmatprep.mubr.bf16.mxu1 %v6204_v23  ;;  %v5240_v10 = vld [vmem:[#allocation2 + $0x73c] ss:$28 sps:$4 sm:$0xff]  }
  0xfc   :  { %2597 = vmatprep.subr.bf16.mxu1 %v5169_v11 }
  0xfd   :  { %2434 = vmatpush1.bf16.msra.mxu0 %v5140_v5  ;;  %v6211_v5 = vld [vmem:[%s6315_s0 + $0x10] sm:$0xff] }
  0xfe   :  { %2435 = vmatprep.subr.bf16.mxu0 %v5148_v8  ;;  %v5231_v8 = vld [vmem:[#allocation2 + $0x700] ss:$28 sps:$4 sm:$0xff]   ;;  %v6219_v11 = vcombine.high %v6211_v5, %v6211_v5 }
  0xff   :  { %2598 = vmatpush1.bf16.msra.mxu1 %v5167_v14  ;;  %v5261_v14 = vld [vmem:[#allocation2 + $0x70c] ss:$28 sps:$4 sm:$0xff]  }
 0x100   :  { %2599 = vmatprep.subr.bf16.mxu1 %v5175_v15  ;;  %v5246_v15 = vld [vmem:[#allocation2 + $0x774] ss:$28 sps:$4 sm:$0xff]  }
 0x101   :  { %2436 = vmatpush1.bf16.msra.mxu0 %v5146_v9  ;;  %v5255_v9 = vld [vmem:[#allocation2 + $0x6d4] ss:$28 sps:$4 sm:$0xff]  }
 0x102   :  { %2437 = vmatprep.subr.bf16.mxu0 %v5154_v12  ;;  %v5238_v12 = vld [vmem:[#allocation2 + $0x738] ss:$28 sps:$4 sm:$0xff]  }
 0x103   :  { %2600 = vmatpush1.bf16.msra.mxu1 %v5173_v18  ;;  %v5267_v18 = vld [vmem:[#allocation2 + $0x744] ss:$28 sps:$4 sm:$0xff]  }
 0x104   :  { %2601 = vmatprep.subr.bf16.mxu1 %v5181_v19  ;;  %v5252_v19 = vld [vmem:[#allocation2 + $0x7ac] ss:$28 sps:$4 sm:$0xff]  }
 0x105   :  { %2438 = vmatpush1.bf16.msra.mxu0 %v5152_v13  ;;  %v5253_v13 = vld [vmem:[#allocation2 + $0x6d0] ss:$28 sps:$4 sm:$0xff]  }
 0x106   :  { %2439 = vmatprep.subr.bf16.mxu0 %v5160_v16  ;;  %v5244_v16 = vld [vmem:[#allocation2 + $0x770] ss:$28 sps:$4 sm:$0xff]  }
 0x107   :  { %2602 = vmatpush1.bf16.msra.mxu1 %v5179_v24  ;;  %v5258_v24 = vld [vmem:[#allocation2 + $0x7e4] ss:$28 sps:$4 sm:$0xff]  }
 0x108   :  { %2603 = vmatprep.subr.bf16.mxu1 %v5187_v25  ;;  %v5256_v25 = vld [vmem:[#allocation2 + $0x7e0] ss:$28 sps:$4 sm:$0xff]  }
 0x109   :  { %2440 = vmatpush1.bf16.msra.mxu0 %v5158_v17  ;;  %v5259_v17 = vld [vmem:[#allocation2 + $0x708] ss:$28 sps:$4 sm:$0xff]  }
 0x10a   :  { %2441 = vmatprep.subr.bf16.mxu0 %v5166_v20  ;;  %v5250_v20 = vld [vmem:[#allocation2 + $0x7a8] ss:$28 sps:$4 sm:$0xff]  }
 0x10b   :  { %2604 = vmatpush1.bf16.msra.mxu1 %v5185_v28  ;;  %v5264_v28 = vld [vmem:[#allocation2 + $0x81c] ss:$28 sps:$4 sm:$0xff]  }
 0x10c   :  { %2605 = vmatprep.subr.bf16.mxu1 %v5193_v29  ;;  %v5262_v29 = vld [vmem:[#allocation2 + $0x818] ss:$28 sps:$4 sm:$0xff]  }
 0x10d   :  { %2442 = vmatpush1.bf16.msra.mxu0 %v5164_v22  ;;  %v5273_v22 = vld [vmem:[#allocation2 + $0x77c] ss:$28 sps:$4 sm:$0xff]  }
 0x10e   :  { %2443 = vmatprep.subr.bf16.mxu0 %v5172_v26  ;;  %v5271_v26 = vld [vmem:[#allocation2 + $0x778] ss:$28 sps:$4 sm:$0xff]  }
 0x10f   :  { %2606 = vmatpush1.bf16.msra.mxu1 %v5191_v32  ;;  %v5270_v32 = vld [vmem:[#allocation2 + $0x854] ss:$28 sps:$4 sm:$0xff]  }
 0x110   :  { %2607 = vmatprep.subr.bf16.mxu1 %v5199_v33  ;;  %v5268_v33 = vld [vmem:[#allocation2 + $0x850] ss:$28 sps:$4 sm:$0xff]  }
 0x111   :  { %2444 = vmatpush1.bf16.msra.mxu0 %v5170_v27  ;;  %v5279_v27 = vld [vmem:[#allocation2 + $0x7b4] ss:$28 sps:$4 sm:$0xff]  }
 0x112   :  { %2445 = vmatprep.subr.bf16.mxu0 %v5178_v30  ;;  %v5277_v30 = vld [vmem:[#allocation2 + $0x7b0] ss:$28 sps:$4 sm:$0xff]  }
 0x113   :  { %2608 = vmatpush1.bf16.msra.mxu1 %v5197_v36  ;;  %v5276_v36 = vld [vmem:[#allocation2 + $0x88c] ss:$28 sps:$4 sm:$0xff]  }
 0x114   :  { %2609 = vmatprep.subr.bf16.mxu1 %v5205_v37  ;;  %v5274_v37 = vld [vmem:[#allocation2 + $0x888] ss:$28 sps:$4 sm:$0xff]  }
 0x115   :  { %2446 = vmatpush1.bf16.msra.mxu0 %v5176_v31  ;;  %v5285_v31 = vld [vmem:[#allocation2 + $0x7ec] ss:$28 sps:$4 sm:$0xff]  }
 0x116   :  { %2447 = vmatprep.subr.bf16.mxu0 %v5184_v34  ;;  %v5283_v34 = vld [vmem:[#allocation2 + $0x7e8] ss:$28 sps:$4 sm:$0xff]  }
 0x117   :  { %2610 = vmatpush1.bf16.msra.mxu1 %v5203_v40  ;;  %v5282_v40 = vld [vmem:[#allocation2 + $0x8c4] ss:$28 sps:$4 sm:$0xff]  }
 0x118   :  { %2611 = vmatprep.subr.bf16.mxu1 %v5211_v42  ;;  %v5280_v42 = vld [vmem:[#allocation2 + $0x8c0] ss:$28 sps:$4 sm:$0xff]  }
 0x119   :  { %2448 = vmatpush1.bf16.msra.mxu0 %v5182_v35  ;;  %v5291_v35 = vld [vmem:[#allocation2 + $0x824] ss:$28 sps:$4 sm:$0xff]  }
 0x11a   :  { %2449 = vmatprep.subr.bf16.mxu0 %v5190_v38  ;;  %v5289_v38 = vld [vmem:[#allocation2 + $0x820] ss:$28 sps:$4 sm:$0xff]  }
 0x11b   :  { %2612 = vmatpush1.bf16.msra.mxu1 %v5209_v45  ;;  %v5288_v45 = vld [vmem:[#allocation2 + $0x8fc] ss:$28 sps:$4 sm:$0xff]  }
 0x11c   :  { %2613 = vmatprep.subr.bf16.mxu1 %v5217_v46  ;;  %v5286_v46 = vld [vmem:[#allocation2 + $0x8f8] ss:$28 sps:$4 sm:$0xff]  }
 0x11d   :  { %2450 = vmatpush1.bf16.msra.mxu0 %v5188_v39  ;;  %v5297_v39 = vld [vmem:[#allocation2 + $0x85c] ss:$28 sps:$4 sm:$0xff]  }
 0x11e   :  { %2451 = vmatprep.subr.bf16.mxu0 %v5196_v43  ;;  %v5295_v43 = vld [vmem:[#allocation2 + $0x858] ss:$28 sps:$4 sm:$0xff]  }
 0x11f   :  { %2614 = vmatpush1.bf16.msra.mxu1 %v5215_v49  ;;  %v5294_v49 = vld [vmem:[#allocation2 + $0x934] ss:$28 sps:$4 sm:$0xff]  }
 0x120   :  { %2615 = vmatprep.subr.bf16.mxu1 %v5223_v50  ;;  %v5307_v50 = vld [vmem:[#allocation2 + $0x8c8] ss:$28 sps:$4 sm:$0xff]  }
 0x121   :  { %2452 = vmatpush1.bf16.msra.mxu0 %v5194_v44  ;;  %v5303_v44 = vld [vmem:[#allocation2 + $0x894] ss:$28 sps:$4 sm:$0xff]  }
 0x122   :  { %2453 = vmatprep.subr.bf16.mxu0 %v5202_v47  ;;  %v5301_v47 = vld [vmem:[#allocation2 + $0x890] ss:$28 sps:$4 sm:$0xff]  }
 0x123   :  { %2616 = vmatpush1.bf16.msra.mxu1 %v5221_v53  ;;  %v5300_v53 = vld [vmem:[#allocation2 + $0x96c] ss:$28 sps:$4 sm:$0xff]  }
 0x124   :  { %2617 = vmatprep.subr.bf16.mxu1 %v5229_v54  ;;  %v5298_v54 = vld [vmem:[#allocation2 + $0x968] ss:$28 sps:$4 sm:$0xff]  }
 0x125   :  { %2454 = vmatpush1.bf16.msra.mxu0 %v5200_v48  ;;  %v5309_v48 = vld [vmem:[#allocation2 + $0x8cc] ss:$28 sps:$4 sm:$0xff]  }
 0x126   :  { %2455 = vmatprep.subr.bf16.mxu0 %v5208_v51  ;;  %v5292_v51 = vld [vmem:[#allocation2 + $0x930] ss:$28 sps:$4 sm:$0xff]  }
 0x127   :  { %2618 = vmatpush1.bf16.msra.mxu1 %v5227_v57  ;;  %v5306_v57 = vld [vmem:[#allocation2 + $0x9a4] ss:$28 sps:$4 sm:$0xff]  }
 0x128   :  { %2619 = vmatprep.subr.bf16.mxu1 %v5237_v58  ;;  %v5304_v58 = vld [vmem:[#allocation2 + $0x9a0] ss:$28 sps:$4 sm:$0xff]  }
 0x129   :  { %2456 = vmatpush1.bf16.msra.mxu0 %v5206_v52  ;;  %v5315_v52 = vld [vmem:[#allocation2 + $0x904] ss:$28 sps:$4 sm:$0xff]  }
 0x12a   :  { %2457 = vmatprep.subr.bf16.mxu0 %v5214_v55  ;;  %v5313_v55 = vld [vmem:[#allocation2 + $0x900] ss:$28 sps:$4 sm:$0xff]  }
 0x12b   :  { %2620 = vmatpush1.bf16.msra.mxu1 %v5235_v61  ;;  %v5312_v61 = vld [vmem:[#allocation2 + $0x9dc] ss:$28 sps:$4 sm:$0xff]  }
 0x12c   :  { %2621 = vmatprep.subr.bf16.mxu1 %v5243_v62  ;;  %v5310_v62 = vld [vmem:[#allocation2 + $0x9d8] ss:$28 sps:$4 sm:$0xff]  }
 0x12d   :  { %2458 = vmatpush1.bf16.msra.mxu0 %v5212_v56  ;;  %v5321_v56 = vld [vmem:[#allocation2 + $0x93c] ss:$28 sps:$4 sm:$0xff]  }
 0x12e   :  { %2459 = vmatprep.subr.bf16.mxu0 %v5220_v59  ;;  %v5319_v59 = vld [vmem:[#allocation2 + $0x938] ss:$28 sps:$4 sm:$0xff]  }
 0x12f   :  { %2622 = vmatpush1.bf16.msra.mxu1 %v5241_v0  ;;  %v5335_v0 = vld [vmem:[#allocation2 + $0x9ac] ss:$28 sps:$4 sm:$0xff]  }
 0x130   :  { %2623 = vmatprep.subr.bf16.mxu1 %v5249_v3  ;;  %v5316_v3 = vld [vmem:[#allocation2 + $0xa10] ss:$28 sps:$4 sm:$0xff]  }
 0x131   :  { %2460 = vmatpush1.bf16.msra.mxu0 %v5218_v60  ;;  %v5327_v60 = vld [vmem:[#allocation2 + $0x974] ss:$28 sps:$4 sm:$0xff]  }
 0x132   :  { %2461 = vmatprep.subr.bf16.mxu0 %v5226_v63  ;;  %v5325_v63 = vld [vmem:[#allocation2 + $0x970] ss:$28 sps:$4 sm:$0xff]  }
 0x133   :  { %2624 = vmatpush1.bf16.msra.mxu1 %v5247_v7  ;;  %v5338_v7 = vld [vmem:[#allocation2 + $0x9e4] ss:$28 sps:$4 sm:$0xff]  }
 0x134   :  { %2625 = vmatprep.subr.bf16.mxu1 %v5255_v9  ;;  %v5336_v9 = vld [vmem:[#allocation2 + $0x9e0] ss:$28 sps:$4 sm:$0xff]  }
 0x135   :  { %2462 = vmatpush1.bf16.msra.mxu0 %v5224_v2  ;;  %v5318_v2 = vld [vmem:[#allocation2 + $0xa14] ss:$28 sps:$4 sm:$0xff]  }
 0x136   :  { %2472 = vmatprep.subr.bf16.mxu0 %v5233_v4  ;;  %v5333_v4 = vld [vmem:[#allocation2 + $0x9a8] ss:$28 sps:$4 sm:$0xff]  }
 0x137   :  { %2626 = vmatpush1.bf16.msra.mxu1 %v5253_v13  ;;  %v5332_v13 = vld [vmem:[#allocation2 + $0xa84] ss:$28 sps:$4 sm:$0xff]  }
 0x138   :  { %2464 = vmatmul.mubr.bf16.vlgmr.msra.gmra.mrb[0].mxu0 %v6215_v6  ;;  %2636 = vmatprep.subr.bf16.mxu1 %v5261_v14  ;;  %v6227_v14 = vcombine.low %v6211_v5, %v6211_v5  ;;  %v5392_v5 = vld [vmem:[#allocation2 + $0x18] ss:$28 sps:$4 sm:$0xff]  }
 0x139   :  { %2473 = vmatpush1.bf16.msra.mxu0 %v5231_v8  ;;  %2504 = vmatprep.mubr.bf16.mxu0 %v6219_v11  ;;  %v5324_v8 = vld [vmem:[#allocation2 + $0xa4c] ss:$28 sps:$4 sm:$0xff]  }
 0x13a   :  { %2474 = vmatprep.subr.bf16.mxu0 %v5240_v10  ;;  %2628 = vmatmul.mubr.bf16.vlgmr.msra.gmra.mrb[0].mxu1 %v6215_v6  ;;  %v5322_v10 = vld [vmem:[#allocation2 + $0xa48] ss:$28 sps:$4 sm:$0xff]  }
 0x13b   :  { %2637 = vmatpush1.bf16.msra.mxu1 %v5259_v17  ;;  %2668 = vmatprep.mubr.bf16.mxu1 %v6219_v11  ;;  %v5345_v17 = vld [vmem:[#allocation2 + $0xa8c] ss:$28 sps:$4 sm:$0xff]  }
 0x13c   :  { %2638 = vmatprep.subr.bf16.mxu1 %v5267_v18  ;;  %v5348_v18 = vld [vmem:[#allocation2 + $0xa54] ss:$28 sps:$4 sm:$0xff]  }
 0x13d   :  { %2475 = vmatpush1.bf16.msra.mxu0 %v5238_v12  ;;  %v5341_v12 = vld [vmem:[#allocation2 + $0xa1c] ss:$28 sps:$4 sm:$0xff]  }
 0x13e   :  { %2476 = vmatprep.subr.bf16.mxu0 %v5246_v15  ;;  %v5330_v15 = vld [vmem:[#allocation2 + $0xa80] ss:$28 sps:$4 sm:$0xff]  }
 0x13f   :  { %2639 = vmatpush1.bf16.msra.mxu1 %v5265_v21  ;;  %v5391_v21 = vld [vmem:[#allocation2 + $0x1d8] ss:$28 sps:$4 sm:$0xff]  }
 0x140   :  { %2640 = vmatprep.subr.bf16.mxu1 %v5273_v22  ;;  %v5396_v22 = vld [vmem:[#allocation2 + $0x210] ss:$28 sps:$4 sm:$0xff]  }
 0x141   :  { %2477 = vmatpush1.bf16.msra.mxu0 %v5244_v16  ;;  %v5339_v16 = vld [vmem:[#allocation2 + $0xa18] ss:$28 sps:$4 sm:$0xff]  }
 0x142   :  { %2478 = vmatprep.subr.bf16.mxu0 %v5252_v19  ;;  %v5346_v19 = vld [vmem:[#allocation2 + $0xa50] ss:$28 sps:$4 sm:$0xff]  }
 0x143   :  { %2641 = vmatpush1.bf16.msra.mxu1 %v5271_v26  ;;  %v5397_v26 = vld [vmem:[#allocation2 + $0x50] ss:$28 sps:$4 sm:$0xff]  }
 0x144   :  { %2642 = vmatprep.subr.bf16.mxu1 %v5279_v27  ;;  %v5351_v27 = vld [vmem:[#allocation2 + $0x14] ss:$28 sps:$4 sm:$0xff]  }
 0x145   :  { %2479 = vmatpush1.bf16.msra.mxu0 %v5250_v20  ;;  %v5994_v20 = vmov 0  }
 0x146   :  { %2480 = vmatprep.subr.bf16.mxu0 %v5258_v24  ;;  %v5342_v24 = vld [vmem:[%s6315_s0 + $0x18] ss:$0 sps:$4 sm:$0xff]  }
 0x147   :  { %2643 = vmatpush1.bf16.msra.mxu1 %v5277_v30  ;;  %v5406_v30 = vld [vmem:[#allocation2 + $0x280] ss:$28 sps:$4 sm:$0xff]  }
 0x148   :  { %2644 = vmatprep.subr.bf16.mxu1 %v5285_v31  ;;  %v5349_v31 = vld [vmem:[#allocation2 + $0x10] ss:$28 sps:$4 sm:$0xff]  }
 0x149   :  { %2481 = vmatpush1.bf16.msra.mxu0 %v5256_v25  ;;  %v5343_v25 = vld [vmem:[#allocation2 + $0xa88] ss:$28 sps:$4 sm:$0xff]  }
 0x14a   :  { %2482 = vmatprep.subr.bf16.mxu0 %v5264_v28  ;;  %v5401_v28 = vld [vmem:[#allocation2 + $0x248] ss:$28 sps:$4 sm:$0xff]  }
 0x14b   :  { %2645 = vmatpush1.bf16.msra.mxu1 %v5283_v34  ;;  %v5411_v34 = vld [vmem:[#allocation2 + $0x2b8] ss:$28 sps:$4 sm:$0xff]  }
 0x14c   :  { %2646 = vmatprep.subr.bf16.mxu1 %v5291_v35  ;;  %v5352_v35 = vld [vmem:[#allocation2 + $0x48] ss:$28 sps:$4 sm:$0xff]  }
 0x14d   :  { %2483 = vmatpush1.bf16.msra.mxu0 %v5262_v29  ;;  %v5402_v29 = vld [vmem:[#allocation2 + $0x88] ss:$28 sps:$4 sm:$0xff]  }
 0x14e   :  { %2484 = vmatprep.subr.bf16.mxu0 %v5270_v32  ;;  %v5407_v32 = vld [vmem:[#allocation2 + $0xc0] ss:$28 sps:$4 sm:$0xff]  }
 0x14f   :  { %2647 = vmatpush1.bf16.msra.mxu1 %v5289_v38  ;;  %v5357_v38 = vld [vmem:[#allocation2 + $0x84] ss:$28 sps:$4 sm:$0xff]  }
 0x150   :  { %2648 = vmatprep.subr.bf16.mxu1 %v5297_v39  ;;  %v5355_v39 = vld [vmem:[#allocation2 + $0x80] ss:$28 sps:$4 sm:$0xff]  }
 0x151   :  { %2485 = vmatpush1.bf16.msra.mxu0 %v5268_v33  ;;  %v5354_v33 = vld [vmem:[#allocation2 + $0x4c] ss:$28 sps:$4 sm:$0xff]  }
 0x152   :  { %2486 = vmatprep.subr.bf16.mxu0 %v5276_v36  ;;  %v5412_v36 = vld [vmem:[#allocation2 + $0xf8] ss:$28 sps:$4 sm:$0xff]  }
 0x153   :  { %2649 = vmatpush1.bf16.msra.mxu1 %v5295_v43  ;;  %v5360_v43 = vld [vmem:[#allocation2 + $0xbc] ss:$28 sps:$4 sm:$0xff]  }
 0x154   :  { %2650 = vmatprep.subr.bf16.mxu1 %v5303_v44  ;;  %v5358_v44 = vld [vmem:[#allocation2 + $0xb8] ss:$28 sps:$4 sm:$0xff]  }
 0x155   :  { %2487 = vmatpush1.bf16.msra.mxu0 %v5274_v37  ;;  %v5416_v37 = vld [vmem:[#allocation2 + $0x2f0] ss:$28 sps:$4 sm:$0xff]  }
 0x156   :  { %2488 = vmatprep.subr.bf16.mxu0 %v5282_v40  ;;  %v5417_v40 = vld [vmem:[#allocation2 + $0x130] ss:$28 sps:$4 sm:$0xff]  }
 0x157   :  { %2651 = vmatpush1.bf16.msra.mxu1 %v5301_v47  ;;  %v5427_v47 = vld [vmem:[#allocation2 + $0x1a0] ss:$28 sps:$4 sm:$0xff]  }
 0x158   :  { %2652 = vmatprep.subr.bf16.mxu1 %v5309_v48  ;;  %v5361_v48 = vld [vmem:[#allocation2 + $0xf0] ss:$28 sps:$4 sm:$0xff]  }
 0x159   :  { %2489 = vmatpush1.bf16.msra.mxu0 %v5280_v42  ;;  %v5421_v42 = vld [vmem:[#allocation2 + $0x328] ss:$28 sps:$4 sm:$0xff]  }
 0x15a   :  { %2490 = vmatprep.subr.bf16.mxu0 %v5288_v45  ;;  %v5422_v45 = vld [vmem:[#allocation2 + $0x168] ss:$28 sps:$4 sm:$0xff]  }
 0x15b   :  { %2653 = vmatpush1.bf16.msra.mxu1 %v5307_v50  ;;  %v5366_v50 = vld [vmem:[#allocation2 + $0x12c] ss:$28 sps:$4 sm:$0xff]  }
 0x15c   :  { %2654 = vmatprep.subr.bf16.mxu1 %v5315_v52  ;;  %v5364_v52 = vld [vmem:[#allocation2 + $0x128] ss:$28 sps:$4 sm:$0xff]  }
 0x15d   :  { %2491 = vmatpush1.bf16.msra.mxu0 %v5286_v46  ;;  %v5426_v46 = vld [vmem:[#allocation2 + $0x360] ss:$28 sps:$4 sm:$0xff]  }
 0x15e   :  { %2492 = vmatprep.subr.bf16.mxu0 %v5294_v49  ;;  %v5431_v49 = vld [vmem:[#allocation2 + $0x558] ss:$28 sps:$4 sm:$0xff]  }
 0x15f   :  { %2655 = vmatpush1.bf16.msra.mxu1 %v5313_v55  ;;  %v5437_v55 = vld [vmem:[#allocation2 + $0x3d0] ss:$28 sps:$4 sm:$0xff]  }
 0x160   :  { %2656 = vmatprep.subr.bf16.mxu1 %v5321_v56  ;;  %v5367_v56 = vld [vmem:[#allocation2 + $0x160] ss:$28 sps:$4 sm:$0xff]  }
 0x161   :  { %2493 = vmatpush1.bf16.msra.mxu0 %v5292_v51  ;;  %v5432_v51 = vld [vmem:[#allocation2 + $0x398] ss:$28 sps:$4 sm:$0xff]  }
 0x162   :  { %2494 = vmatprep.subr.bf16.mxu0 %v5300_v53  ;;  %v5436_v53 = vld [vmem:[#allocation2 + $0x590] ss:$28 sps:$4 sm:$0xff]  }
 0x163   :  { %2657 = vmatpush1.bf16.msra.mxu1 %v5319_v59  ;;  %v5442_v59 = vld [vmem:[#allocation2 + $0x408] ss:$28 sps:$4 sm:$0xff]  }
 0x164   :  { %2658 = vmatprep.subr.bf16.mxu1 %v5327_v60  ;;  %v5370_v60 = vld [vmem:[#allocation2 + $0x198] ss:$28 sps:$4 sm:$0xff]  }
 0x165   :  { %2495 = vmatpush1.bf16.msra.mxu0 %v5298_v54  ;;  %v5369_v54 = vld [vmem:[#allocation2 + $0x164] ss:$28 sps:$4 sm:$0xff]  }
 0x166   :  { %2496 = vmatprep.subr.bf16.mxu0 %v5306_v57  ;;  %v5441_v57 = vld [vmem:[#allocation2 + $0x5c8] ss:$28 sps:$4 sm:$0xff]  }
 0x167   :  { %2659 = vmatpush1.bf16.msra.mxu1 %v5325_v63  ;;  %v5447_v63 = vld [vmem:[#allocation2 + $0x440] ss:$28 sps:$4 sm:$0xff]  }
 0x168   :  { %2660 = vmatprep.subr.bf16.mxu1 %v5335_v0  ;;  %v5373_v0 = vld [vmem:[#allocation2 + $0x1d0] ss:$28 sps:$4 sm:$0xff]  }
 0x169   :  { %2497 = vmatpush1.bf16.msra.mxu0 %v5304_v58  ;;  %v5372_v58 = vld [vmem:[#allocation2 + $0x19c] ss:$28 sps:$4 sm:$0xff]  }
 0x16a   :  { %2498 = vmatprep.subr.bf16.mxu0 %v5312_v61  ;;  %v5446_v61 = vld [vmem:[#allocation2 + $0x600] ss:$28 sps:$4 sm:$0xff]  }
 0x16b   :  { %2661 = vmatpush1.bf16.msra.mxu1 %v5333_v4  ;;  %v5452_v4 = vld [vmem:[#allocation2 + $0x478] ss:$28 sps:$4 sm:$0xff]  }
 0x16c   :  { %2662 = vmatprep.subr.bf16.mxu1 %v5338_v7  ;;  %v5376_v7 = vld [vmem:[#allocation2 + $0x208] ss:$28 sps:$4 sm:$0xff]  }
 0x16d   :  { %2499 = vmatpush1.bf16.msra.mxu0 %v5310_v62  ;;  %v5375_v62 = vld [vmem:[#allocation2 + $0x1d4] ss:$28 sps:$4 sm:$0xff]  }
 0x16e   :  { %2500 = vmatprep.subr.bf16.mxu0 %v5318_v2  ;;  %v5451_v2 = vld [vmem:[#allocation2 + $0x638] ss:$28 sps:$4 sm:$0xff]  }
 0x16f   :  { %2663 = vmatpush1.bf16.msra.mxu1 %v5336_v9  ;;  %v5381_v9 = vld [vmem:[#allocation2 + $0x244] ss:$28 sps:$4 sm:$0xff]  }
 0x170   :  { %2664 = vmatprep.subr.bf16.mxu1 %v5341_v12  ;;  %v5379_v12 = vld [vmem:[#allocation2 + $0x240] ss:$28 sps:$4 sm:$0xff]  }
 0x171   :  { %2501 = vmatpush1.bf16.msra.mxu0 %v5316_v3  ;;  %v5378_v3 = vld [vmem:[#allocation2 + $0x20c] ss:$28 sps:$4 sm:$0xff]  }
 0x172   :  { %2502 = vmatprep.subr.bf16.mxu0 %v5324_v8  ;;  %v5456_v8 = vld [vmem:[#allocation2 + $0x670] ss:$28 sps:$4 sm:$0xff]  }
 0x173   :  { %2665 = vmatpush1.bf16.msra.mxu1 %v5339_v16  ;;  %v5462_v16 = vld [vmem:[#allocation2 + $0x4e8] ss:$28 sps:$4 sm:$0xff]  }
 0x174   :  { %2666 = vmatprep.subr.bf16.mxu1 %v5348_v18  ;;  %v5466_v18 = vld [vmem:[#allocation2 + $0x6e0] ss:$28 sps:$4 sm:$0xff]  }
 0x175   :  { %2503 = vmatpush1.bf16.msra.mxu0 %v5322_v10  ;;  %v5457_v10 = vld [vmem:[#allocation2 + $0x4b0] ss:$28 sps:$4 sm:$0xff]  }
 0x176   :  { %2513 = vmatprep.subr.bf16.mxu0 %v5332_v13  ;;  %v5461_v13 = vld [vmem:[#allocation2 + $0x6a8] ss:$28 sps:$4 sm:$0xff]  }
 0x177   :  { %2667 = vmatpush1.bf16.msra.mxu1 %v5346_v19  ;;  %v5387_v19 = vld [vmem:[#allocation2 + $0x2b4] ss:$28 sps:$4 sm:$0xff]  }
 0x178   :  { %2505 = vmatmul.mubr.bf16.vlgmr.msra.gmra.mrb[0].mxu0 %v6227_v14  ;;  %4821 = vmatprep.subr.bf16.mxu1 %v5391_v21  ;;  %v5467_v21 = vld [vmem:[#allocation2 + $0x520] ss:$28 sps:$4 sm:$0xff]  }
 0x179   :  { %2514 = vmatpush1.bf16.msra.mxu0 %v5330_v15  ;;  %2545 = vmatprep.mubr.bf16.mxu0 %v5994_v20  ;;  %v5384_v15 = vld [vmem:[#allocation2 + $0x27c] ss:$28 sps:$4 sm:$0xff]  }
 0x17a   :  { %2677 = vmatprep.subr.bf16.mxu0 %v5345_v17  ;;  %2669 = vmatmul.mubr.bf16.vlgmr.msra.gmra.mrb[0].mxu1 %v6227_v14  ;;  %v5382_v17 = vld [vmem:[#allocation2 + $0x278] ss:$28 sps:$4 sm:$0xff]  }
 0x17b   :  { %4822 = vmatpush3.bf16.msra.mxu1 %v5392_v5  ;;  %2914 = vmatprep.mubr.bf16.mxu1 %v6189_v41  ;;  %v5385_v5 = vld [vmem:[#allocation2 + $0x2b0] ss:$28 sps:$4 sm:$0xff]  }
 0x17c   :  { %4823 = vmatprep.subr.bf16.mxu1 %v5396_v22  ;;  %v5471_v22 = vld [vmem:[#allocation2 + $0x8d8] ss:$28 sps:$4 sm:$0xff]  }
 0x17f   :  { %4824 = vmatpush3.bf16.msra.mxu1 %v5397_v26  ;;  %v5388_v26 = vld [vmem:[#allocation2 + $0x2e8] ss:$28 sps:$4 sm:$0xff]  }
 0x180   :  { %4825 = vmatprep.subr.bf16.mxu1 %v5401_v28  ;;  %v5395_v28 = vld [vmem:[#allocation2 + $0x324] ss:$28 sps:$4 sm:$0xff]  }
 0x183   :  { %4826 = vmatpush3.bf16.msra.mxu1 %v5402_v29  ;;  %v5477_v29 = vld [vmem:[#allocation2 + $0x750] ss:$28 sps:$4 sm:$0xff]  }
 0x184   :  { %4670 = vmatmul.mubr.msk.bf16.vlgmr.msra.gmra.mrb[0].mxu0 %vm2386_vm0, %v5342_v24  ;;  %4827 = vmatprep.subr.bf16.mxu1 %v5406_v30  ;;  %v5393_v30 = vld [vmem:[#allocation2 + $0x320] ss:$28 sps:$4 sm:$0xff]  }
 0x185   :  { %2678 = vmatpush1.bf16.msra.mxu0 %v5343_v25  ;;  %2709 = vmatprep.mubr.bf16.mxu0 %v5994_v20  ;;  %v5472_v25 = vld [vmem:[#allocation2 + $0x718] ss:$28 sps:$4 sm:$0xff]  }
 0x186   :  { %2718 = vmatprep.subr.bf16.mxu0 %v5351_v27  ;;  %v5476_v27 = vld [vmem:[#allocation2 + $0x910] ss:$28 sps:$4 sm:$0xff]  }
 0x187   :  { %4828 = vmatpush3.bf16.msra.mxu1 %v5407_v32  ;;  %v5400_v32 = vld [vmem:[#allocation2 + $0x35c] ss:$28 sps:$4 sm:$0xff]  }
 0x188   :  { %4829 = vmatprep.subr.bf16.mxu1 %v5411_v34  ;;  %v5398_v34 = vld [vmem:[#allocation2 + $0x358] ss:$28 sps:$4 sm:$0xff]  }
 0x18b   :  { %4830 = vmatpush3.bf16.msra.mxu1 %v5412_v36  ;;  %v5405_v36 = vld [vmem:[#allocation2 + $0x394] ss:$28 sps:$4 sm:$0xff]  }
 0x18c   :  { %4671 = vmatmul.mubr.msk.bf16.vlgmr.msra.gmra.mrb[4].mxu0 %vm2386_vm0, %v5342_v24  ;;  %4831 = vmatprep.subr.bf16.mxu1 %v5416_v37  ;;  %v5390_v24 = vld [vmem:[#allocation2 + $0x2ec] ss:$28 sps:$4 sm:$0xff]   ;;  %v5487_v37 = vld [vmem:[#allocation2 + $0x7c0] ss:$28 sps:$4 sm:$0xff]  }
 0x18d   :  { %2719 = vmatpush1.bf16.msra.mxu0 %v5349_v31  ;;  %2750 = vmatprep.mubr.bf16.mxu0 %v6189_v41  ;;  %v5363_v41 = vld [vmem:[#allocation2 + $0xf4] ss:$28 sps:$4 sm:$0xff]   ;;  %v5481_v31 = vld [vmem:[#allocation2 + $0x948] ss:$28 sps:$4 sm:$0xff]  }
 0x18e   :  { %2720 = vmatprep.subr.bf16.mxu0 %v5354_v33  ;;  %v5482_v33 = vld [vmem:[#allocation2 + $0x788] ss:$28 sps:$4 sm:$0xff]  }
 0x18f   :  { %4832 = vmatpush3.bf16.msra.mxu1 %v5417_v40  ;;  %v5491_v40 = vld [vmem:[#allocation2 + $0x9b8] ss:$28 sps:$4 sm:$0xff]  }
 0x190   :  { %4833 = vmatprep.subr.bf16.mxu1 %v5421_v42  ;;  %v5492_v42 = vld [vmem:[#allocation2 + $0x7f8] ss:$28 sps:$4 sm:$0xff]  }
 0x191   :  { %2721 = vmatpush1.bf16.msra.mxu0 %v5352_v35  ;;  %v5486_v35 = vld [vmem:[#allocation2 + $0x980] ss:$28 sps:$4 sm:$0xff]  }
 0x192   :  { %2722 = vmatprep.subr.bf16.mxu0 %v5357_v38  ;;  %v5403_v38 = vld [vmem:[#allocation2 + $0x390] ss:$28 sps:$4 sm:$0xff]  }
 0x193   :  { %4834 = vmatpush3.bf16.msra.mxu1 %v5422_v45  ;;  %v5415_v45 = vld [vmem:[#allocation2 + $0x404] ss:$28 sps:$4 sm:$0xff]  }
 0x194   :  { %4835 = vmatprep.subr.bf16.mxu1 %v5426_v46  ;;  %v5497_v46 = vld [vmem:[#allocation2 + $0x830] ss:$28 sps:$4 sm:$0xff]  }
 0x195   :  { %2723 = vmatpush1.bf16.msra.mxu0 %v5355_v39  ;;  %v5410_v39 = vld [vmem:[#allocation2 + $0x3cc] ss:$28 sps:$4 sm:$0xff]  }
 0x196   :  { %2724 = vmatprep.subr.bf16.mxu0 %v5360_v43  ;;  %v5408_v43 = vld [vmem:[#allocation2 + $0x3c8] ss:$28 sps:$4 sm:$0xff]  }
 0x197   :  { %4836 = vmatpush3.bf16.msra.mxu1 %v5427_v47  ;;  %v5501_v47 = vld [vmem:[#allocation2 + $0xa28] ss:$28 sps:$4 sm:$0xff]  }
 0x198   :  { %4843 = vmatprep.subr.bf16.mxu1 %v5431_v49  ;;  %v5502_v49 = vld [vmem:[#allocation2 + $0x868] ss:$28 sps:$4 sm:$0xff]  }
 0x199   :  { %2725 = vmatpush1.bf16.msra.mxu0 %v5358_v44  ;;  %v5496_v44 = vld [vmem:[#allocation2 + $0x9f0] ss:$28 sps:$4 sm:$0xff]  }
 0x19a   :  { %2726 = vmatprep.subr.bf16.mxu0 %v5363_v41  ;;  %2915 = vmatmul.mubr.bf16.vlgmr.msra.gmra.mrb[4].mxu1 %v6193_v1  ;;  %v5413_v41 = vld [vmem:[#allocation2 + $0x400] ss:$28 sps:$4 sm:$0xff]  }
 0x19b   :  { %4844 = vmatpush3.bf16.msra.mxu1 %v5432_v51  ;;  %2954 = vmatprep.mubr.bf16.mxu1 %v6204_v23  ;;  %v5425_v51 = vld [vmem:[#allocation2 + $0x474] ss:$28 sps:$4 sm:$0xff]  }
 0x19c   :  { %4845 = vmatprep.subr.bf16.mxu1 %v5436_v53  ;;  %v5513_v53 = vld [vmem:[#allocation6 + $0x4] ss:$8 sps:$4 sm:$0xff]  }
 0x19d   :  { %2727 = vmatpush1.bf16.msra.mxu0 %v5361_v48  ;;  %v5420_v48 = vld [vmem:[#allocation2 + $0x43c] ss:$28 sps:$4 sm:$0xff]  }
 0x19e   :  { %2728 = vmatprep.subr.bf16.mxu0 %v5366_v50  ;;  %v5506_v50 = vld [vmem:[#allocation2 + $0xa60] ss:$28 sps:$4 sm:$0xff]  }
 0x19f   :  { %4846 = vmatpush3.bf16.msra.mxu1 %v5437_v55  ;;  %v5428_v55 = vld [vmem:[#allocation2 + $0x4a8] ss:$28 sps:$4 sm:$0xff]  }
 0x1a0   :  { %4847 = vmatprep.subr.bf16.mxu1 %v5441_v57  ;;  %v5519_v57 = vld [vmem:[#allocation6 + $0x14] ss:$8 sps:$4 sm:$0xff]  }
 0x1a1   :  { %2729 = vmatpush1.bf16.msra.mxu0 %v5364_v52  ;;  %v5423_v52 = vld [vmem:[#allocation2 + $0x470] ss:$28 sps:$4 sm:$0xff]  }
 0x1a2   :  { %2730 = vmatprep.subr.bf16.mxu0 %v5369_v54  ;;  %v5430_v54 = vld [vmem:[#allocation2 + $0x4ac] ss:$28 sps:$4 sm:$0xff]  }
 0x1a3   :  { %4848 = vmatpush3.bf16.msra.mxu1 %v5442_v59  ;;  %v5517_v59 = vld [vmem:[#allocation6 + $0x10] ss:$8 sps:$4 sm:$0xff]  }
 0x1a4   :  { %4849 = vmatprep.subr.bf16.mxu1 %v5446_v61  ;;  %v5525_v61 = vld [vmem:[#allocation6 + $0x24] ss:$8 sps:$4 sm:$0xff]  }
 0x1a5   :  { %2731 = vmatpush1.bf16.msra.mxu0 %v5367_v56  ;;  %v5511_v56 = vld [vmem:[#allocation6] ss:$8 sps:$4 sm:$0xff]  }
 0x1a6   :  { %2732 = vmatprep.subr.bf16.mxu0 %v5372_v58  ;;  %v5435_v58 = vld [vmem:[#allocation2 + $0x4e4] ss:$28 sps:$4 sm:$0xff]  }
 0x1a7   :  { %4850 = vmatpush3.bf16.msra.mxu1 %v5447_v63  ;;  %v5438_v63 = vld [vmem:[#allocation2 + $0x518] ss:$28 sps:$4 sm:$0xff]  }
 0x1a8   :  { %4851 = vmatprep.subr.bf16.mxu1 %v5451_v2  ;;  %v5445_v2 = vld [vmem:[#allocation2 + $0x554] ss:$28 sps:$4 sm:$0xff]  }
 0x1a9   :  { %2733 = vmatpush1.bf16.msra.mxu0 %v5370_v60  ;;  %v5433_v60 = vld [vmem:[#allocation2 + $0x4e0] ss:$28 sps:$4 sm:$0xff]  }
 0x1aa   :  { %2734 = vmatprep.subr.bf16.mxu0 %v5375_v62  ;;  %v5440_v62 = vld [vmem:[#allocation2 + $0x51c] ss:$28 sps:$4 sm:$0xff]  }
 0x1ab   :  { %4852 = vmatpush3.bf16.msra.mxu1 %v5452_v4  ;;  %v5529_v4 = vld [vmem:[#allocation6 + $0x30] ss:$8 sps:$4 sm:$0xff]  }
 0x1ac   :  { %4853 = vmatprep.subr.bf16.mxu1 %v5456_v8  ;;  %v5450_v8 = vld [vmem:[#allocation2 + $0x58c] ss:$28 sps:$4 sm:$0xff]  }
 0x1ad   :  { %2735 = vmatpush1.bf16.msra.mxu0 %v5373_v0  ;;  %v5523_v0 = vld [vmem:[#allocation6 + $0x20] ss:$8 sps:$4 sm:$0xff]  }
 0x1ae   :  { %2736 = vmatprep.subr.bf16.mxu0 %v5378_v3  ;;  %v5531_v3 = vld [vmem:[#allocation6 + $0x34] ss:$8 sps:$4 sm:$0xff]  }
 0x1af   :  { %4854 = vmatpush3.bf16.msra.mxu1 %v5457_v10  ;;  %v5535_v10 = vld [vmem:[#allocation6 + $0x40] ss:$8 sps:$4 sm:$0xff]  }
 0x1b0   :  { %4855 = vmatprep.subr.bf16.mxu1 %v5461_v13  ;;  %v5455_v13 = vld [vmem:[#allocation2 + $0x5c4] ss:$28 sps:$4 sm:$0xff]  }
 0x1b1   :  { %2737 = vmatpush1.bf16.msra.mxu0 %v5376_v7  ;;  %v5443_v7 = vld [vmem:[#allocation2 + $0x550] ss:$28 sps:$4 sm:$0xff]  }
 0x1b2   :  { %2738 = vmatprep.subr.bf16.mxu0 %v5381_v9  ;;  %v5537_v9 = vld [vmem:[#allocation6 + $0x44] ss:$8 sps:$4 sm:$0xff]  }
 0x1b3   :  { %4856 = vmatpush3.bf16.msra.mxu1 %v5462_v16  ;;  %v5541_v16 = vld [vmem:[#allocation6 + $0x50] ss:$8 sps:$4 sm:$0xff]  }
 0x1b4   :  { %4857 = vmatprep.subr.bf16.mxu1 %v5466_v18  ;;  %v5460_v18 = vld [vmem:[#allocation2 + $0x5fc] ss:$28 sps:$4 sm:$0xff]  }
 0x1b5   :  { %2739 = vmatpush1.bf16.msra.mxu0 %v5379_v12  ;;  %v5448_v12 = vld [vmem:[#allocation2 + $0x588] ss:$28 sps:$4 sm:$0xff]  }
 0x1b6   :  { %2740 = vmatprep.subr.bf16.mxu0 %v5384_v15  ;;  %v5543_v15 = vld [vmem:[#allocation6 + $0x54] ss:$8 sps:$4 sm:$0xff]  }
 0x1b7   :  { %4858 = vmatpush3.bf16.msra.mxu1 %v5467_v21  ;;  %v5547_v21 = vld [vmem:[#allocation6 + $0x60] ss:$8 sps:$4 sm:$0xff]  }
 0x1b8   :  { %4865 = vmatprep.subr.bf16.mxu1 %v5471_v22  ;;  %v5465_v22 = vld [vmem:[#allocation2 + $0x634] ss:$28 sps:$4 sm:$0xff]  }
 0x1b9   :  { %2741 = vmatpush1.bf16.msra.mxu0 %v5382_v17  ;;  %v5453_v17 = vld [vmem:[#allocation2 + $0x5c0] ss:$28 sps:$4 sm:$0xff]  }
 0x1ba   :  { %2742 = vmatprep.subr.bf16.mxu0 %v5387_v19  ;;  %2955 = vmatmul.mubr.bf16.vlgmr.msra.gmra.mrb[8].mxu1 %v6215_v6  ;;  %v5549_v19 = vld [vmem:[#allocation6 + $0x64] ss:$8 sps:$4 sm:$0xff]  }
 0x1bb   :  { %4866 = vmatpush3.bf16.msra.mxu1 %v5472_v25  ;;  %2994 = vmatprep.mubr.bf16.mxu1 %v6219_v11  ;;  %v5553_v25 = vld [vmem:[#allocation6 + $0x70] ss:$8 sps:$4 sm:$0xff]  }
 0x1bc   :  { %4867 = vmatprep.subr.bf16.mxu1 %v5476_v27  ;;  %v5561_v27 = vld [vmem:[#allocation6 + $0x84] ss:$8 sps:$4 sm:$0xff]  }
 0x1bd   :  { %2743 = vmatpush1.bf16.msra.mxu0 %v5385_v5  ;;  %v5458_v5 = vld [vmem:[#allocation2 + $0x5f8] ss:$28 sps:$4 sm:$0xff]  }
 0x1be   :  { %2744 = vmatprep.subr.bf16.mxu0 %v5390_v24  ;;  %v5555_v24 = vld [vmem:[#allocation6 + $0x74] ss:$8 sps:$4 sm:$0xff]  }
 0x1bf   :  { %4868 = vmatpush3.bf16.msra.mxu1 %v5477_v29  ;;  %v5559_v29 = vld [vmem:[#allocation6 + $0x80] ss:$8 sps:$4 sm:$0xff]  }
 0x1c0   :  { %4869 = vmatprep.subr.bf16.mxu1 %v5481_v31  ;;  %v5567_v31 = vld [vmem:[#allocation6 + $0x94] ss:$8 sps:$4 sm:$0xff]  }
 0x1c1   :  { %2745 = vmatpush1.bf16.msra.mxu0 %v5388_v26  ;;  %v5463_v26 = vld [vmem:[#allocation2 + $0x630] ss:$28 sps:$4 sm:$0xff]  }
 0x1c2   :  { %2746 = vmatprep.subr.bf16.mxu0 %v5395_v28  ;;  %v5470_v28 = vld [vmem:[#allocation2 + $0x66c] ss:$28 sps:$4 sm:$0xff]  }
 0x1c3   :  { %4870 = vmatpush3.bf16.msra.mxu1 %v5482_v33  ;;  %v5565_v33 = vld [vmem:[#allocation6 + $0x90] ss:$8 sps:$4 sm:$0xff]  }
 0x1c4   :  { %4871 = vmatprep.subr.bf16.mxu1 %v5486_v35  ;;  %v5573_v35 = vld [vmem:[#allocation6 + $0xa4] ss:$8 sps:$4 sm:$0xff]  }
 0x1c5   :  { %2747 = vmatpush1.bf16.msra.mxu0 %v5393_v30  ;;  %v5468_v30 = vld [vmem:[#allocation2 + $0x668] ss:$28 sps:$4 sm:$0xff]  }
 0x1c6   :  { %2748 = vmatprep.subr.bf16.mxu0 %v5400_v32  ;;  %v5475_v32 = vld [vmem:[#allocation2 + $0x6a4] ss:$28 sps:$4 sm:$0xff]  }
 0x1c7   :  { %4872 = vmatpush3.bf16.msra.mxu1 %v5487_v37  ;;  %v5571_v37 = vld [vmem:[#allocation6 + $0xa0] ss:$8 sps:$4 sm:$0xff]  }
 0x1c8   :  { %4873 = vmatprep.subr.bf16.mxu1 %v5491_v40  ;;  %v5485_v40 = vld [vmem:[#allocation2 + $0x714] ss:$28 sps:$4 sm:$0xff]  }
 0x1c9   :  { %2749 = vmatpush1.bf16.msra.mxu0 %v5398_v34  ;;  %v5473_v34 = vld [vmem:[#allocation2 + $0x6a0] ss:$28 sps:$4 sm:$0xff]  }
 0x1ca   :  { %2759 = vmatprep.subr.bf16.mxu0 %v5405_v36  ;;  %v5480_v36 = vld [vmem:[#allocation2 + $0x6dc] ss:$28 sps:$4 sm:$0xff]  }
 0x1cb   :  { %4874 = vmatpush3.bf16.msra.mxu1 %v5492_v42  ;;  %v5577_v42 = vld [vmem:[#allocation6 + $0xb0] ss:$8 sps:$4 sm:$0xff]  }
 0x1cc   :  { %2751 = vmatmul.mubr.bf16.vlgmr.msra.gmra.mrb[8].mxu0 %v6193_v1  ;;  %4875 = vmatprep.subr.bf16.mxu1 %v5496_v44  ;;  %v5418_v1 = vld [vmem:[#allocation2 + $0x438] ss:$28 sps:$4 sm:$0xff]   ;;  %v5490_v44 = vld [vmem:[#allocation2 + $0x74c] ss:$28 sps:$4 sm:$0xff]  }
 0x1cd   :  { %2760 = vmatpush1.bf16.msra.mxu0 %v5403_v38  ;;  %2791 = vmatprep.mubr.bf16.mxu0 %v6204_v23  ;;  %v5507_v23 = vld [vmem:[#allocation2 + $0x8a0] ss:$28 sps:$4 sm:$0xff]   ;;  %v5478_v38 = vld [vmem:[#allocation2 + $0x6d8] ss:$28 sps:$4 sm:$0xff]  }
 0x1ce   :  { %2761 = vmatprep.subr.bf16.mxu0 %v5410_v39  ;;  %v5579_v39 = vld [vmem:[#allocation6 + $0xb4] ss:$8 sps:$4 sm:$0xff]  }
 0x1cf   :  { %4876 = vmatpush3.bf16.msra.mxu1 %v5497_v46  ;;  %v5580_v46 = vld [vmem:[#allocation6 + $0xc0] ss:$8 sps:$4 sm:$0xff]  }
 0x1d0   :  { %4877 = vmatprep.subr.bf16.mxu1 %v5501_v47  ;;  %v5585_v47 = vld [vmem:[#allocation6 + $0xd4] ss:$8 sps:$4 sm:$0xff]  }
 0x1d1   :  { %2762 = vmatpush1.bf16.msra.mxu0 %v5408_v43  ;;  %v5483_v43 = vld [vmem:[#allocation2 + $0x710] ss:$28 sps:$4 sm:$0xff]  }
 0x1d2   :  { %2763 = vmatprep.subr.bf16.mxu0 %v5415_v45  ;;  %v5582_v45 = vld [vmem:[#allocation6 + $0xc4] ss:$8 sps:$4 sm:$0xff]  }
 0x1d3   :  { %4878 = vmatpush3.bf16.msra.mxu1 %v5502_v49  ;;  %v5583_v49 = vld [vmem:[#allocation6 + $0xd0] ss:$8 sps:$4 sm:$0xff]  }
 0x1d4   :  { %4879 = vmatprep.subr.bf16.mxu1 %v5506_v50  ;;  %v5588_v50 = vld [vmem:[#allocation6 + $0xe4] ss:$8 sps:$4 sm:$0xff]  }
 0x1d5   :  { %2764 = vmatpush1.bf16.msra.mxu0 %v5413_v41  ;;  %v5488_v41 = vld [vmem:[#allocation2 + $0x748] ss:$28 sps:$4 sm:$0xff]  }
 0x1d6   :  { %2765 = vmatprep.subr.bf16.mxu0 %v5420_v48  ;;  %v5495_v48 = vld [vmem:[#allocation2 + $0x784] ss:$28 sps:$4 sm:$0xff]  }
 0x1d7   :  { %4880 = vmatpush3.bf16.msra.mxu1 %v5507_v23  ;;  %v5498_v23 = vld [vmem:[#allocation2 + $0x7b8] ss:$28 sps:$4 sm:$0xff]  }
 0x1d8   :  { %3740 = vmatprep.subr.bf16.mxu1 %v5513_v53  ;;  %v5589_v53 = vld [vmem:[#allocation6 + $0xf0] ss:$8 sps:$4 sm:$0xff]  }
 0x1d9   :  { %2766 = vmatpush1.bf16.msra.mxu0 %v5418_v1  ;;  %v5493_v1 = vld [vmem:[#allocation2 + $0x780] ss:$28 sps:$4 sm:$0xff]  }
 0x1da   :  { %2767 = vmatprep.subr.bf16.mxu0 %v5425_v51  ;;  %2995 = vmatmul.mubr.bf16.vlgmr.msra.gmra.mrb[12].mxu1 %v6227_v14  ;;  %v5500_v51 = vld [vmem:[#allocation2 + $0x7bc] ss:$28 sps:$4 sm:$0xff]  }
 0x1db   :  { %3741 = vmatpush1.bf16.msra.mxu1 %v5511_v56  ;;  %v5510_v56 = vld [vmem:[#allocation2 + $0x82c] ss:$28 sps:$4 sm:$0xff]  }
 0x1dc   :  { %3742 = vmatprep.subr.bf16.mxu1 %v5519_v57  ;;  %v5508_v57 = vld [vmem:[#allocation2 + $0x828] ss:$28 sps:$4 sm:$0xff]  }
 0x1dd   :  { %2768 = vmatpush1.bf16.msra.mxu0 %v5423_v52  ;;  %v5591_v52 = vld [vmem:[#allocation6 + $0xf4] ss:$8 sps:$4 sm:$0xff]  }
 0x1de   :  { %2769 = vmatprep.subr.bf16.mxu0 %v5430_v54  ;;  %v5503_v54 = vld [vmem:[#allocation2 + $0x7f0] ss:$28 sps:$4 sm:$0xff]  }
 0x1df   :  { %3743 = vmatpush1.bf16.msra.mxu1 %v5517_v59  ;;  %v5514_v59 = vld [vmem:[#allocation2 + $0x860] ss:$28 sps:$4 sm:$0xff]  }
 0x1e0   :  { %3744 = vmatprep.subr.bf16.mxu1 %v5525_v61  ;;  %v5520_v61 = vld [vmem:[#allocation2 + $0x898] ss:$28 sps:$4 sm:$0xff]  }
 0x1e1   :  { %2770 = vmatpush1.bf16.msra.mxu0 %v5428_v55  ;;  %v5595_v55 = vld [vmem:[#allocation6 + $0x104] ss:$8 sps:$4 sm:$0xff]  }
 0x1e2   :  { %2771 = vmatprep.subr.bf16.mxu0 %v5435_v58  ;;  %v5516_v58 = vld [vmem:[#allocation2 + $0x864] ss:$28 sps:$4 sm:$0xff]  }
 0x1e3   :  { %3745 = vmatpush1.bf16.msra.mxu1 %v5523_v0  ;;  %v5534_v0 = vld [vmem:[#allocation2 + $0x90c] ss:$28 sps:$4 sm:$0xff]  }
 0x1e4   :  { %3746 = vmatprep.subr.bf16.mxu1 %v5531_v3  ;;  %v5540_v3 = vld [vmem:[#allocation2 + $0x944] ss:$28 sps:$4 sm:$0xff]  }
 0x1e5   :  { %2772 = vmatpush1.bf16.msra.mxu0 %v5433_v60  ;;  %v5522_v60 = vld [vmem:[#allocation2 + $0x89c] ss:$28 sps:$4 sm:$0xff]  }
 0x1e6   :  { %2773 = vmatprep.subr.bf16.mxu0 %v5440_v62  ;;  %v5528_v62 = vld [vmem:[#allocation2 + $0x8d4] ss:$28 sps:$4 sm:$0xff]  }
 0x1e7   :  { %3747 = vmatpush1.bf16.msra.mxu1 %v5529_v4  ;;  %v5538_v4 = vld [vmem:[#allocation2 + $0x940] ss:$28 sps:$4 sm:$0xff]  }
 0x1e8   :  { %3748 = vmatprep.subr.bf16.mxu1 %v5537_v9  ;;  %v5552_v9 = vld [vmem:[#allocation2 + $0x9b4] ss:$28 sps:$4 sm:$0xff]  }
 0x1e9   :  { %2774 = vmatpush1.bf16.msra.mxu0 %v5438_v63  ;;  %v5526_v63 = vld [vmem:[#allocation2 + $0x8d0] ss:$28 sps:$4 sm:$0xff]  }
 0x1ea   :  { %2775 = vmatprep.subr.bf16.mxu0 %v5445_v2  ;;  %v5532_v2 = vld [vmem:[#allocation2 + $0x908] ss:$28 sps:$4 sm:$0xff]  }
 0x1eb   :  { %3749 = vmatpush1.bf16.msra.mxu1 %v5535_v10  ;;  %v5550_v10 = vld [vmem:[#allocation2 + $0x9b0] ss:$28 sps:$4 sm:$0xff]  }
 0x1ec   :  { %3750 = vmatprep.subr.bf16.mxu1 %v5543_v15  ;;  %v5564_v15 = vld [vmem:[#allocation2 + $0xa24] ss:$28 sps:$4 sm:$0xff]  }
 0x1ed   :  { %2776 = vmatpush1.bf16.msra.mxu0 %v5443_v7  ;;  %v5546_v7 = vld [vmem:[#allocation2 + $0x97c] ss:$28 sps:$4 sm:$0xff]  }
 0x1ee   :  { %2777 = vmatprep.subr.bf16.mxu0 %v5450_v8  ;;  %v5544_v8 = vld [vmem:[#allocation2 + $0x978] ss:$28 sps:$4 sm:$0xff]  }
 0x1ef   :  { %3751 = vmatpush1.bf16.msra.mxu1 %v5541_v16  ;;  %v5562_v16 = vld [vmem:[#allocation2 + $0xa20] ss:$28 sps:$4 sm:$0xff]  }
 0x1f0   :  { %3752 = vmatprep.subr.bf16.mxu1 %v5549_v19  ;;  %v5576_v19 = vld [vmem:[#allocation2 + $0xa94] ss:$28 sps:$4 sm:$0xff]  }
 0x1f1   :  { %2778 = vmatpush1.bf16.msra.mxu0 %v5448_v12  ;;  %v5558_v12 = vld [vmem:[#allocation2 + $0x9ec] ss:$28 sps:$4 sm:$0xff]  }
 0x1f2   :  { %2779 = vmatprep.subr.bf16.mxu0 %v5455_v13  ;;  %v5556_v13 = vld [vmem:[#allocation2 + $0x9e8] ss:$28 sps:$4 sm:$0xff]  }
 0x1f3   :  { %3753 = vmatpush1.bf16.msra.mxu1 %v5547_v21  ;;  %v563_v21 = vlaneseq }
 0x1f4   :  { %3754 = vmatprep.subr.bf16.mxu1 %v5555_v24  ;;  %v5995_v24 = vmov 0.0  }
 0x1f5   :  { %2780 = vmatpush1.bf16.msra.mxu0 %v5453_v17  ;;  %v5570_v17 = vld [vmem:[#allocation2 + $0xa5c] ss:$28 sps:$4 sm:$0xff]  }
 0x1f6   :  { %2781 = vmatprep.subr.bf16.mxu0 %v5460_v18  ;;  %v5568_v18 = vld [vmem:[#allocation2 + $0xa58] ss:$28 sps:$4 sm:$0xff]  }
 0x1f7   :  { %3755 = vmatpush1.bf16.msra.mxu1 %v5553_v25 }
 0x1f8   :  { %3756 = vmatprep.subr.bf16.mxu1 %v5561_v27 }
 0x1f9   :  { %2782 = vmatpush1.bf16.msra.mxu0 %v5458_v5  ;;  %v5574_v5 = vld [vmem:[#allocation2 + $0xa90] ss:$28 sps:$4 sm:$0xff]  }
 0x1fa   :  { %2783 = vmatprep.subr.bf16.mxu0 %v5465_v22  ;;  %v6250_v22 = vshrl.u32 %v563_v21, 7  ;;  %v5625_v21 = vld [vmem:[#allocation6 + $0x1a4] ss:$8 sps:$4 sm:$0xff]  }
 0x1fb   :  { %3757 = vmatpush1.bf16.msra.mxu1 %v5559_v29 }
 0x1fc   :  { %3758 = vmatprep.subr.bf16.mxu1 %v5567_v31  ;;  %v565_v25 = vsub.s32 0, %v6250_v22  ;;  %v569_v27 = vsub.s32 1, %v6250_v22 }
 0x1fd   :  { %2784 = vmatpush1.bf16.msra.mxu0 %v5463_v26  ;;  %v6255_v26 = vld [vmem:[#allocation4] sm:$0xff] }
 0x1fe   :  { %2785 = vmatprep.subr.bf16.mxu0 %v5470_v28 }
 0x1ff   :  { %3759 = vmatpush1.bf16.msra.mxu1 %v5565_v33  ;;  %v5592_v33 = vld [vmem:[#allocation2 + $0xa98] ss:$28 sps:$4 sm:$0xff]  }
 0x200   :  { %3760 = vmatprep.subr.bf16.mxu1 %v5573_v35 }
 0x201   :  { %2786 = vmatpush1.bf16.msra.mxu0 %v5468_v30  ;;  %v573_v30 = vsub.s32 2, %v6250_v22 }
 0x202   :  { %2787 = vmatprep.subr.bf16.mxu0 %v5475_v32  ;;  %v570_v32 = vrot.slane %v6255_v26, %v569_v27 }
 0x203   :  { %3761 = vmatpush1.bf16.msra.mxu1 %v5571_v37 }
 0x204   :  { %3762 = vmatprep.subr.bf16.mxu1 %v5579_v39 }
 0x205   :  { %2788 = vmatpush1.bf16.msra.mxu0 %v5473_v34  ;;  %v577_v34 = vsub.s32 3, %v6250_v22 }
 0x206   :  { %2789 = vmatprep.subr.bf16.mxu0 %v5480_v36 }
 0x207   :  { %3763 = vmatpush1.bf16.msra.mxu1 %v5577_v42 }
 0x208   :  { %3764 = vmatprep.subr.bf16.mxu1 %v5582_v45 }
 0x209   :  { %2790 = vmatpush1.bf16.msra.mxu0 %v5478_v38  ;;  %v5745_v38 = vld [vmem:[%s6315_s0 + $0x18] ss:$0 sps:$4 sm:$0xff]  }
 0x20a   :  { %2800 = vmatprep.subr.bf16.mxu0 %v5485_v40  ;;  %v574_v40 = vrot.slane %v6255_v26, %v573_v30  ;;  %v589_v30 = vsub.s32 6, %v6250_v22 }
 0x20b   :  { %3765 = vmatpush1.bf16.msra.mxu1 %v5580_v46 }
 0x20c   :  { %2792 = vmatmul.mubr.bf16.vlgmr.msra.gmra.mrb[8].mxu0 %v6215_v6  ;;  %3766 = vmatprep.subr.bf16.mxu1 %v5585_v47  ;;  %v5586_v6 = vld [vmem:[#allocation6 + $0xe0] ss:$8 sps:$4 sm:$0xff]  }
 0x20d   :  { %2801 = vmatpush1.bf16.msra.mxu0 %v5483_v43  ;;  %2832 = vmatprep.mubr.bf16.mxu0 %v6219_v11  ;;  %v5505_v11 = vld [vmem:[#allocation2 + $0x7f4] ss:$28 sps:$4 sm:$0xff]  }
 0x20e   :  { %2802 = vmatprep.subr.bf16.mxu0 %v5490_v44  ;;  %v578_v44 = vrot.slane %v6255_v26, %v577_v34  ;;  %v5632_v34 = vld [vmem:[#allocation6 + $0x1d0] ss:$8 sps:$4 sm:$0xff]  }
 0x20f   :  { %3767 = vmatpush1.bf16.msra.mxu1 %v5583_v49 }
 0x210   :  { %3768 = vmatprep.subr.bf16.mxu1 %v5588_v50 }
 0x211   :  { %2803 = vmatpush1.bf16.msra.mxu0 %v5488_v41 }
 0x212   :  { %2804 = vmatprep.subr.bf16.mxu0 %v5495_v48 }
 0x213   :  { %3769 = vmatpush1.bf16.msra.mxu1 %v5586_v6 }
 0x214   :  { %3770 = vmatprep.subr.bf16.mxu1 %v5591_v52 }
 0x215   :  { %2805 = vmatpush1.bf16.msra.mxu0 %v5493_v1  ;;  %v5593_v1 = vld [vmem:[#allocation6 + $0x100] ss:$8 sps:$4 sm:$0xff]  }
 0x216   :  { %2806 = vmatprep.subr.bf16.mxu0 %v5500_v51  ;;  %v5598_v51 = vld [vmem:[#allocation6 + $0x114] ss:$8 sps:$4 sm:$0xff]  }
 0x217   :  { %3771 = vmatpush1.bf16.msra.mxu1 %v5589_v53 }
 0x218   :  { %3781 = vmatprep.subr.bf16.mxu1 %v5595_v55 }
 0x219   :  { %2807 = vmatpush1.bf16.msra.mxu0 %v5498_v23 }
 0x21a   :  { %2808 = vmatprep.subr.bf16.mxu0 %v5505_v11 }
 0x21d   :  { %2809 = vmatpush1.bf16.msra.mxu0 %v5503_v54  ;;  %v5596_v54 = vld [vmem:[#allocation6 + $0x110] ss:$8 sps:$4 sm:$0xff]  }
 0x21e   :  { %2810 = vmatprep.subr.bf16.mxu0 %v5510_v56  ;;  %v5601_v56 = vld [vmem:[#allocation6 + $0x124] ss:$8 sps:$4 sm:$0xff]  }
 0x221   :  { %2811 = vmatpush1.bf16.msra.mxu0 %v5508_v57 }
 0x222   :  { %2812 = vmatprep.subr.bf16.mxu0 %v5516_v58 }
 0x225   :  { %2813 = vmatpush1.bf16.msra.mxu0 %v5514_v59  ;;  %v5599_v59 = vld [vmem:[#allocation6 + $0x120] ss:$8 sps:$4 sm:$0xff]  }
 0x226   :  { %2814 = vmatprep.subr.bf16.mxu0 %v5522_v60  ;;  %v5604_v60 = vld [vmem:[#allocation6 + $0x134] ss:$8 sps:$4 sm:$0xff]  }
 0x229   :  { %2815 = vmatpush1.bf16.msra.mxu0 %v5520_v61  ;;  %v5602_v61 = vld [vmem:[#allocation6 + $0x130] ss:$8 sps:$4 sm:$0xff]  }
 0x22a   :  { %2816 = vmatprep.subr.bf16.mxu0 %v5528_v62  ;;  %v5607_v62 = vld [vmem:[#allocation6 + $0x144] ss:$8 sps:$4 sm:$0xff]  }
 0x22d   :  { %2817 = vmatpush1.bf16.msra.mxu0 %v5526_v63  ;;  %v5605_v63 = vld [vmem:[#allocation6 + $0x140] ss:$8 sps:$4 sm:$0xff]  }
 0x22e   :  { %2818 = vmatprep.subr.bf16.mxu0 %v5534_v0  ;;  %v5610_v0 = vld [vmem:[#allocation6 + $0x154] ss:$8 sps:$4 sm:$0xff]  }
 0x231   :  { %2819 = vmatpush1.bf16.msra.mxu0 %v5532_v2  ;;  %v5608_v2 = vld [vmem:[#allocation6 + $0x150] ss:$8 sps:$4 sm:$0xff]  }
 0x232   :  { %2820 = vmatprep.subr.bf16.mxu0 %v5540_v3  ;;  %v5613_v3 = vld [vmem:[#allocation6 + $0x164] ss:$8 sps:$4 sm:$0xff]  }
 0x235   :  { %2821 = vmatpush1.bf16.msra.mxu0 %v5538_v4 }
 0x236   :  { %2822 = vmatprep.subr.bf16.mxu0 %v5546_v7 }
 0x239   :  { %2823 = vmatpush1.bf16.msra.mxu0 %v5544_v8 }
 0x23a   :  { %2824 = vmatprep.subr.bf16.mxu0 %v5552_v9 }
 0x23d   :  { %2825 = vmatpush1.bf16.msra.mxu0 %v5550_v10  ;;  %v5611_v10 = vld [vmem:[#allocation6 + $0x160] ss:$8 sps:$4 sm:$0xff]  }
 0x23e   :  { %2826 = vmatprep.subr.bf16.mxu0 %v5558_v12 }
 0x241   :  { %2827 = vmatpush1.bf16.msra.mxu0 %v5556_v13  ;;  %v5616_v13 = vld [vmem:[#allocation6 + $0x174] ss:$8 sps:$4 sm:$0xff]  }
 0x242   :  { %2828 = vmatprep.subr.bf16.mxu0 %v5564_v15  ;;  %v5614_v15 = vld [vmem:[#allocation6 + $0x170] ss:$8 sps:$4 sm:$0xff]  }
 0x245   :  { %2829 = vmatpush1.bf16.msra.mxu0 %v5562_v16  ;;  %v5619_v16 = vld [vmem:[#allocation6 + $0x184] ss:$8 sps:$4 sm:$0xff]  }
 0x246   :  { %2830 = vmatprep.subr.bf16.mxu0 %v5570_v17  ;;  %v5617_v17 = vld [vmem:[#allocation6 + $0x180] ss:$8 sps:$4 sm:$0xff]  }
 0x249   :  { %2831 = vmatpush1.bf16.msra.mxu0 %v5568_v18  ;;  %v5622_v18 = vld [vmem:[#allocation6 + $0x194] ss:$8 sps:$4 sm:$0xff]  }
 0x24a   :  { %2841 = vmatprep.subr.bf16.mxu0 %v5576_v19  ;;  %v5620_v19 = vld [vmem:[#allocation6 + $0x190] ss:$8 sps:$4 sm:$0xff]  }
 0x24c   :  { %2833 = vmatmul.mubr.bf16.vlgmr.msra.gmra.mrb[8].mxu0 %v6227_v14  ;;  %v566_v14 = vrot.slane %v6255_v26, %v565_v25 }
 0x24d   :  { %2842 = vmatpush1.bf16.msra.mxu0 %v5574_v5  ;;  %2873 = vmatprep.mubr.bf16.mxu0 %v5994_v20  ;;  %v2670_v28 = vpop.f32.mrb[0].mxu1  ;;  %v5623_v5 = vld [vmem:[#allocation6 + $0x1a0] ss:$8 sps:$4 sm:$0xff]  }
 0x24e   :  { %4929 = vmatprep.subr.bf16.mxu0 %v5995_v24  ;;  %v2672_v29 = vpop.f32.mrb[1].mxu1  ;;  %v4977_v47 = vadd.f32 %v2670_v28, %v574_v40  ;;  %v5628_v28 = vld [vmem:[#allocation6 + $0x1b4] ss:$8 sps:$4 sm:$0xff]  }
 0x24f   :  { %v2674_v31 = vpop.f32.mrb[2].mxu1  ;;  %v4979_v49 = vadd.f32 %v2672_v29, %v578_v44  ;;  %v5626_v29 = vld [vmem:[#allocation6 + $0x1b0] ss:$8 sps:$4 sm:$0xff]   ;;  %v5640_v44 = vld [vmem:[#allocation6 + $0x1f4] ss:$8 sps:$4 sm:$0xff]  }
 0x250   :  { %v2675_v35 = vpop.f32.mrb[3].mxu1  ;;  %v5629_v31 = vld [vmem:[#allocation6 + $0x1c0] ss:$8 sps:$4 sm:$0xff]  }
 0x251   :  { %v5637_v35 = vld [vmem:[#allocation6 + $0x1e4] ss:$8 sps:$4 sm:$0xff]  }
 0x257   :  { %v2547_v36 = vpop.f32.mrb[0].mxu0 }
 0x258   :  { %v4975_v37 = vadd.f32 %v2547_v36, %v566_v14  ;;  %4672 = vmatmul.mubr.msk.bf16.vlgmr.msra.gmra.mrb[8].mxu0 %vm2386_vm0, %v5745_v38  ;;  %v2549_v39 = vpop.f32.mrb[1].mxu0  ;;  %v5631_v14 = vld [vmem:[#allocation6 + $0x1c4] ss:$8 sps:$4 sm:$0xff]  }
 0x259   :  { %v4976_v42 = vadd.f32 %v2549_v39, %v570_v32  ;;  %v2551_v43 = vpop.f32.mrb[2].mxu0  ;;  %4930 = vmatpush3.bf16.msra.mxu0 %v5592_v33  ;;  %4931 = vmatprep.mubr.msk.bf16.mxu0 %vm5996_vm1, %v5995_v24  ;;  %v5634_v32 = vld [vmem:[#allocation6 + $0x1d4] ss:$8 sps:$4 sm:$0xff]   ;;  %v590_v33 = vrot.slane %v6255_v26, %v589_v30  ;;  %v5716_v30 = vld [vmem:[#allocation9 + $0x8] sm:$0xff]  }
 0x25a   :  { %v3042_v45 = vmax.f32 %v4975_v37, 0.0  ;;  %v2552_v46 = vpop.f32.mrb[3].mxu0 }
 0x25b   :  { %v3043_v41 = vmax.f32 %v4976_v42, 0.0  ;;  %v5635_v42 = vld [vmem:[#allocation6 + $0x1e0] ss:$8 sps:$4 sm:$0xff]   ;;  %v5638_v46 = vld [vmem:[#allocation6 + $0x1f0] ss:$8 sps:$4 sm:$0xff]  }
 0x25c   :  { %v3049_v50 = vpack.c.bf16 %v3042_v45, %v3042_v45 }
 0x25d   :  { %v3050_v48 = vpack.c.bf16 %v3043_v41, %v3043_v41 }
 0x25f   :  { %v2711_v6 = vpop.f32.mrb[4].mxu0  ;;  %3772 = vmatprep.mubr.bf16.mxu1 %v3050_v48  ;;  %v5641_v48 = vld [vmem:[#allocation6 + $0x200] ss:$8 sps:$4 sm:$0xff]  }
 0x260   :  { %v6274_v23 = vadd.f32 %v4977_v47, %v2711_v6  ;;  %4932 = vmatmul.mubr.msk.bf16.vlgmr.msra.gmra.mrb[12].mxu0 %vm2386_vm0, %v5745_v38  ;;  %v2713_v52 = vpop.f32.mrb[5].mxu0  ;;  %3773 = vmatmul.mubr.bf16.vlgmr.msra.gmra.mrb[16].mxu1 %v3049_v50  ;;  %v5643_v47 = vld [vmem:[#allocation6 + $0x204] ss:$8 sps:$4 sm:$0xff]   ;;  %v5644_v50 = vld [vmem:[#allocation6 + $0x210] ss:$8 sps:$4 sm:$0xff]  }
 0x261   :  { %v4980_v11 = vadd.f32 %v4979_v49, %v2713_v52  ;;  %3782 = vmatpush1.bf16.msra.mxu1 %v5593_v1  ;;  %v2715_v53 = vpop.f32.mrb[6].mxu0  ;;  %v5646_v1 = vld [vmem:[#allocation6 + $0x214] ss:$8 sps:$4 sm:$0xff]   ;;  %v5647_v6 = vld [vmem:[#allocation6 + $0x220] ss:$8 sps:$4 sm:$0xff]  }
 0x262   :  { %v2716_v55 = vpop.f32.mrb[7].mxu0  ;;  %3783 = vmatprep.subr.bf16.mxu1 %v5598_v51  ;;  %v3044_v41 = vmax.f32 %v6274_v23, 0.0  ;;  %v5649_v51 = vld [vmem:[#allocation6 + $0x224] ss:$8 sps:$4 sm:$0xff]   ;;  %v5652_v52 = vld [vmem:[#allocation6 + $0x234] ss:$8 sps:$4 sm:$0xff]  }
 0x263   :  { %v3045_v57 = vmax.f32 %v4980_v11, 0.0  ;;  %v5650_v11 = vld [vmem:[#allocation6 + $0x230] ss:$8 sps:$4 sm:$0xff]   ;;  %v5655_v23 = vld [vmem:[#allocation6 + $0x244] ss:$8 sps:$4 sm:$0xff]  }
 0x264   :  { %v3051_v49 = vpack.c.bf16 %v3044_v41, %v3044_v41  ;;  %v5653_v53 = vld [vmem:[#allocation6 + $0x240] ss:$8 sps:$4 sm:$0xff]   ;;  %v5656_v55 = vld [vmem:[#allocation6 + $0x250] ss:$8 sps:$4 sm:$0xff]  }
 0x265   :  { %v3052_v58 = vpack.c.bf16 %v3045_v57, %v3045_v57  ;;  %3784 = vmatpush1.bf16.msra.mxu1 %v5596_v54  ;;  %v5658_v54 = vld [vmem:[#allocation6 + $0x254] ss:$8 sps:$4 sm:$0xff]   ;;  %v5661_v57 = vld [vmem:[#allocation6 + $0x264] ss:$8 sps:$4 sm:$0xff]  }
 0x266   :  { %3785 = vmatprep.subr.bf16.mxu1 %v5601_v56 }
 0x267   :  { %3813 = vmatprep.mubr.bf16.mxu1 %v3052_v58 }
 0x269   :  { %3786 = vmatpush1.bf16.msra.mxu1 %v5599_v59 }
 0x26a   :  { %3787 = vmatprep.subr.bf16.mxu1 %v5604_v60 }
 0x26d   :  { %3788 = vmatpush1.bf16.msra.mxu1 %v5602_v61  ;;  %v4837_v4 = vpop.f32.mrb[4].mxu1  ;;  %v5659_v61 = vld [vmem:[#allocation6 + $0x260] ss:$8 sps:$4 sm:$0xff]  }
 0x26e   :  { %3789 = vmatprep.subr.bf16.mxu1 %v5607_v62  ;;  %v4838_v7 = vpop.f32.mrb[5].mxu1 }
 0x26f   :  { %v4839_v8 = vadd.f32 %v4838_v7, %v4837_v4  ;;  %v4840_v9 = vpop.f32.mrb[6].mxu1  ;;  %v5665_v4 = vld [vmem:[#allocation6 + $0x280] ss:$8 sps:$4 sm:$0xff]   ;;  %v5670_v7 = vld [vmem:[#allocation6 + $0x294] ss:$8 sps:$4 sm:$0xff]  }
 0x270   :  { %v4841_v12 = vpop.f32.mrb[7].mxu1  ;;  %v5673_v9 = vld [vmem:[#allocation6 + $0x2a4] ss:$8 sps:$4 sm:$0xff]  }
 0x271   :  { %3790 = vmatpush1.bf16.msra.mxu1 %v5605_v63  ;;  %v2917_v36 = vadd.f32 %v4839_v8, %v590_v33  ;;  %v5664_v63 = vld [vmem:[#allocation6 + $0x274] ss:$8 sps:$4 sm:$0xff]   ;;  %v5668_v8 = vld [vmem:[#allocation6 + $0x290] ss:$8 sps:$4 sm:$0xff]   ;;  %v5691_v33 = vld [vmem:[#allocation6 + $0x304] ss:$8 sps:$4 sm:$0xff]  }
 0x272   :  { %3791 = vmatprep.subr.bf16.mxu1 %v5610_v0  ;;  %v5676_v12 = vld [vmem:[#allocation6 + $0x2b4] ss:$8 sps:$4 sm:$0xff]  }
 0x275   :  { %3792 = vmatpush1.bf16.msra.mxu1 %v5608_v2  ;;  %v5662_v2 = vld [vmem:[#allocation6 + $0x270] ss:$8 sps:$4 sm:$0xff]  }
 0x276   :  { %3793 = vmatprep.subr.bf16.mxu1 %v5613_v3  ;;  %v5667_v3 = vld [vmem:[#allocation6 + $0x284] ss:$8 sps:$4 sm:$0xff]  }
 0x279   :  { %3794 = vmatpush1.bf16.msra.mxu1 %v5611_v10  ;;  %v5671_v10 = vld [vmem:[#allocation6 + $0x2a0] ss:$8 sps:$4 sm:$0xff]  }
 0x27a   :  { %3795 = vmatprep.subr.bf16.mxu1 %v5616_v13  ;;  %v5674_v13 = vld [vmem:[#allocation6 + $0x2b0] ss:$8 sps:$4 sm:$0xff]  }
 0x27d   :  { %3796 = vmatpush1.bf16.msra.mxu1 %v5614_v15  ;;  %v5679_v15 = vld [vmem:[#allocation6 + $0x2c4] ss:$8 sps:$4 sm:$0xff]  }
 0x27e   :  { %3797 = vmatprep.subr.bf16.mxu1 %v5619_v16  ;;  %v5677_v16 = vld [vmem:[#allocation6 + $0x2c0] ss:$8 sps:$4 sm:$0xff]  }
 0x281   :  { %3798 = vmatpush1.bf16.msra.mxu1 %v5617_v17  ;;  %v5682_v17 = vld [vmem:[#allocation6 + $0x2d4] ss:$8 sps:$4 sm:$0xff]  }
 0x282   :  { %3799 = vmatprep.subr.bf16.mxu1 %v5622_v18  ;;  %v5680_v18 = vld [vmem:[#allocation6 + $0x2d0] ss:$8 sps:$4 sm:$0xff]  }
 0x285   :  { %3800 = vmatpush1.bf16.msra.mxu1 %v5620_v19  ;;  %v5685_v19 = vld [vmem:[#allocation6 + $0x2e4] ss:$8 sps:$4 sm:$0xff]  }
 0x286   :  { %3801 = vmatprep.subr.bf16.mxu1 %v5625_v21  ;;  %v5713_v21 = vld [vmem:[#allocation9 + $0x40] sm:$0xff]  }
 0x287   :  { %4889 = vmatprep.subr.bf16.mxu0 %v5713_v21 }
 0x289   :  { %3802 = vmatpush1.bf16.msra.mxu1 %v5623_v5  ;;  %v5714_v5 = vld [vmem:[#allocation9] sm:$0xff]  }
 0x28a   :  { %3803 = vmatprep.subr.bf16.mxu1 %v5628_v28  ;;  %v5715_v28 = vld [vmem:[#allocation9 + $0x48] sm:$0xff]   ;;  %4890 = vmatpush3.bf16.msra.mxu0 %v5714_v5 }
 0x28b   :  { %4891 = vmatprep.subr.bf16.mxu0 %v5715_v28 }
 0x28d   :  { %3804 = vmatpush1.bf16.msra.mxu1 %v5626_v29  ;;  %v4859_v37 = vpop.f32.mrb[8].mxu1  ;;  %v5683_v29 = vld [vmem:[#allocation6 + $0x2e0] ss:$8 sps:$4 sm:$0xff]  }
 0x28e   :  { %3805 = vmatprep.subr.bf16.mxu1 %v5631_v14  ;;  %v4860_v38 = vpop.f32.mrb[9].mxu1  ;;  %v5688_v14 = vld [vmem:[#allocation6 + $0x2f4] ss:$8 sps:$4 sm:$0xff]   ;;  %4892 = vmatpush3.bf16.msra.mxu0 %v5716_v30 }
 0x28f   :  { %v4861_v39 = vadd.f32 %v4860_v38, %v4859_v37  ;;  %v4862_v40 = vpop.f32.mrb[10].mxu1  ;;  %v5721_v37 = vld [vmem:[#allocation9 + $0x60] sm:$0xff]  }
 0x290   :  { %v4863_v43 = vpop.f32.mrb[11].mxu1  ;;  %v5722_v38 = vld [vmem:[#allocation9 + $0x20] sm:$0xff]   ;;  %v5724_v40 = vld [vmem:[#allocation9 + $0x28] sm:$0xff]  }
 0x291   :  { %3806 = vmatpush1.bf16.msra.mxu1 %v5629_v31  ;;  %v2957_v45 = vadd.f32 %v4861_v39, %v2917_v36  ;;  %v5717_v31 = vld [vmem:[#allocation9 + $0x50] sm:$0xff]   ;;  %v5720_v36 = vld [vmem:[#allocation9 + $0x18] sm:$0xff]   ;;  %v5723_v39 = vld [vmem:[#allocation9 + $0x68] sm:$0xff]   ;;  %v585_v43 = vsub.s32 5, %v6250_v22 }
 0x292   :  { %3807 = vmatprep.subr.bf16.mxu1 %v5634_v32  ;;  %v5686_v32 = vld [vmem:[#allocation6 + $0x2f0] ss:$8 sps:$4 sm:$0xff]   ;;  %4893 = vmatprep.subr.bf16.mxu0 %v5717_v31 }
 0x295   :  { %3808 = vmatpush1.bf16.msra.mxu1 %v5632_v34  ;;  %v5718_v34 = vld [vmem:[#allocation9 + $0x10] sm:$0xff]  }
 0x296   :  { %3809 = vmatprep.subr.bf16.mxu1 %v5637_v35  ;;  %v5719_v35 = vld [vmem:[#allocation9 + $0x58] sm:$0xff]   ;;  %4894 = vmatpush3.bf16.msra.mxu0 %v5718_v34 }
 0x297   :  { %4895 = vmatprep.subr.bf16.mxu0 %v5719_v35  ;;  %v5730_v35 = vld [vmem:[#allocation12 + $0x8] sm:$0xff]  }
 0x299   :  { %3810 = vmatpush1.bf16.msra.mxu1 %v5635_v42  ;;  %v581_v42 = vsub.s32 4, %v6250_v22  ;;  %v5731_v22 = vld [vmem:[#allocation12 + $0x10] sm:$0xff]  }
 0x29a   :  { %3811 = vmatprep.subr.bf16.mxu1 %v5640_v44  ;;  %4896 = vmatpush3.bf16.msra.mxu0 %v5720_v36  ;;  %v5734_v36 = vld [vmem:[#allocation12 + $0x28] sm:$0xff]  }
 0x29b   :  { %4897 = vmatprep.subr.bf16.mxu0 %v5721_v37  ;;  %v582_v44 = vrot.slane %v6255_v26, %v581_v42  ;;  %v5735_v37 = vld [vmem:[#allocation12 + $0x30] sm:$0xff]  }
 0x29d   :  { %3812 = vmatpush1.bf16.msra.mxu1 %v5638_v46 }
 0x29e   :  { %3822 = vmatprep.subr.bf16.mxu1 %v5643_v47  ;;  %4898 = vmatpush3.bf16.msra.mxu0 %v5722_v38  ;;  %v5736_v38 = vld [vmem:[#allocation12 + $0x38] sm:$0xff]  }
 0x29f   :  { %4899 = vmatprep.subr.bf16.mxu0 %v5723_v39 }
 0x2a0   :  { %3814 = vmatmul.mubr.bf16.vlgmr.msra.gmra.mrb[16].mxu1 %v3051_v49 }
 0x2a1   :  { %3823 = vmatpush1.bf16.msra.mxu1 %v5641_v48 }
 0x2a2   :  { %3824 = vmatprep.subr.bf16.mxu1 %v5646_v1  ;;  %4900 = vmatpush3.bf16.msra.mxu0 %v5724_v40  ;;  %v4786_v40 = vld [vmem:[#allocation10] ss:$0 sm:$0xff] }
 0x2a5   :  { %3825 = vmatpush1.bf16.msra.mxu1 %v5644_v50 }
 0x2a6   :  { %3826 = vmatprep.subr.bf16.mxu1 %v5649_v51 }
 0x2a9   :  { %3827 = vmatpush1.bf16.msra.mxu1 %v5647_v6 }
 0x2aa   :  { %3828 = vmatprep.subr.bf16.mxu1 %v5652_v52  ;;  %v5689_v52 = vld [vmem:[#allocation6 + $0x300] ss:$8 sps:$4 sm:$0xff]  }
 0x2ad   :  { %3829 = vmatpush1.bf16.msra.mxu1 %v5650_v11  ;;  %v4881_v56 = vpop.f32.mrb[12].mxu1 }
 0x2ae   :  { %3830 = vmatprep.subr.bf16.mxu1 %v5655_v23  ;;  %v4882_v58 = vpop.f32.mrb[13].mxu1  ;;  %v5694_v23 = vld [vmem:[#allocation6 + $0x314] ss:$8 sps:$4 sm:$0xff]  }
 0x2af   :  { %v4883_v59 = vadd.f32 %v4882_v58, %v4881_v56  ;;  %v4884_v60 = vpop.f32.mrb[14].mxu1 }
 0x2b0   :  { %v4885_v62 = vpop.f32.mrb[15].mxu1  ;;  %v5700_v60 = vld [vmem:[#allocation6 + $0x334] ss:$8 sps:$4 sm:$0xff]  }
 0x2b1   :  { %3831 = vmatpush1.bf16.msra.mxu1 %v5653_v53  ;;  %v6280_v0 = vadd.f32 %v4883_v59, %v2957_v45  ;;  %v586_v45 = vrot.slane %v6255_v26, %v585_v43  ;;  %v5692_v26 = vld [vmem:[#allocation6 + $0x310] ss:$8 sps:$4 sm:$0xff]   ;;  %v5695_v59 = vld [vmem:[#allocation6 + $0x320] ss:$8 sps:$4 sm:$0xff]   ;;  %v5703_v62 = vld [vmem:[#allocation6 + $0x344] ss:$8 sps:$4 sm:$0xff]  }
 0x2b2   :  { %3832 = vmatprep.subr.bf16.mxu1 %v5658_v54 }
 0x2b5   :  { %3833 = vmatpush1.bf16.msra.mxu1 %v5656_v55 }
 0x2b6   :  { %3834 = vmatprep.subr.bf16.mxu1 %v5661_v57  ;;  %v5697_v57 = vld [vmem:[#allocation6 + $0x324] ss:$8 sps:$4 sm:$0xff]  }
 0x2b9   :  { %3835 = vmatpush1.bf16.msra.mxu1 %v5659_v61  ;;  %v5698_v61 = vld [vmem:[#allocation6 + $0x330] ss:$8 sps:$4 sm:$0xff]  }
 0x2ba   :  { %3836 = vmatprep.subr.bf16.mxu1 %v5664_v63  ;;  %v5701_v63 = vld [vmem:[#allocation6 + $0x340] ss:$8 sps:$4 sm:$0xff]  }
 0x2bd   :  { %3837 = vmatpush1.bf16.msra.mxu1 %v5662_v2  ;;  %v5704_v2 = vld [vmem:[#allocation6 + $0x350] ss:$8 sps:$4 sm:$0xff]  }
 0x2be   :  { %3838 = vmatprep.subr.bf16.mxu1 %v5667_v3  ;;  %v5709_v3 = vld [vmem:[#allocation6 + $0x364] ss:$8 sps:$4 sm:$0xff]  }
 0x2c1   :  { %3839 = vmatpush1.bf16.msra.mxu1 %v5665_v4  ;;  %v5712_v4 = vld [vmem:[#allocation6 + $0x374] ss:$8 sps:$4 sm:$0xff]  }
 0x2c2   :  { %3840 = vmatprep.subr.bf16.mxu1 %v5670_v7  ;;  %v5710_v7 = vld [vmem:[#allocation6 + $0x370] ss:$8 sps:$4 sm:$0xff]  }
 0x2c5   :  { %3841 = vmatpush1.bf16.msra.mxu1 %v5668_v8 }
 0x2c6   :  { %3842 = vmatprep.subr.bf16.mxu1 %v5673_v9 }
 0x2c9   :  { %3843 = vmatpush1.bf16.msra.mxu1 %v5671_v10  ;;  %v5725_v10 = vld [vmem:[#allocation9 + $0x70] sm:$0xff]  }
 0x2ca   :  { %3844 = vmatprep.subr.bf16.mxu1 %v5676_v12  ;;  %v5726_v12 = vld [vmem:[#allocation9 + $0x30] sm:$0xff]   ;;  %4901 = vmatprep.subr.bf16.mxu0 %v5725_v10 }
 0x2cb   :  { %4902 = vmatpush3.bf16.msra.mxu0 %v5726_v12 }
 0x2cd   :  { %3845 = vmatpush1.bf16.msra.mxu1 %v5674_v13  ;;  %v5727_v13 = vld [vmem:[#allocation9 + $0x78] sm:$0xff]  }
 0x2ce   :  { %3846 = vmatprep.subr.bf16.mxu1 %v5679_v15  ;;  %v5728_v15 = vld [vmem:[#allocation9 + $0x38] sm:$0xff]   ;;  %4903 = vmatprep.subr.bf16.mxu0 %v5727_v13 }
 0x2cf   :  { %4904 = vmatpush3.bf16.msra.mxu0 %v5728_v15 }
 0x2d0   :  { %4935 = vmatprep.subr.bf16.mxu0 %v5995_v24 }
 0x2d1   :  { %3847 = vmatpush1.bf16.msra.mxu1 %v5677_v16  ;;  %v3168_v16 = vld [vmem:[#allocation7] sm:$0x3] }
 0x2d2   :  { %3848 = vmatprep.subr.bf16.mxu1 %v5682_v17  ;;  %v3173_v17 = vrot.slane %v3168_v16, %v565_v25  ;;  %v5732_v25 = vld [vmem:[#allocation12 + $0x18] sm:$0xff]  }
 0x2d5   :  { %3849 = vmatpush1.bf16.msra.mxu1 %v5680_v18  ;;  %v3177_v18 = vrot.slane %v3168_v16, %v569_v27  ;;  %v5733_v27 = vld [vmem:[#allocation12 + $0x20] sm:$0xff]  }
 0x2d6   :  { %3850 = vmatprep.subr.bf16.mxu1 %v5685_v19 }
 0x2d9   :  { %3851 = vmatpush1.bf16.msra.mxu1 %v5683_v29 }
 0x2da   :  { %3852 = vmatprep.subr.bf16.mxu1 %v5688_v14 }
 0x2dd   :  { %3853 = vmatpush1.bf16.msra.mxu1 %v5686_v32 }
 0x2de   :  { %3863 = vmatprep.subr.bf16.mxu1 %v5691_v33  ;;  %v5729_v33 = vld [vmem:[#allocation12] sm:$0xff]  }
 0x32b   :  { %v2875_v46 = vpop.f32.mrb[8].mxu0 }
 0x32c   :  { %v4981_v41 = vadd.f32 %v2875_v46, %v582_v44  ;;  %v2877_v47 = vpop.f32.mrb[9].mxu0 }
 0x32d   :  { %v4982_v48 = vadd.f32 %v2877_v47, %v586_v45  ;;  %v2879_v49 = vpop.f32.mrb[10].mxu0  ;;  %v5737_v47 = vld [vmem:[#allocation15] sm:$0xff]  }
 0x32e   :  { %v3046_v1 = vmax.f32 %v4981_v41, 0.0  ;;  %v2880_v50 = vpop.f32.mrb[11].mxu0  ;;  %v5738_v49 = vld [vmem:[#allocation15 + $0x8] sm:$0xff]  }
 0x32f   :  { %v3047_v51 = vmax.f32 %v4982_v48, 0.0  ;;  %v5740_v50 = vld [vmem:[#allocation15 + $0x18] sm:$0xff]  }
 0x330   :  { %v3053_v11 = vpack.c.bf16 %v3046_v1, %v3046_v1  ;;  %v5739_v1 = vld [vmem:[#allocation15 + $0x10] sm:$0xff]  }
 0x331   :  { %v3054_v6 = vpack.c.bf16 %v3047_v51, %v3047_v51  ;;  %v5741_v51 = vld [vmem:[#allocation15 + $0x20] sm:$0xff]  }
 0x333   :  { %v3036_v53 = vpop.f32.mrb[12].mxu0  ;;  %3854 = vmatprep.mubr.bf16.mxu1 %v3054_v6  ;;  %v5742_v6 = vld [vmem:[#allocation15 + $0x28] sm:$0xff]  }
 0x334   :  { %v3037_v54 = vadd.f32 %v3036_v53, %v6280_v0  ;;  %3855 = vmatmul.mubr.bf16.vlgmr.msra.gmra.mrb[16].mxu1 %v3053_v11  ;;  %v4933_v55 = vpop.f32.mrb[13].mxu0  ;;  %v5706_v0 = vld [vmem:[#allocation6 + $0x354] ss:$8 sps:$4 sm:$0xff]  }
 0x335   :  { %3864 = vmatpush1.bf16.msra.mxu1 %v5689_v52  ;;  %v3039_v56 = vpop.f32.mrb[14].mxu0  ;;  %3895 = vmatprep.mubr.bf16.mxu1 %v5994_v20  ;;  %v5707_v20 = vld [vmem:[#allocation6 + $0x360] ss:$8 sps:$4 sm:$0xff]   ;;  %v5743_v52 = vld [vmem:[#allocation15 + $0x30] sm:$0xff]  }
 0x336   :  { %3865 = vmatprep.subr.bf16.mxu1 %v5694_v23  ;;  %v4934_v58 = vpop.f32.mrb[15].mxu0  ;;  %v3048_v8 = vmax.f32 %v3037_v54, 0.0  ;;  %v5744_v11 = vld [vmem:[#allocation15 + $0x38] sm:$0xff]  }
 0x337   :  { %v4803_v23 = vld [vmem:[#allocation13] ss:$0 sm:$0xff] }
 0x338   :  { %v3055_v9 = vpack.c.bf16 %v3048_v8, %v3048_v8 }
 0x339   :  { %3866 = vmatpush1.bf16.msra.mxu1 %v5692_v26 }
 0x33a   :  { %3867 = vmatprep.subr.bf16.mxu1 %v5697_v57 }
 0x33d   :  { %3868 = vmatpush1.bf16.msra.mxu1 %v5695_v59  ;;  %v4812_v59 = vld [vmem:[#allocation16] ss:$0 sm:$0xff] }
 0x33e   :  { %3869 = vmatprep.subr.bf16.mxu1 %v5700_v60 }
 0x341   :  { %3870 = vmatpush1.bf16.msra.mxu1 %v5698_v61 }
 0x342   :  { %3871 = vmatprep.subr.bf16.mxu1 %v5703_v62 }
 0x345   :  { %3872 = vmatpush1.bf16.msra.mxu1 %v5701_v63 }
 0x346   :  { %3873 = vmatprep.subr.bf16.mxu1 %v5706_v0 }
 0x349   :  { %3874 = vmatpush1.bf16.msra.mxu1 %v5704_v2 }
 0x34a   :  { %3875 = vmatprep.subr.bf16.mxu1 %v5709_v3 }
 0x34d   :  { %3876 = vmatpush1.bf16.msra.mxu1 %v5707_v20 }
 0x34e   :  { %3877 = vmatprep.subr.bf16.mxu1 %v5712_v4 }
 0x351   :  { %3878 = vmatpush1.bf16.msra.mxu1 %v5710_v7 }
 0x354   :  { %3896 = vmatmul.mubr.bf16.vlgmr.msra.gmra.mrb[16].mxu1 %v3055_v9 }
 0x427   :  { %v3897_v19 = vpop.f32.mrb[16].mxu1 }
 0x428   :  { %v4983_v21 = vadd.f32 %v3897_v19, %v3173_v17  ;;  %v3899_v5 = vpop.f32.mrb[17].mxu1 }
 0x429   :  { %v4984_v28 = vadd.f32 %v3899_v5, %v3177_v18  ;;  %v3901_v29 = vpop.f32.mrb[18].mxu1 }
 0x42a   :  { %v3904_v14 = vmax.f32 %v4983_v21, 0.0  ;;  %v3902_v30 = vpop.f32.mrb[19].mxu1 }
 0x42b   :  { %v3905_v31 = vmax.f32 %v4984_v28, 0.0 }
 0x42c   :  { %v3906_v34 = vpack.c.bf16 %v3904_v14, %v3904_v14 }
 0x42d   :  { %v3907_v32 = vpack.c.bf16 %v3905_v31, %v3905_v31 }
 0x42f   :  { %4075 = vmatprep.mubr.bf16.mxu0 %v3907_v32 }
 0x430   :  { %4076 = vmatmul.mubr.bf16.vlgmr.msra.gmra.mrb[16].mxu0 %v3906_v34 }
 0x431   :  { %4936 = vmatpush3.bf16.msra.mxu0 %v5729_v33  ;;  %4951 = vmatprep.mubr.msk.bf16.mxu0 %vm5996_vm1, %v5995_v24 }
 0x432   :  { %4937 = vmatprep.subr.bf16.mxu0 %v5995_v24 }
 0x435   :  { %4938 = vmatpush3.bf16.msra.mxu0 %v5730_v35 }
 0x436   :  { %4939 = vmatprep.subr.bf16.mxu0 %v5995_v24 }
 0x439   :  { %4940 = vmatpush3.bf16.msra.mxu0 %v5731_v22 }
 0x43a   :  { %4941 = vmatprep.subr.bf16.mxu0 %v5995_v24 }
 0x43d   :  { %4942 = vmatpush3.bf16.msra.mxu0 %v5732_v25 }
 0x43e   :  { %4943 = vmatprep.subr.bf16.mxu0 %v5995_v24 }
 0x441   :  { %4944 = vmatpush3.bf16.msra.mxu0 %v5733_v27 }
 0x442   :  { %4945 = vmatprep.subr.bf16.mxu0 %v5995_v24 }
 0x445   :  { %4946 = vmatpush3.bf16.msra.mxu0 %v5734_v36 }
 0x446   :  { %4947 = vmatprep.subr.bf16.mxu0 %v5995_v24 }
 0x449   :  { %4948 = vmatpush3.bf16.msra.mxu0 %v5735_v37 }
 0x44a   :  { %4949 = vmatprep.subr.bf16.mxu0 %v5995_v24 }
 0x44d   :  { %4950 = vmatpush3.bf16.msra.mxu0 %v5736_v38 }
 0x44e   :  { %4955 = vmatprep.subr.bf16.mxu0 %v5995_v24 }
 0x503   :  { %v4905_v39 = vpop.f32.mrb[16].mxu0 }
 0x504   :  { %v4906_v42 = vpop.f32.mrb[17].mxu0 }
 0x505   :  { %v4907_v43 = vadd.f32 %v4906_v42, %v4905_v39  ;;  %v4908_v44 = vpop.f32.mrb[18].mxu0 }
 0x506   :  { %v4909_v45 = vpop.f32.mrb[19].mxu0 }
 0x507   :  { %v4078_v46 = vadd.f32 %v4907_v43, %v4786_v40 }
 0x509   :  { %v4083_v41 = vmax.f32 %v4078_v46, 0.0 }
 0x50b   :  { %v4084_v48 = vpack.c.bf16 %v4083_v41, %v4083_v41 }
 0x50d   :  { %4952 = vmatmul.mubr.bf16.vlgmr.msra.gmra.mrb[20].mxu0 %v4084_v48 }
 0x50e   :  { %4956 = vmatpush3.bf16.msra.mxu0 %v5737_v47  ;;  %4971 = vmatprep.mubr.msk.bf16.mxu0 %vm5996_vm1, %v5995_v24 }
 0x50f   :  { %4957 = vmatprep.subr.bf16.mxu0 %v5995_v24 }
 0x512   :  { %4958 = vmatpush3.bf16.msra.mxu0 %v5738_v49 }
 0x513   :  { %4959 = vmatprep.subr.bf16.mxu0 %v5995_v24 }
 0x516   :  { %4960 = vmatpush3.bf16.msra.mxu0 %v5739_v1 }
 0x517   :  { %4961 = vmatprep.subr.bf16.mxu0 %v5995_v24 }
 0x51a   :  { %4962 = vmatpush3.bf16.msra.mxu0 %v5740_v50 }
 0x51b   :  { %4963 = vmatprep.subr.bf16.mxu0 %v5995_v24 }
 0x51e   :  { %4964 = vmatpush3.bf16.msra.mxu0 %v5741_v51 }
 0x51f   :  { %4965 = vmatprep.subr.bf16.mxu0 %v5995_v24 }
 0x522   :  { %4966 = vmatpush3.bf16.msra.mxu0 %v5742_v6 }
 0x523   :  { %4967 = vmatprep.subr.bf16.mxu0 %v5995_v24 }
 0x526   :  { %4968 = vmatpush3.bf16.msra.mxu0 %v5743_v52 }
 0x527   :  { %4969 = vmatprep.subr.bf16.mxu0 %v5995_v24 }
 0x52a   :  { %4970 = vmatpush3.bf16.msra.mxu0 %v5744_v11 }
 0x5e0   :  { %v4190_v53 = vpop.f32.mrb[20].mxu0 }
 0x5e1   :  { %v4191_v54 = vadd.f32 %v4803_v23, %v4190_v53  ;;  %v4953_v55 = vpop.f32.mrb[21].mxu0 }
 0x5e2   :  { %v4193_v26 = vpop.f32.mrb[22].mxu0 }
 0x5e3   :  { %v4196_v56 = vmax.f32 %v4191_v54, 0.0  ;;  %v4954_v57 = vpop.f32.mrb[23].mxu0 }
 0x5e5   :  { %v4197_v58 = vpack.c.bf16 %v4196_v56, %v4196_v56 }
 0x5e7   :  { %4972 = vmatmul.mubr.bf16.vlgmr.msra.gmra.mrb[24].mxu0 %v4197_v58 }
 0x6ba   :  { %v4303_v60 = vpop.f32.mrb[24].mxu0 }
 0x6bb   :  { %v4304_v61 = vadd.f32 %v4812_v59, %v4303_v60  ;;  %v4973_v62 = vpop.f32.mrb[25].mxu0 }
 0x6bc   :  { %v4306_v63 = vpop.f32.mrb[26].mxu0 }
 0x6bd   :  { %4309 = vst [vmem:[%s6326_s11] sm:$0xff] %v4304_v61  ;;  %v4974_v24 = vpop.f32.mrb[27].mxu0 }
 0x6be   :  { %4314 = vsyncpa [#allocation3], 1 }
 0x6bf   :  { %4315 = vsyncpa [#allocation5], 1 }
 0x6c0   :  { %4316 = vsyncpa [#allocation8], 1 }
 0x6c1   :  { %4317 = vsyncpa [#allocation11], 1 }
 0x6c2   :  { %4318 = vsyncpa [#allocation14], 1 }
 0x6c3   :  { %4319 = vsyncpa [#allocation17], 1 }

</bundles_post_ra>
